<compile_context>
chip_gen: v7x
topology: tpu7x:2x2x1
jax: 0.10.0
libtpu: 0.0.40
codegen_flags: <defaults>
</compile_context>

<pallas_src>
import functools

import numpy as np
import jax
import jax.numpy as jnp
from jax.experimental import pallas as pl
from jax.experimental.pallas import tpu as pltpu


# ---------------------------------------------------------------------------
# Schedule construction (host-side numpy — mirrors the PyTorch __init__)
# ---------------------------------------------------------------------------
def cosine_beta_schedule(timesteps, s=0.008, raise_to_power: float = 1):
    steps = timesteps + 2
    x = np.linspace(0, steps, steps)
    alphas_cumprod = np.cos((x / steps + s) / (1 + s) * np.pi * 0.5) ** 2
    alphas_cumprod = alphas_cumprod / alphas_cumprod[0]
    betas = 1 - alphas_cumprod[1:] / alphas_cumprod[:-1]
    betas = np.clip(betas, a_min=0, a_max=0.999)
    alphas = 1.0 - betas
    alphas_cumprod = np.cumprod(alphas, axis=0)
    if raise_to_power != 1:
        alphas_cumprod = np.power(alphas_cumprod, raise_to_power)
    return alphas_cumprod


def clip_noise_schedule(alphas2, clip_value=0.001):
    alphas2 = np.concatenate([np.ones(1), alphas2], axis=0)
    alphas_step = alphas2[1:] / alphas2[:-1]
    alphas_step = np.clip(alphas_step, a_min=clip_value, a_max=1.0)
    alphas2 = np.cumprod(alphas_step, axis=0)
    return alphas2


def polynomial_schedule(timesteps: int, s=0.0001, power=3.0):
    steps = timesteps + 1
    x = np.linspace(0, steps, steps)
    alphas2 = (1 - np.power(x / steps, power)) ** 2
    alphas2 = clip_noise_schedule(alphas2, clip_value=0.001)
    precision = 1 - 2 * s
    alphas2 = precision * alphas2 + s
    return alphas2


def _round_up(n: int, m: int) -> int:
    return ((n + m - 1) // m) * m


def build_gamma_table(noise_schedule: str, timesteps: int, precision: float) -> np.ndarray:
    """Deterministic 'parameter' init — identical to PredefinedNoiseSchedule.__init__."""
    if noise_schedule == "cosine":
        alphas2 = cosine_beta_schedule(timesteps)
    elif "polynomial" in noise_schedule:
        splits = noise_schedule.split("_")
        assert len(splits) == 2
        power = float(splits[1])
        alphas2 = polynomial_schedule(timesteps, s=precision, power=power)
    else:
        raise ValueError(noise_schedule)
    sigmas2 = 1 - alphas2
    log_alphas2 = np.log(alphas2)
    log_sigmas2 = np.log(sigmas2)
    log_alphas2_to_sigmas2 = log_alphas2 - log_sigmas2
    gamma = (-log_alphas2_to_sigmas2).astype(np.float32)  # shape (timesteps + 1,)
    return gamma


def build_padded_gamma_table(noise_schedule: str, timesteps: int,
                             precision: float) -> jax.Array:
    """Build gamma once and pre-pad to a lane-aligned (1, Gp) slab on device."""
    gamma = build_gamma_table(noise_schedule, timesteps, precision)  # (T + 1,)
    g = gamma.shape[0]
    gp = max(128, _round_up(g, 128))
    gamma_pad = np.zeros((1, gp), np.float32)
    gamma_pad[0, :g] = gamma
    return jnp.asarray(gamma_pad)


# ---------------------------------------------------------------------------
# Pallas kernel: round + clamp + chunked one-hot table gather
# ---------------------------------------------------------------------------
_TABLE_CHUNK = 128   # rows of the gamma table processed per accumulation step


def _gamma_lookup_kernel(t_ref, gamma_ref, out_ref, *, timesteps: int):
    # t_ref:     (1, Bb) f32   -- lane-major block of t values in [0, 1]
    # gamma_ref: (1, Gp) f32   -- full gamma table (zero-padded, VMEM-pinned)
    # out_ref:   (1, Bb) f32
    t = t_ref[...]                                               # (1, Bb)
    bb = t.shape[1]
    gp = gamma_ref.shape[1]
    n_chunks = gp // _TABLE_CHUNK

    # t_int = round(t * timesteps)  (round-half-to-even, same as torch.round),
    # clamped so out-of-range t cannot read the zero-padded table tail.
    idx = jnp.round(t * jnp.float32(timesteps)).astype(jnp.int32)
    idx = jnp.clip(idx, 0, timesteps)                            # (1, Bb)

    # Hoisted: built once, reused by every chunk (JAX does not CSE broadcasts).
    base_iota = jax.lax.broadcasted_iota(jnp.int32, (_TABLE_CHUNK, bb), 0)

    def body(c, acc):
        g0 = pl.multiple_of(c * _TABLE_CHUNK, _TABLE_CHUNK)
        gamma_c = gamma_ref[:, pl.ds(g0, _TABLE_CHUNK)]          # (1, chunk)
        onehot = (base_iota == (idx - g0)).astype(jnp.float32)   # (chunk, Bb)
        # One small MXU push per chunk; HIGHEST precision keeps the gathered
        # f32 gamma value exact (default precision decomposes to bf16).
        return acc + jnp.dot(gamma_c, onehot,
                             preferred_element_type=jnp.float32,
                             precision=jax.lax.Precision.HIGHEST)

    acc = jax.lax.fori_loop(0, n_chunks, body,
                            jnp.zeros((1, bb), jnp.float32), unroll=True)
    out_ref[...] = acc


def predefined_noise_schedule_forward(t: jax.Array,
                                      gamma_table_padded: jax.Array,
                                      timesteps: int) -> jax.Array:
    """Equivalent of PredefinedNoiseSchedule.forward(t) -> gamma[round(t*T)].

    `gamma_table_padded` is the (1, Gp) slab from build_padded_gamma_table.
    """
    orig_shape = t.shape
    t_flat = t.reshape(-1).astype(jnp.float32)
    b = t_flat.shape[0]

    # 256-lane blocks once the batch is big enough (fills v6e/v7x MXU N width,
    # halves grid-step overhead); 128 otherwise (keeps >=1 step, already fills
    # a v5e MXU tile and keeps the one-hot live set small).
    block_b = 256 if b > 256 else 128
    bp = _round_up(max(b, 1), block_b)

    # Single pad op; tail lanes produce gamma[clamp(round(0*T))] = gamma[0]
    # and are sliced off below.
    t_pad = jnp.pad(t_flat, (0, bp - b))[None, :]                # (1, bp)

    gp = gamma_table_padded.shape[1]
    assert gp % _TABLE_CHUNK == 0
    n_b_blocks = bp // block_b

    out = pl.pallas_call(
        functools.partial(_gamma_lookup_kernel, timesteps=timesteps),
        out_shape=jax.ShapeDtypeStruct((1, bp), jnp.float32),
        grid_spec=pl.GridSpec(
            grid=(n_b_blocks,),
            in_specs=[
                pl.BlockSpec((1, block_b), lambda i: (0, i)),    # t block
                pl.BlockSpec((1, gp), lambda i: (0, 0)),         # gamma (pinned)
            ],
            out_specs=pl.BlockSpec((1, block_b), lambda i: (0, i)),
        ),
        compiler_params=pltpu.CompilerParams(
            dimension_semantics=("parallel",)),
    )(t_pad, gamma_table_padded)

    return out[0, :b].reshape(orig_shape)


# ---------------------------------------------------------------------------
# Demo / self-check
# ---------------------------------------------------------------------------
if __name__ == "__main__":
    timesteps = 1000
    noise_schedule = "polynomial_2"
    precision = 1e-5

    # Built and padded once ("non-learned parameter").
    gamma_padded = build_padded_gamma_table(noise_schedule, timesteps, precision)
    gamma_np = build_gamma_table(noise_schedule, timesteps, precision)      # (1001,)
    gamma_table = jnp.asarray(gamma_np)

    # t in [0, 1], shape (batch, 1) as used in en_diffusion (e.g. t = t_int / T)
    key = jax.random.PRNGKey(0)
    batch = 8
    t_small = jax.random.uniform(key, (batch, 1), dtype=jnp.float32)

    out_small = jax.block_until_ready(
        predefined_noise_schedule_forward(t_small, gamma_padded, timesteps))
    ref_idx = jnp.round(t_small * timesteps).astype(jnp.int32)
    ref_small = gamma_table[ref_idx[..., 0]][..., None]
    assert out_small.shape == t_small.shape, (out_small.shape, t_small.shape)
    np.testing.assert_allclose(np.asarray(out_small), np.asarray(ref_small),
                               rtol=1e-6, atol=1e-6)

    # Second check: multi-block grid (256-lane blocks, 2 grid steps) and both
    # table endpoints (t=0 -> gamma[0], t=1 -> gamma[timesteps]).
    t_big = jnp.linspace(0.0, 1.0, 260, dtype=jnp.float32)
    out_big = jax.block_until_ready(
        predefined_noise_schedule_forward(t_big, gamma_padded, timesteps))
    ref_big = gamma_table[jnp.round(t_big * timesteps).astype(jnp.int32)]
    assert out_big.shape == t_big.shape
    np.testing.assert_allclose(np.asarray(out_big), np.asarray(ref_big),
                               rtol=1e-6, atol=1e-6)

    print("KERNEL_OK")
</pallas_src>

<mosaic_0001>
module attributes {stable_mosaic.version = 11 : i64} {
  func.func @_gamma_lookup_kernel(%arg0: i32, %arg1: memref<1x128xf32, #tpu.memory_space<vmem>>, %arg2: memref<1x1024xf32, #tpu.memory_space<vmem>>, %arg3: memref<1x128xf32, #tpu.memory_space<vmem>>) attributes {dimension_semantics = [#tpu.dimension_semantics<parallel>], iteration_bounds = array<i64: 1>, scalar_prefetch = 0 : i64, scratch_operands = 0 : i64, tpu.core_type = #tpu.core_type<tc>, window_params = [{transform_indices = @transform_0, window_bounds = array<i64: 1, 128>}, {pipeline_mode = #tpu.pipeline_mode<synchronous>, transform_indices = @transform_1, window_bounds = array<i64: 1, 1024>}, {transform_indices = @transform_2, window_bounds = array<i64: 1, 128>}]} {
    %c0 = arith.constant 0 : index
    %c0_0 = arith.constant 0 : index
    %0 = vector.load %arg1[%c0, %c0_0] : memref<1x128xf32, #tpu.memory_space<vmem>>, vector<1x128xf32>
    %cst = arith.constant 1.000000e+03 : f32
    %1 = vector.broadcast %cst : f32 to vector<1x128xf32>
    %2 = arith.mulf %0, %1 : vector<1x128xf32>
    %3 = math.roundeven %2 : vector<1x128xf32>
    %4 = arith.fptosi %3 : vector<1x128xf32> to vector<1x128xi32>
    %c0_i32 = arith.constant 0 : i32
    %c1000_i32 = arith.constant 1000 : i32
    %5 = vector.broadcast %c0_i32 : i32 to vector<1x128xi32>
    %6 = arith.maxsi %5, %4 : vector<1x128xi32>
    %7 = vector.broadcast %c1000_i32 : i32 to vector<1x128xi32>
    %8 = arith.minsi %7, %6 : vector<1x128xi32>
    %9 = tpu.iota {dimensions = array<i32: 0>} : vector<128x128xi32>
    %cst_1 = arith.constant 0.000000e+00 : f32
    %10 = vector.broadcast %cst_1 : f32 to vector<1x128xf32>
    %c0_i32_2 = arith.constant 0 : i32
    %c128_i32 = arith.constant 128 : i32
    %11 = arith.muli %c0_i32_2, %c128_i32 : i32
    %12 = tpu.assume_multiple %11, 128 : i32
    %c0_3 = arith.constant 0 : index
    %13 = arith.index_cast %12 : i32 to index
    %14 = vector.load %arg2[%c0_3, %13] : memref<1x1024xf32, #tpu.memory_space<vmem>>, vector<1x128xf32>
    %15 = vector.broadcast %12 : i32 to vector<1x128xi32>
    %16 = arith.subi %8, %15 : vector<1x128xi32>
    %17 = vector.broadcast %16 : vector<1x128xi32> to vector<128x128xi32>
    %18 = arith.cmpi eq, %9, %17 : vector<128x128xi32>
    %19 = arith.extui %18 : vector<128x128xi1> to vector<128x128xi32>
    %20 = arith.sitofp %19 : vector<128x128xi32> to vector<128x128xf32>
    %cst_4 = arith.constant dense<0.000000e+00> : vector<1x128xf32>
    %21 = tpu.matmul %14, %20, %cst_4 {dimension_numbers = #tpu.dot_dimension_numbers<[1], [0], [0], [1], [0, 0, 1, 1], [], []>, precision = #tpu.contract_precision<fp32>} : vector<1x128xf32>, vector<128x128xf32>, vector<1x128xf32> -> vector<1x128xf32>
    %22 = arith.addf %10, %21 : vector<1x128xf32>
    %c1_i32 = arith.constant 1 : i32
    %c128_i32_5 = arith.constant 128 : i32
    %23 = arith.muli %c1_i32, %c128_i32_5 : i32
    %24 = tpu.assume_multiple %23, 128 : i32
    %c0_6 = arith.constant 0 : index
    %25 = arith.index_cast %24 : i32 to index
    %26 = vector.load %arg2[%c0_6, %25] : memref<1x1024xf32, #tpu.memory_space<vmem>>, vector<1x128xf32>
    %27 = vector.broadcast %24 : i32 to vector<1x128xi32>
    %28 = arith.subi %8, %27 : vector<1x128xi32>
    %29 = vector.broadcast %28 : vector<1x128xi32> to vector<128x128xi32>
    %30 = arith.cmpi eq, %9, %29 : vector<128x128xi32>
    %31 = arith.extui %30 : vector<128x128xi1> to vector<128x128xi32>
    %32 = arith.sitofp %31 : vector<128x128xi32> to vector<128x128xf32>
    %cst_7 = arith.constant dense<0.000000e+00> : vector<1x128xf32>
    %33 = tpu.matmul %26, %32, %cst_7 {dimension_numbers = #tpu.dot_dimension_numbers<[1], [0], [0], [1], [0, 0, 1, 1], [], []>, precision = #tpu.contract_precision<fp32>} : vector<1x128xf32>, vector<128x128xf32>, vector<1x128xf32> -> vector<1x128xf32>
    %34 = arith.addf %22, %33 : vector<1x128xf32>
    %c2_i32 = arith.constant 2 : i32
    %c128_i32_8 = arith.constant 128 : i32
    %35 = arith.muli %c2_i32, %c128_i32_8 : i32
    %36 = tpu.assume_multiple %35, 128 : i32
    %c0_9 = arith.constant 0 : index
    %37 = arith.index_cast %36 : i32 to index
    %38 = vector.load %arg2[%c0_9, %37] : memref<1x1024xf32, #tpu.memory_space<vmem>>, vector<1x128xf32>
    %39 = vector.broadcast %36 : i32 to vector<1x128xi32>
    %40 = arith.subi %8, %39 : vector<1x128xi32>
    %41 = vector.broadcast %40 : vector<1x128xi32> to vector<128x128xi32>
    %42 = arith.cmpi eq, %9, %41 : vector<128x128xi32>
    %43 = arith.extui %42 : vector<128x128xi1> to vector<128x128xi32>
    %44 = arith.sitofp %43 : vector<128x128xi32> to vector<128x128xf32>
    %cst_10 = arith.constant dense<0.000000e+00> : vector<1x128xf32>
    %45 = tpu.matmul %38, %44, %cst_10 {dimension_numbers = #tpu.dot_dimension_numbers<[1], [0], [0], [1], [0, 0, 1, 1], [], []>, precision = #tpu.contract_precision<fp32>} : vector<1x128xf32>, vector<128x128xf32>, vector<1x128xf32> -> vector<1x128xf32>
    %46 = arith.addf %34, %45 : vector<1x128xf32>
    %c3_i32 = arith.constant 3 : i32
    %c128_i32_11 = arith.constant 128 : i32
    %47 = arith.muli %c3_i32, %c128_i32_11 : i32
    %48 = tpu.assume_multiple %47, 128 : i32
    %c0_12 = arith.constant 0 : index
    %49 = arith.index_cast %48 : i32 to index
    %50 = vector.load %arg2[%c0_12, %49] : memref<1x1024xf32, #tpu.memory_space<vmem>>, vector<1x128xf32>
    %51 = vector.broadcast %48 : i32 to vector<1x128xi32>
    %52 = arith.subi %8, %51 : vector<1x128xi32>
    %53 = vector.broadcast %52 : vector<1x128xi32> to vector<128x128xi32>
    %54 = arith.cmpi eq, %9, %53 : vector<128x128xi32>
    %55 = arith.extui %54 : vector<128x128xi1> to vector<128x128xi32>
    %56 = arith.sitofp %55 : vector<128x128xi32> to vector<128x128xf32>
    %cst_13 = arith.constant dense<0.000000e+00> : vector<1x128xf32>
    %57 = tpu.matmul %50, %56, %cst_13 {dimension_numbers = #tpu.dot_dimension_numbers<[1], [0], [0], [1], [0, 0, 1, 1], [], []>, precision = #tpu.contract_precision<fp32>} : vector<1x128xf32>, vector<128x128xf32>, vector<1x128xf32> -> vector<1x128xf32>
    %58 = arith.addf %46, %57 : vector<1x128xf32>
    %c4_i32 = arith.constant 4 : i32
    %c128_i32_14 = arith.constant 128 : i32
    %59 = arith.muli %c4_i32, %c128_i32_14 : i32
    %60 = tpu.assume_multiple %59, 128 : i32
    %c0_15 = arith.constant 0 : index
    %61 = arith.index_cast %60 : i32 to index
    %62 = vector.load %arg2[%c0_15, %61] : memref<1x1024xf32, #tpu.memory_space<vmem>>, vector<1x128xf32>
    %63 = vector.broadcast %60 : i32 to vector<1x128xi32>
    %64 = arith.subi %8, %63 : vector<1x128xi32>
    %65 = vector.broadcast %64 : vector<1x128xi32> to vector<128x128xi32>
    %66 = arith.cmpi eq, %9, %65 : vector<128x128xi32>
    %67 = arith.extui %66 : vector<128x128xi1> to vector<128x128xi32>
    %68 = arith.sitofp %67 : vector<128x128xi32> to vector<128x128xf32>
    %cst_16 = arith.constant dense<0.000000e+00> : vector<1x128xf32>
    %69 = tpu.matmul %62, %68, %cst_16 {dimension_numbers = #tpu.dot_dimension_numbers<[1], [0], [0], [1], [0, 0, 1, 1], [], []>, precision = #tpu.contract_precision<fp32>} : vector<1x128xf32>, vector<128x128xf32>, vector<1x128xf32> -> vector<1x128xf32>
    %70 = arith.addf %58, %69 : vector<1x128xf32>
    %c5_i32 = arith.constant 5 : i32
    %c128_i32_17 = arith.constant 128 : i32
    %71 = arith.muli %c5_i32, %c128_i32_17 : i32
    %72 = tpu.assume_multiple %71, 128 : i32
    %c0_18 = arith.constant 0 : index
    %73 = arith.index_cast %72 : i32 to index
    %74 = vector.load %arg2[%c0_18, %73] : memref<1x1024xf32, #tpu.memory_space<vmem>>, vector<1x128xf32>
    %75 = vector.broadcast %72 : i32 to vector<1x128xi32>
    %76 = arith.subi %8, %75 : vector<1x128xi32>
    %77 = vector.broadcast %76 : vector<1x128xi32> to vector<128x128xi32>
    %78 = arith.cmpi eq, %9, %77 : vector<128x128xi32>
    %79 = arith.extui %78 : vector<128x128xi1> to vector<128x128xi32>
    %80 = arith.sitofp %79 : vector<128x128xi32> to vector<128x128xf32>
    %cst_19 = arith.constant dense<0.000000e+00> : vector<1x128xf32>
    %81 = tpu.matmul %74, %80, %cst_19 {dimension_numbers = #tpu.dot_dimension_numbers<[1], [0], [0], [1], [0, 0, 1, 1], [], []>, precision = #tpu.contract_precision<fp32>} : vector<1x128xf32>, vector<128x128xf32>, vector<1x128xf32> -> vector<1x128xf32>
    %82 = arith.addf %70, %81 : vector<1x128xf32>
    %c6_i32 = arith.constant 6 : i32
    %c128_i32_20 = arith.constant 128 : i32
    %83 = arith.muli %c6_i32, %c128_i32_20 : i32
    %84 = tpu.assume_multiple %83, 128 : i32
    %c0_21 = arith.constant 0 : index
    %85 = arith.index_cast %84 : i32 to index
    %86 = vector.load %arg2[%c0_21, %85] : memref<1x1024xf32, #tpu.memory_space<vmem>>, vector<1x128xf32>
    %87 = vector.broadcast %84 : i32 to vector<1x128xi32>
    %88 = arith.subi %8, %87 : vector<1x128xi32>
    %89 = vector.broadcast %88 : vector<1x128xi32> to vector<128x128xi32>
    %90 = arith.cmpi eq, %9, %89 : vector<128x128xi32>
    %91 = arith.extui %90 : vector<128x128xi1> to vector<128x128xi32>
    %92 = arith.sitofp %91 : vector<128x128xi32> to vector<128x128xf32>
    %cst_22 = arith.constant dense<0.000000e+00> : vector<1x128xf32>
    %93 = tpu.matmul %86, %92, %cst_22 {dimension_numbers = #tpu.dot_dimension_numbers<[1], [0], [0], [1], [0, 0, 1, 1], [], []>, precision = #tpu.contract_precision<fp32>} : vector<1x128xf32>, vector<128x128xf32>, vector<1x128xf32> -> vector<1x128xf32>
    %94 = arith.addf %82, %93 : vector<1x128xf32>
    %c7_i32 = arith.constant 7 : i32
    %c128_i32_23 = arith.constant 128 : i32
    %95 = arith.muli %c7_i32, %c128_i32_23 : i32
    %96 = tpu.assume_multiple %95, 128 : i32
    %c0_24 = arith.constant 0 : index
    %97 = arith.index_cast %96 : i32 to index
    %98 = vector.load %arg2[%c0_24, %97] : memref<1x1024xf32, #tpu.memory_space<vmem>>, vector<1x128xf32>
    %99 = vector.broadcast %96 : i32 to vector<1x128xi32>
    %100 = arith.subi %8, %99 : vector<1x128xi32>
    %101 = vector.broadcast %100 : vector<1x128xi32> to vector<128x128xi32>
    %102 = arith.cmpi eq, %9, %101 : vector<128x128xi32>
    %103 = arith.extui %102 : vector<128x128xi1> to vector<128x128xi32>
    %104 = arith.sitofp %103 : vector<128x128xi32> to vector<128x128xf32>
    %cst_25 = arith.constant dense<0.000000e+00> : vector<1x128xf32>
    %105 = tpu.matmul %98, %104, %cst_25 {dimension_numbers = #tpu.dot_dimension_numbers<[1], [0], [0], [1], [0, 0, 1, 1], [], []>, precision = #tpu.contract_precision<fp32>} : vector<1x128xf32>, vector<128x128xf32>, vector<1x128xf32> -> vector<1x128xf32>
    %106 = arith.addf %94, %105 : vector<1x128xf32>
    %c8_i32 = arith.constant 8 : i32
    %c0_26 = arith.constant 0 : index
    %c0_27 = arith.constant 0 : index
    %107 = vector.load %arg3[%c0_26, %c0_27] : memref<1x128xf32, #tpu.memory_space<vmem>>, vector<1x128xf32>
    tpu.vector_store %arg3[%c0_26, %c0_27], %106 {strides = array<i32>} : memref<1x128xf32, #tpu.memory_space<vmem>>, vector<1x128xf32>,
    return
  }
  func.func @transform_0(%arg0: i32) -> (i32, i32) {
    %c0_i32 = arith.constant 0 : i32
    %c0_i32_0 = arith.constant 0 : i32
    return %c0_i32, %arg0 : i32, i32
  }
  func.func @transform_1(%arg0: i32) -> (i32, i32) {
    %c0_i32 = arith.constant 0 : i32
    %c0_i32_0 = arith.constant 0 : i32
    %c0_i32_1 = arith.constant 0 : i32
    return %c0_i32, %c0_i32_0 : i32, i32
  }
  func.func @transform_2(%arg0: i32) -> (i32, i32) {
    %c0_i32 = arith.constant 0 : i32
    %c0_i32_0 = arith.constant 0 : i32
    return %c0_i32, %arg0 : i32, i32
  }
}

</mosaic_0001>

<bundles_post_ra>
// kernel: tpu_custom_call.1
= control target key start
LH: loop header
LB: loop body
LE: loop exit
PB: predicated region body
PF: predicated region fallthrough
CT: control target
= control target key end

     0   :  { %7 = vsyncpa [#allocation3], 0  ;;  %s13710_s0 = inlined_call_operand.hbm [shape: f32[1,128], index: 0, kind: input, shape index: {}]   ;;  %s13711_s1 = inlined_call_operand.hbm [shape: f32[1,1024], index: 1, kind: input, shape index: {}]   ;;  %s13712_s2 = inlined_call_operand.hbm [shape: f32[1,128], index: 2, kind: output, shape index: {}]  }
   0x1   :  { %8 = vsyncpa [#allocation6], 0 }
   0x2   :  { %9 = vsyncpa [#allocation4], 0  ;;  %s10000_s9 = smov [#allocation2]   ;;  %s10001_s11 = smov [#allocation5]  }
   0x3   :  { %s16_s10 = sshll.u32 %s10000_s9, 4  ;;  %s26_s12 = sshll.u32 %s10001_s11, 4  ;;  %s17_s10 = int_to_ptr.vmem [resolvable:$true] %s16_s10  ;;  %s27_s12 = int_to_ptr.vmem [resolvable:$true] %s26_s12 }
   0x4   :  { %s9928_s15 = scalar_lea.hbm %s13710_s0, 16 }
   0x5   :  { %p9929_p0 = scmp.ne.s32.totalorder %s13710_s0, %s9928_s15  ;;  %p9932_p1 = scmp.lt.u32.totalorder %s9928_s15, %s13710_s0 }
   0x7   :  { %p9934_p2 = pnand %p9932_p1, %p9929_p0 }
   0x9   :  { %9937 = shalt.err (!%p9934_p2)
}
   0xa   :  { %s9938_s20 = scalar_lea.vmem %s17_s10, 16  ;;  %s9942_s21 = scalar_lea.vmem %s17_s10, 32 }
   0xb   :  { %p9939_p3 = scmp.ne.s32.totalorder %s17_s10, %s9938_s20  ;;  %p9943_p4 = scmp.lt.s32.totalorder %s17_s10, %s17_s10 }
   0xc   :  { %p9944_p5 = scmp.lt.s32.totalorder %s9942_s21, %s9938_s20 }
   0xe   :  { %p9945_p6 = por %p9944_p5, %p9943_p4 }
  0x10   :  { %p9946_p7 = pnand %p9945_p6, %p9939_p3 }
  0x12   :  { %9949 = shalt.err (!%p9946_p7)
}
  0x13   :  { %19 = dma.hbm_to_vmem [thread:$0]  %s13710_s0, 16, %s17_s10, [#allocation3]  }
  0x14   :  { %s9950_s26 = scalar_lea.hbm %s13711_s1, 128 }
  0x15   :  { %p9951_p8 = scmp.ne.s32.totalorder %s13711_s1, %s9950_s26  ;;  %p9954_p9 = scmp.lt.u32.totalorder %s9950_s26, %s13711_s1 }
  0x17   :  { %p9956_p10 = pnand %p9954_p9, %p9951_p8 }
  0x19   :  { %9959 = shalt.err (!%p9956_p10)
}
  0x1a   :  { %s9960_s3 = scalar_lea.vmem %s27_s12, 128  ;;  %p9965_p12 = scmp.lt.s32.totalorder %s27_s12, %s27_s12 }
  0x1b   :  { %p9961_p11 = scmp.ne.s32.totalorder %s27_s12, %s9960_s3  ;;  %p9966_p13 = scmp.lt.s32.totalorder %s9960_s3, %s9960_s3 }
  0x1d   :  { %p9967_p0 = por %p9966_p13, %p9965_p12 }
  0x1f   :  { %p9968_p1 = pnand %p9967_p0, %p9961_p11 }
  0x21   :  { %9971 = shalt.err (!%p9968_p1)
}
  0x22   :  { %29 = dma.hbm_to_vmem [thread:$0]  %s13711_s1, 128, %s27_s12, [#allocation6]  }
  0x23   :  { %9994 = dma.done.wait [#allocation3], 16  }
  0x24   :  { %9995 = vsyncadd [#allocation3], 4294967280 }
  0x25   :  { %9996 = dma.done.wait [#allocation6], 128  }
  0x26   :  { %9997 = vsyncadd [#allocation6], 4294967168  ;;  %v13719_v0 = vmov 0.0|0.0   ;;  %vm13735_vm0 = vmmov 0   ;;  %v13721_v1 = vmov 0.0   ;;  %v43_v2 = vlaneseq  ;;  %s10006_s1 = smov [#allocation7]  }
  0x27   :  { %8673 = vmatprep.subr.bf16.mxu1 %v13719_v0  ;;  %9249 = vmatprep.subr.bf16.mxu0 %v13719_v0  ;;  %v36_v3 = vld [vmem:[#allocation2] sm:$0x1]  ;;  %v116_v5 = vld [vmem:[#allocation5 + $0x1] sm:$0x1]  ;;  %v2850_v6 = vld [vmem:[#allocation5 + $0x4] sm:$0x1] }
  0x28   :  { %7025 = vmatprep.mubr.msk.f32.mxu1 %vm13735_vm0, %v13721_v1  ;;  %7865 = vmatprep.mubr.msk.f32.mxu0 %vm13735_vm0, %v13721_v1  ;;  %v37_v4 = vmul.f32 1000.0, %v36_v3  ;;  %v10052_v7 = vand.u32 4294901760, %v116_v5  ;;  %v10054_v9 = vshrl.u32 %v43_v2, 7  ;;  %v10059_v11 = vand.u32 4294901760, %v2850_v6  ;;  %s5648_s5 = sshll.u32 %s10006_s1, 4  ;;  %s5649_s5 = int_to_ptr.vmem [resolvable:$true] %s5648_s5 }
  0x29   :  { %v14037_v34 = vmov 0  ;;  %v13725_v37 = vmov 1.0|1.0   ;;  %v14040_v40 = vmov 0  ;;  %v14044_v48 = vmov 0  ;;  %s9972_s6 = scalar_lea.vmem %s5649_s5, 16  ;;  %p9977_p3 = scmp.lt.s32.totalorder %s5649_s5, %s5649_s5 }
  0x2a   :  { %v9920_v8 = vcvt.f32.s32 %v37_v4  ;;  %14022 = vst [vmem:[#allocation11_spill] sm:$0xff] %v10054_v9  ;;  %v10057_v10 = vsub.f32 %v116_v5, %v10052_v7  ;;  %14024 = vst [vmem:[#allocation13_spill] sm:$0xff] %v10059_v11  ;;  %v10062_v13 = vsub.s32 0, %v10054_v9  ;;  %v10068_v16 = vsub.f32 %v2850_v6, %v10059_v11  ;;  %p9973_p2 = scmp.ne.s32.totalorder %s5649_s5, %s9972_s6  ;;  %s9976_s7 = scalar_lea.vmem %s5649_s5, 32 }
  0x2b   :  { %v10071_v17 = vadd.s32 8, %v10054_v9  ;;  %v10076_v20 = vadd.s32 16, %v10054_v9  ;;  %v10079_v21 = vadd.s32 24, %v10054_v9  ;;  %v10082_v22 = vadd.s32 32, %v10054_v9  ;;  %p9978_p4 = scmp.lt.s32.totalorder %s9976_s7, %s9972_s6 }
  0x2c   :  { %14023 = vst [vmem:[#allocation12_spill] sm:$0xff] %v10057_v10  ;;  %vm39_vm1 = vcmp.gt.s32.totalorder %v9920_v8, 0  ;;  %14025 = vst [vmem:[#allocation14_spill] sm:$0xff] %v10062_v13  ;;  %v13714_v15 = vand.u32 4294901760, %v10057_v10  ;;  %v10085_v23 = vadd.s32 40, %v10054_v9  ;;  %v10094_v26 = vadd.s32 48, %v10054_v9 }
  0x2d   :  { %v40_v12 = vsel %vm39_vm1, %v9920_v8, 0  ;;  %14027 = vst [vmem:[#allocation16_spill] sm:$0xff] %v10068_v16  ;;  %14028 = vst [vmem:[#allocation17_spill] sm:$0xff] %v10071_v17  ;;  %v10097_v27 = vadd.s32 56, %v10054_v9  ;;  %v10100_v28 = vadd.s32 64, %v10054_v9  ;;  %v10103_v29 = vadd.s32 72, %v10054_v9  ;;  %p9979_p5 = por %p9978_p4, %p9977_p3 }
  0x2e   :  { %vm41_vm2 = vcmp.lt.s32.totalorder %v40_v12, 1000  ;;  %14029 = vst [vmem:[#allocation18_spill] sm:$0xff] %v10076_v20  ;;  %14030 = vst [vmem:[#allocation19_spill] sm:$0xff] %v10079_v21  ;;  %v10108_v30 = vsub.f32 %v10057_v10, %v13714_v15  ;;  %v13713_v31 = vand.u32 4294901760, %v10068_v16  ;;  %v10153_v43 = vadd.s32 80, %v10054_v9 }
  0x2f   :  { %v10064_v14 = vsel %vm41_vm2, %v40_v12, 1000  ;;  %14031 = vst [vmem:[#allocation20_spill] sm:$0xff] %v10082_v22  ;;  %14032 = vst [vmem:[#allocation21_spill] sm:$0xff] %v10085_v23  ;;  %v10168_v50 = vadd.s32 88, %v10054_v9  ;;  %v14048_v54 = vmov 0  ;;  %v10194_v55 = vadd.s32 96, %v10054_v9  ;;  %p9980_p6 = pnand %p9979_p5, %p9973_p2 }
  0x30   :  { %14026 = vst [vmem:[#allocation15_spill] sm:$0xff] %v10064_v14  ;;  %v5674_v18 = vadd.s32 4294967168, %v10064_v14  ;;  %v5917_v19 = vadd.s32 4294966784, %v10064_v14  ;;  %14033 = vst [vmem:[#allocation22_spill] sm:$0xff] %v10094_v26  ;;  %v10173_v51 = vsub.f32 %v10068_v16, %v13713_v31  ;;  %v10197_v56 = vadd.s32 104, %v10054_v9 }
  0x31   :  { %14034 = vst [vmem:[#allocation23_spill] sm:$0xff] %v10097_v27  ;;  %14035 = vst [vmem:[#allocation24_spill] sm:$0xff] %v10100_v28  ;;  %v10219_v60 = vadd.s32 112, %v10054_v9  ;;  %v10230_v63 = vadd.s32 120, %v10054_v9 }
  0x32   :  { %v10088_v24 = vrot.slane %v5674_v18, %v10062_v13  ;;  %v10091_v25 = vrot.slane %v5917_v19, %v10062_v13  ;;  %14036 = vst [vmem:[#allocation25_spill] sm:$0xff] %v10103_v29  ;;  %14043 = vst [vmem:[#allocation28_spill] sm:$0xff] %v10153_v43  ;;  %v14067_v18 = vmov 0 }
  0x33   :  { %14047 = vst [vmem:[#allocation30_spill] sm:$0xff] %v10168_v50  ;;  %14051 = vst [vmem:[#allocation32_spill] sm:$0xff] %v10194_v55 }
  0x34   :  { %vm123_vm3 = vcmp.eq.s32.totalorder %v10054_v9, %v10088_v24  ;;  %vm124_vm4 = vcmp.eq.s32.totalorder %v10071_v17, %v10088_v24  ;;  %vm2857_vm5 = vcmp.eq.s32.totalorder %v10054_v9, %v10091_v25  ;;  %vm2858_vm6 = vcmp.eq.s32.totalorder %v10071_v17, %v10091_v25  ;;  %14052 = vst [vmem:[#allocation33_spill] sm:$0xff] %v10197_v56 }
  0x35   :  { %v5675_v32 = vsel %vm123_vm3, 1.0, %v13721_v1  ;;  %v5676_v33 = vsel %vm124_vm4, 1.0, %v13721_v1  ;;  %vm10121_vm7 = vmpackc.low %vm124_vm4, %vm123_vm3  ;;  %v5918_v35 = vsel %vm2857_vm5, 1.0, %v13721_v1  ;;  %v5919_v36 = vsel %vm2858_vm6, 1.0, %v13721_v1  ;;  %14053 = vst [vmem:[#allocation34_spill] sm:$0xff] %v10219_v60 }
  0x36   :  { %v14038_v34 = vsel %vm10121_vm7, 4294967295, %v14037_v34  ;;  %8675 = vmatpush3.bf16.msk.msra.mxu1 %vm10121_vm7, %v13725_v37  ;;  %v10130_v38 = vsub.f32 %v5675_v32, %v5675_v32  ;;  %v10132_v39 = vsub.f32 %v5676_v33, %v5676_v33  ;;  %vm10134_vm8 = vmpackc.low %vm2858_vm6, %vm2857_vm5  ;;  %v10138_v41 = vsub.f32 %v5918_v35, %v5918_v35  ;;  %14054 = vst [vmem:[#allocation35_spill] sm:$0xff] %v10230_v63 }
  0x37   :  { %14039 = vst [vmem:[#allocation26_spill] sm:$0xff] %v14038_v34  ;;  %v14041_v40 = vsel %vm10134_vm8, 4294967295, %v14040_v40  ;;  %v10140_v42 = vsub.f32 %v5919_v36, %v5919_v36  ;;  %9251 = vmatpush3.bf16.msk.msra.mxu0 %vm10134_vm8, %v13725_v37  ;;  %8676 = vmatprep.subr.bf16.mxu1 %v13719_v0  ;;  %vm125_vm9 = vcmp.eq.s32.totalorder %v10076_v20, %v10088_v24  ;;  %v14055_v32 = vmov 0 }
  0x38   :  { %14042 = vst [vmem:[#allocation27_spill] sm:$0xff] %v14041_v40  ;;  %vm126_vm10 = vcmp.eq.s32.totalorder %v10079_v21, %v10088_v24  ;;  %vm2859_vm11 = vcmp.eq.s32.totalorder %v10076_v20, %v10091_v25  ;;  %v13718_v44 = vand.u32 4294901760, %v10130_v38  ;;  %v13717_v45 = vand.u32 4294901760, %v10132_v39  ;;  %9252 = vmatprep.subr.bf16.mxu0 %v13719_v0 }
  0x39   :  { %v13716_v46 = vand.u32 4294901760, %v10138_v41  ;;  %v13715_v47 = vand.u32 4294901760, %v10140_v42  ;;  %vm10160_vm12 = vmpackc.low %vm126_vm10, %vm125_vm9  ;;  %v5677_v49 = vsel %vm125_vm9, 1.0, %v13721_v1  ;;  %vm2860_vm13 = vcmp.eq.s32.totalorder %v10079_v21, %v10091_v25 }
  0x3a   :  { %v14045_v48 = vsel %vm10160_vm12, 4294967295, %v14044_v48  ;;  %v5678_v52 = vsel %vm126_vm10, 1.0, %v13721_v1  ;;  %8678 = vmatpush3.bf16.msk.msra.mxu1 %vm10160_vm12, %v13725_v37  ;;  %v5920_v53 = vsel %vm2859_vm11, 1.0, %v13721_v1  ;;  %vm10189_vm14 = vmpackc.low %vm2860_vm13, %vm2859_vm11  ;;  %v10202_v57 = vsub.f32 %v10130_v38, %v13718_v44 }
  0x3b   :  { %14046 = vst [vmem:[#allocation29_spill] sm:$0xff] %v14045_v48  ;;  %v14049_v54 = vsel %vm10189_vm14, 4294967295, %v14048_v54  ;;  %v10207_v58 = vsub.f32 %v10132_v39, %v13717_v45  ;;  %v10212_v59 = vsub.f32 %v10138_v41, %v13716_v46  ;;  %9254 = vmatpush3.bf16.msk.msra.mxu0 %vm10189_vm14, %v13725_v37  ;;  %8679 = vmatprep.subr.bf16.mxu1 %v13719_v0  ;;  %v5921_v4 = vsel %vm2860_vm13, 1.0, %v13721_v1 }
  0x3c   :  { %14050 = vst [vmem:[#allocation31_spill] sm:$0xff] %v14049_v54  ;;  %v10224_v61 = vsub.f32 %v10140_v42, %v13715_v47  ;;  %v10226_v62 = vsub.f32 %v5677_v49, %v5677_v49  ;;  %9255 = vmatprep.subr.bf16.mxu0 %v13719_v0  ;;  %v10233_v3 = vsub.f32 %v5678_v52, %v5678_v52  ;;  %v14058_v52 = vmov 0 }
  0x3d   :  { %v10239_v5 = vsub.f32 %v5920_v53, %v5920_v53  ;;  %vm127_vm15 = vcmp.eq.s32.totalorder %v10082_v22, %v10088_v24  ;;  %vm128_vm1 = vcmp.eq.s32.totalorder %v10085_v23, %v10088_v24  ;;  %vm2861_vm2 = vcmp.eq.s32.totalorder %v10082_v22, %v10091_v25 }
  0x3e   :  { %vm2862_vm3 = vcmp.eq.s32.totalorder %v10085_v23, %v10091_v25  ;;  %v5679_v19 = vsel %vm127_vm15, 1.0, %v13721_v1  ;;  %vm10254_vm4 = vmpackc.low %vm128_vm1, %vm127_vm15  ;;  %v5680_v36 = vsel %vm128_vm1, 1.0, %v13721_v1  ;;  %v5922_v49 = vsel %vm2861_vm2, 1.0, %v13721_v1 }
  0x3f   :  { %v14056_v32 = vsel %vm10254_vm4, 4294967295, %v14055_v32  ;;  %8681 = vmatpush3.bf16.msk.msra.mxu1 %vm10254_vm4, %v13725_v37  ;;  %vm10265_vm5 = vmpackc.low %vm2862_vm3, %vm2861_vm2  ;;  %v5923_v31 = vsel %vm2862_vm3, 1.0, %v13721_v1  ;;  %vm129_vm6 = vcmp.eq.s32.totalorder %v10094_v26, %v10088_v24  ;;  %vm130_vm9 = vcmp.eq.s32.totalorder %v10097_v27, %v10088_v24 }
  0x40   :  { %14057 = vst [vmem:[#allocation36_spill] sm:$0xff] %v14056_v32  ;;  %v14059_v52 = vsel %vm10265_vm5, 4294967295, %v14058_v52  ;;  %9257 = vmatpush3.bf16.msk.msra.mxu0 %vm10265_vm5, %v13725_v37  ;;  %8682 = vmatprep.subr.bf16.mxu1 %v13719_v0  ;;  %v10280_v47 = vsub.f32 %v5921_v4, %v5921_v4  ;;  %v10282_v46 = vsub.f32 %v5679_v19, %v5679_v19  ;;  %v5681_v45 = vsel %vm129_vm6, 1.0, %v13721_v1  ;;  %vm10286_vm10 = vmpackc.low %vm130_vm9, %vm129_vm6 }
  0x41   :  { %14060 = vst [vmem:[#allocation37_spill] sm:$0xff] %v14059_v52  ;;  %9258 = vmatprep.subr.bf16.mxu0 %v13719_v0  ;;  %v14061_v44 = vmov 0  ;;  %v10290_v6 = vsub.f32 %v5680_v36, %v5680_v36  ;;  %v10292_v2 = vsub.f32 %v5922_v49, %v5922_v49  ;;  %v5682_v53 = vsel %vm130_vm9, 1.0, %v13721_v1 }
  0x42   :  { %v14062_v44 = vsel %vm10286_vm10, 4294967295, %v14061_v44  ;;  %vm2863_vm11 = vcmp.eq.s32.totalorder %v10094_v26, %v10091_v25  ;;  %v10297_v4 = vsub.f32 %v5923_v31, %v5923_v31  ;;  %vm2864_vm13 = vcmp.eq.s32.totalorder %v10097_v27, %v10091_v25 }
  0x43   :  { %14063 = vst [vmem:[#allocation38_spill] sm:$0xff] %v14062_v44  ;;  %8684 = vmatpush3.bf16.msk.msra.mxu1 %vm10286_vm10, %v13725_v37  ;;  %v5924_v19 = vsel %vm2863_vm11, 1.0, %v13721_v1  ;;  %vm131_vm15 = vcmp.eq.s32.totalorder %v10100_v28, %v10088_v24  ;;  %v10307_v36 = vsub.f32 %v5681_v45, %v5681_v45  ;;  %v10309_v49 = vsub.f32 %v5682_v53, %v5682_v53  ;;  %vm10312_vm1 = vmpackc.low %vm2864_vm13, %vm2863_vm11 }
  0x44   :  { %v5925_v15 = vsel %vm2864_vm13, 1.0, %v13721_v1  ;;  %v14064_v31 = vmov 0  ;;  %8685 = vmatprep.subr.bf16.mxu1 %v13719_v0  ;;  %vm132_vm2 = vcmp.eq.s32.totalorder %v10103_v29, %v10088_v24  ;;  %9260 = vmatpush3.bf16.msk.msra.mxu0 %vm10312_vm1, %v13725_v37  ;;  %v5683_v45 = vsel %vm131_vm15, 1.0, %v13721_v1 }
  0x45   :  { %v14065_v31 = vsel %vm10312_vm1, 4294967295, %v14064_v31  ;;  %v5684_v53 = vsel %vm132_vm2, 1.0, %v13721_v1  ;;  %vm10326_vm3 = vmpackc.low %vm132_vm2, %vm131_vm15  ;;  %v10331_v8 = vsub.f32 %v5924_v19, %v5924_v19  ;;  %v10333_v0 = vsub.f32 %v5925_v15, %v5925_v15 }
  0x46   :  { %14066 = vst [vmem:[#allocation39_spill] sm:$0xff] %v14065_v31  ;;  %v14068_v18 = vsel %vm10326_vm3, 4294967295, %v14067_v18  ;;  %v14070_v35 = vmov 0.0|0.0   ;;  %vm2865_vm6 = vcmp.eq.s32.totalorder %v10100_v28, %v10091_v25  ;;  %v10342_v1 = vsub.f32 %v5683_v45, %v5683_v45 }
  0x47   :  { %14069 = vst [vmem:[#allocation40_spill] sm:$0xff] %v14068_v18  ;;  %9261 = vmatprep.subr.bf16.mxu0 %v14070_v35  ;;  %8687 = vmatpush3.bf16.msk.msra.mxu1 %vm10326_vm3, %v13725_v37  ;;  %vm2866_vm9 = vcmp.eq.s32.totalorder %v10103_v29, %v10091_v25  ;;  %vm133_vm11 = vcmp.eq.s32.totalorder %v10153_v43, %v10088_v24  ;;  %v14071_v33 = vmov 0  ;;  %v14074_v45 = vmov 0.0  }
  0x48   :  { %v10351_v28 = vsub.f32 %v5684_v53, %v5684_v53  ;;  %vm10353_vm13 = vmpackc.low %vm2866_vm9, %vm2865_vm6  ;;  %8688 = vmatprep.subr.bf16.mxu1 %v14070_v35  ;;  %v5926_v37 = vsel %vm2865_vm6, 1.0, %v14074_v45  ;;  %v5927_v29 = vsel %vm2866_vm9, 1.0, %v14074_v45  ;;  %v14075_v27 = vmov 1.0|1.0  }
  0x49   :  { %v14072_v33 = vsel %vm10353_vm13, 4294967295, %v14071_v33  ;;  %9263 = vmatpush3.bf16.msk.msra.mxu0 %vm10353_vm13, %v14075_v27  ;;  %vm134_vm15 = vcmp.eq.s32.totalorder %v10168_v50, %v10088_v24  ;;  %vm2867_vm2 = vcmp.eq.s32.totalorder %v10153_v43, %v10091_v25  ;;  %v5685_v19 = vsel %vm133_vm11, 1.0, %v14074_v45 }
  0x4a   :  { %14073 = vst [vmem:[#allocation41_spill] sm:$0xff] %v14072_v33  ;;  %9264 = vmatprep.subr.bf16.mxu0 %v14070_v35  ;;  %vm10377_vm6 = vmpackc.low %vm134_vm15, %vm133_vm11  ;;  %v14076_v15 = vmov 0  ;;  %vm2868_vm9 = vcmp.eq.s32.totalorder %v10168_v50, %v10091_v25  ;;  %v5686_v12 = vsel %vm134_vm15, 1.0, %v14074_v45  ;;  %v5928_v26 = vsel %vm2867_vm2, 1.0, %v14074_v45 }
  0x4b   :  { %v14077_v15 = vsel %vm10377_vm6, 4294967295, %v14076_v15  ;;  %8690 = vmatpush3.bf16.msk.msra.mxu1 %vm10377_vm6, %v14075_v27  ;;  %v5929_v23 = vsel %vm2868_vm9, 1.0, %v14074_v45  ;;  %vm10390_vm0 = vmpackc.low %vm2868_vm9, %vm2867_vm2  ;;  %v14079_v43 = vmov 0  ;;  %v10395_v21 = vsub.f32 %v5926_v37, %v5926_v37 }
  0x4c   :  { %14078 = vst [vmem:[#allocation42_spill] sm:$0xff] %v14077_v15  ;;  %v14080_v43 = vsel %vm10390_vm0, 4294967295, %v14079_v43  ;;  %v10397_v50 = vsub.f32 %v5927_v29, %v5927_v29  ;;  %8691 = vmatprep.subr.bf16.mxu1 %v14070_v35  ;;  %vm135_vm11 = vcmp.eq.s32.totalorder %v10194_v55, %v10088_v24  ;;  %v10402_v53 = vsub.f32 %v5685_v19, %v5685_v19 }
  0x4d   :  { %14081 = vst [vmem:[#allocation43_spill] sm:$0xff] %v14080_v43  ;;  %9266 = vmatpush3.bf16.msk.msra.mxu0 %vm10390_vm0, %v14075_v27  ;;  %vm136_vm15 = vcmp.eq.s32.totalorder %v10197_v56, %v10088_v24  ;;  %v5687_v22 = vsel %vm135_vm11, 1.0, %v14074_v45  ;;  %vm2869_vm2 = vcmp.eq.s32.totalorder %v10194_v55, %v10091_v25  ;;  %v10412_v29 = vsub.f32 %v5686_v12, %v5686_v12 }
  0x4e   :  { %v10414_v37 = vsub.f32 %v5928_v26, %v5928_v26  ;;  %v10416_v20 = vsub.f32 %v5929_v23, %v5929_v23  ;;  %9267 = vmatprep.subr.bf16.mxu0 %v14070_v35  ;;  %v5688_v19 = vsel %vm136_vm15, 1.0, %v14074_v45  ;;  %vm10420_vm9 = vmpackc.low %vm136_vm15, %vm135_vm11  ;;  %v14082_v17 = vmov 0 }
  0x4f   :  { %v14083_v17 = vsel %vm10420_vm9, 4294967295, %v14082_v17  ;;  %8693 = vmatpush3.bf16.msk.msra.mxu1 %vm10420_vm9, %v14075_v27  ;;  %v10427_v9 = vsub.f32 %v5687_v22, %v5687_v22  ;;  %vm2870_vm0 = vcmp.eq.s32.totalorder %v10197_v56, %v10091_v25  ;;  %v5930_v23 = vsel %vm2869_vm2, 1.0, %v14074_v45 }
  0x50   :  { %14084 = vst [vmem:[#allocation44_spill] sm:$0xff] %v14083_v17  ;;  %vm137_vm6 = vcmp.eq.s32.totalorder %v10219_v60, %v10088_v24  ;;  %v10435_v12 = vsub.f32 %v5688_v19, %v5688_v19  ;;  %vm10437_vm11 = vmpackc.low %vm2870_vm0, %vm2869_vm2  ;;  %v14085_v55 = vmov 0  ;;  %v10441_v13 = vsub.f32 %v5930_v23, %v5930_v23  ;;  %8694 = vmatprep.subr.bf16.mxu1 %v14070_v35 }
  0x51   :  { %v14086_v55 = vsel %vm10437_vm11, 4294967295, %v14085_v55  ;;  %vm138_vm15 = vcmp.eq.s32.totalorder %v10230_v63, %v10088_v24  ;;  %v5931_v14 = vsel %vm2870_vm0, 1.0, %v14074_v45  ;;  %9269 = vmatpush3.bf16.msk.msra.mxu0 %vm10437_vm11, %v14075_v27  ;;  %v5689_v19 = vsel %vm137_vm6, 1.0, %v14074_v45 }
  0x52   :  { %14087 = vst [vmem:[#allocation45_spill] sm:$0xff] %v14086_v55  ;;  %vm10453_vm2 = vmpackc.low %vm138_vm15, %vm137_vm6  ;;  %v14088_v23 = vmov 0  ;;  %9270 = vmatprep.subr.bf16.mxu0 %v14070_v35  ;;  %v5690_v56 = vsel %vm138_vm15, 1.0, %v14074_v45  ;;  %vm2871_vm0 = vcmp.eq.s32.totalorder %v10219_v60, %v10091_v25  ;;  %vm2872_vm6 = vcmp.eq.s32.totalorder %v10230_v63, %v10091_v25 }
  0x53   :  { %v14089_v23 = vsel %vm10453_vm2, 4294967295, %v14088_v23  ;;  %8696 = vmatpush3.bf16.msk.msra.mxu1 %vm10453_vm2, %v14075_v27  ;;  %v14091_v24 = vand.u32 4294901760, %v10202_v57  ;;  %v14092_v26 = vand.u32 4294901760, %v10207_v58  ;;  %v10476_v33 = vsub.f32 %v5931_v14, %v5931_v14  ;;  %vm10486_vm15 = vmpackc.low %vm2872_vm6, %vm2871_vm0 }
  0x54   :  { %14090 = vst [vmem:[#allocation46_spill] sm:$0xff] %v14089_v23  ;;  %v10478_v22 = vsub.f32 %v5689_v19, %v5689_v19  ;;  %v14093_v55 = vmov 0  ;;  %8697 = vmatprep.subr.bf16.mxu1 %v14070_v35  ;;  %v10491_v57 = vsub.f32 %v5690_v56, %v5690_v56  ;;  %v14096_v14 = vand.u32 4294901760, %v10212_v59 }
  0x55   :  { %v8698_v17 = vpack.c.bf16 %v14092_v26, %v14091_v24  ;;  %v14094_v55 = vsel %vm10486_vm15, 4294967295, %v14093_v55  ;;  %9272 = vmatpush3.bf16.msk.msra.mxu0 %vm10486_vm15, %v14075_v27  ;;  %v14097_v58 = vand.u32 4294901760, %v10224_v61  ;;  %v14098_v19 = vand.u32 4294901760, %v10226_v62 }
  0x56   :  { %14095 = vst [vmem:[#allocation47_spill] sm:$0xff] %v14094_v55  ;;  %v14099_v15 = vand.u32 4294901760, %v10233_v3  ;;  %v5932_v56 = vsel %vm2871_vm0, 1.0, %v14074_v45  ;;  %9273 = vmatprep.subr.bf16.mxu0 %v14070_v35  ;;  %v14100_v59 = vand.u32 4294901760, %v10108_v30  ;;  %v14101_v61 = vand.u32 4294901760, %v10239_v5 }
  0x57   :  { %v9274_v26 = vpack.c.bf16 %v14097_v58, %v14096_v14  ;;  %v280_v24 = vsub.f32 %v10226_v62, %v14098_v19  ;;  %v14102_v58 = vand.u32 4294901760, %v10280_v47  ;;  %v5933_v60 = vsel %vm2872_vm6, 1.0, %v14074_v45 }
  0x58   :  { %v287_v43 = vsub.f32 %v10233_v3, %v14099_v15  ;;  %7026 = vmatmul.mubr.f32.vlgmr.msra.gmra.mrb[0].mxu1 %v14100_v59  ;;  %v3014_v14 = vsub.f32 %v10239_v5, %v14101_v61  ;;  %v14103_v15 = vand.u32 4294901760, %v10282_v46  ;;  %v14104_v23 = vand.u32 4294901760, %v10290_v6 }
  0x59   :  { %v3021_v19 = vsub.f32 %v10280_v47, %v14102_v58  ;;  %8699 = vmatpush3.bf16.msra.mxu1 %v8698_v17  ;;  %v281_v30 = vand.u32 4294901760, %v280_v24  ;;  %vm14105_vm0 = vmmov 0   ;;  %v14106_v58 = vand.u32 4294901760, %v10173_v51 }
  0x5a   :  { %v294_v55 = vsub.f32 %v10282_v46, %v14103_v15  ;;  %v288_v59 = vand.u32 4294901760, %v287_v43  ;;  %v301_v61 = vsub.f32 %v10290_v6, %v14104_v23  ;;  %7060 = vmatprep.mubr.msk.f32.mxu1 %vm14105_vm0, %v14074_v45  ;;  %8700 = vmatprep.subr.bf16.mxu1 %v14070_v35  ;;  %v3015_v15 = vand.u32 4294901760, %v3014_v14 }
  0x5b   :  { %7866 = vmatmul.mubr.f32.vlgmr.msra.gmra.mrb[0].mxu0 %v14106_v58  ;;  %v3022_v18 = vand.u32 4294901760, %v3021_v19  ;;  %v14107_v25 = vand.u32 4294901760, %v10292_v2  ;;  %v14108_v23 = vand.u32 4294901760, %v10297_v4  ;;  %v14109_v44 = vand.u32 4294901760, %v10307_v36 }
  0x5c   :  { %v295_v31 = vand.u32 4294901760, %v294_v55  ;;  %9275 = vmatpush3.bf16.msra.mxu0 %v9274_v26  ;;  %v8701_v43 = vpack.c.bf16 %v288_v59, %v281_v30  ;;  %v302_v24 = vand.u32 4294901760, %v301_v61  ;;  %7900 = vmatprep.mubr.msk.f32.mxu0 %vm14105_vm0, %v14074_v45  ;;  %v14110_v19 = vand.u32 4294901760, %v10309_v49 }
  0x5d   :  { %v3028_v17 = vsub.f32 %v10292_v2, %v14107_v25  ;;  %v3035_v63 = vsub.f32 %v10297_v4, %v14108_v23  ;;  %v308_v51 = vsub.f32 %v10307_v36, %v14109_v44  ;;  %9276 = vmatprep.subr.bf16.mxu0 %v14070_v35  ;;  %v9277_v55 = vpack.c.bf16 %v3022_v18, %v3015_v15 }
  0x5e   :  { %v315_v26 = vsub.f32 %v10309_v49, %v14110_v19  ;;  %v14111_v30 = vand.u32 4294901760, %v10331_v8  ;;  %8702 = vmatpush3.bf16.msra.mxu1 %v8701_v43  ;;  %v8704_v61 = vpack.c.bf16 %v302_v24, %v295_v31  ;;  %v14112_v44 = vand.u32 4294901760, %v10333_v0 }
  0x5f   :  { %v3029_v14 = vand.u32 4294901760, %v3028_v17  ;;  %v3036_v58 = vand.u32 4294901760, %v3035_v63  ;;  %v309_v25 = vand.u32 4294901760, %v308_v51  ;;  %8703 = vmatprep.subr.bf16.mxu1 %v14070_v35  ;;  %v14113_v17 = vand.u32 4294901760, %v10342_v1 }
  0x60   :  { %v3042_v59 = vsub.f32 %v10331_v8, %v14111_v30  ;;  %v3049_v23 = vsub.f32 %v10333_v0, %v14112_v44  ;;  %v316_v18 = vand.u32 4294901760, %v315_v26  ;;  %v14114_v52 = vand.u32 4294901760, %v10351_v28  ;;  %9278 = vmatpush3.bf16.msra.mxu0 %v9277_v55 }
  0x61   :  { %v322_v19 = vsub.f32 %v10342_v1, %v14113_v17  ;;  %v9280_v31 = vpack.c.bf16 %v3036_v58, %v3029_v14  ;;  %v14115_v43 = vand.u32 4294901760, %v10395_v21  ;;  %v14116_v51 = vand.u32 4294901760, %v10397_v50  ;;  %9279 = vmatprep.subr.bf16.mxu0 %v14070_v35 }
  0x62   :  { %v3043_v15 = vand.u32 4294901760, %v3042_v59  ;;  %v329_v30 = vsub.f32 %v10351_v28, %v14114_v52  ;;  %v3050_v63 = vand.u32 4294901760, %v3049_v23  ;;  %v10569_v44 = vsub.f32 %v5932_v56, %v5932_v56  ;;  %8705 = vmatpush3.bf16.msra.mxu1 %v8704_v61 }
  0x63   :  { %v3056_v24 = vsub.f32 %v10395_v21, %v14115_v43  ;;  %v3063_v26 = vsub.f32 %v10397_v50, %v14116_v51  ;;  %v10571_v17 = vsub.f32 %v5933_v60, %v5933_v60  ;;  %v8707_v52 = vpack.c.bf16 %v316_v18, %v309_v25  ;;  %8706 = vmatprep.subr.bf16.mxu1 %v14070_v35 }
  0x64   :  { %v323_v55 = vand.u32 4294901760, %v322_v19  ;;  %v330_v14 = vand.u32 4294901760, %v329_v30  ;;  %v14117_v58 = vand.u32 4294901760, %v10402_v53  ;;  %v14118_v43 = vand.u32 4294901760, %v10412_v29  ;;  %9281 = vmatpush3.bf16.msra.mxu0 %v9280_v31 }
  0x65   :  { %v9283_v60 = vpack.c.bf16 %v3050_v63, %v3043_v15  ;;  %v3057_v56 = vand.u32 4294901760, %v3056_v24  ;;  %v3064_v32 = vand.u32 4294901760, %v3063_v26  ;;  %v14119_v61 = vand.u32 4294901760, %v10414_v37  ;;  %9282 = vmatprep.subr.bf16.mxu0 %v14070_v35 }
  0x66   :  { %v336_v23 = vsub.f32 %v10402_v53, %v14117_v58  ;;  %v343_v51 = vsub.f32 %v10412_v29, %v14118_v43  ;;  %v14120_v18 = vand.u32 4294901760, %v10416_v20  ;;  %v14121_v30 = vand.u32 4294901760, %v10427_v9  ;;  %8708 = vmatpush3.bf16.msra.mxu1 %v8707_v52 }
  0x67   :  { %v3070_v25 = vsub.f32 %v10414_v37, %v14119_v61  ;;  %v14122_v43 = vand.u32 4294901760, %v10435_v12  ;;  %v370_v15 = vand.u32 4294901760, %v10491_v57  ;;  %v3097_v31 = vand.u32 4294901760, %v10569_v44  ;;  %8709 = vmatprep.subr.bf16.mxu1 %v14070_v35 }
  0x68   :  { %v3077_v19 = vsub.f32 %v10416_v20, %v14120_v18  ;;  %v350_v58 = vsub.f32 %v10427_v9, %v14121_v30  ;;  %v14123_v63 = vand.u32 4294901760, %v10441_v13  ;;  %v14124_v26 = vand.u32 4294901760, %v10476_v33  ;;  %9284 = vmatpush3.bf16.msra.mxu0 %v9283_v60 }
  0x69   :  { %v357_v59 = vsub.f32 %v10435_v12, %v14122_v43  ;;  %v3104_v18 = vand.u32 4294901760, %v10571_v17  ;;  %v8710_v30 = vpack.c.bf16 %v330_v14, %v323_v55  ;;  %v337_v54 = vand.u32 4294901760, %v336_v23  ;;  %9285 = vmatprep.subr.bf16.mxu0 %v14070_v35 }
  0x6a   :  { %v3084_v24 = vsub.f32 %v10441_v13, %v14123_v63  ;;  %v3091_v61 = vsub.f32 %v10476_v33, %v14124_v26  ;;  %v344_v43 = vand.u32 4294901760, %v343_v51  ;;  %v9286_v48 = vpack.c.bf16 %v3064_v32, %v3057_v56 }
  0x6b   :  { %v3071_v40 = vand.u32 4294901760, %v3070_v25  ;;  %v3078_v16 = vand.u32 4294901760, %v3077_v19  ;;  %v351_v34 = vand.u32 4294901760, %v350_v58  ;;  %v358_v27 = vand.u32 4294901760, %v357_v59  ;;  %8711 = vmatpush3.bf16.msra.mxu1 %v8710_v30 }
  0x6c   :  { %v3085_v63 = vand.u32 4294901760, %v3084_v24  ;;  %v3092_v10 = vand.u32 4294901760, %v3091_v61  ;;  %v14125_v26 = vand.u32 4294901760, %v10478_v22  ;;  %v371_v52 = vsub.f32 %v10491_v57, %v370_v15  ;;  %8712 = vmatprep.subr.bf16.mxu1 %v14070_v35  ;;  %9287 = vmatpush3.bf16.msra.mxu0 %v9286_v48 }
  0x6d   :  { %v8713_v55 = vpack.c.bf16 %v344_v43, %v337_v54  ;;  %v3098_v14 = vsub.f32 %v10569_v44, %v3097_v31  ;;  %v3105_v32 = vsub.f32 %v10571_v17, %v3104_v18  ;;  %v9289_v59 = vpack.c.bf16 %v3078_v16, %v3071_v40  ;;  %9288 = vmatprep.subr.bf16.mxu0 %v14070_v35 }
  0x6e   :  { %v364_v11 = vsub.f32 %v10478_v22, %v14125_v26  ;;  %v8716_v23 = vpack.c.bf16 %v358_v27, %v351_v34  ;;  %v9292_v51 = vpack.c.bf16 %v3092_v10, %v3085_v63  ;;  %v372_v56 = vand.u32 4294901760, %v371_v52 }
  0x6f   :  { %8714 = vmatpush3.bf16.msra.mxu1 %v8713_v55  ;;  %v3099_v25 = vand.u32 4294901760, %v3098_v14  ;;  %v3106_v19 = vand.u32 4294901760, %v3105_v32  ;;  %v14126_v58 = vand.u32 4294901760, %v10130_v38  ;;  %v14127_v54 = vand.u32 4294901760, %v10132_v39 }
  0x70   :  { %v365_v60 = vand.u32 4294901760, %v364_v11  ;;  %v14128_v61 = vand.u32 4294901760, %v10138_v41  ;;  %v14129_v48 = vand.u32 4294901760, %v10140_v42  ;;  %8715 = vmatprep.subr.bf16.mxu1 %v14070_v35  ;;  %v14130_v10 = vand.u32 4294901760, %v10226_v62  ;;  %9290 = vmatpush3.bf16.msra.mxu0 %v9289_v59 }
  0x71   :  { %v10618_v24 = vpack.c.bf16 %v14127_v54, %v14126_v58  ;;  %v14131_v11 = vand.u32 4294901760, %v10233_v3  ;;  %v14132_v34 = vand.u32 4294901760, %v10239_v5  ;;  %v14133_v40 = vand.u32 4294901760, %v10280_v47  ;;  %9291 = vmatprep.subr.bf16.mxu0 %v14070_v35 }
  0x72   :  { %v10624_v16 = vpack.c.bf16 %v14129_v48, %v14128_v61  ;;  %v14134_v43 = vand.u32 4294901760, %v10282_v46  ;;  %v14135_v63 = vand.u32 4294901760, %v10290_v6  ;;  %v14136_v52 = vand.u32 4294901760, %v10292_v2 }
  0x73   :  { %v10631_v27 = vpack.c.bf16 %v14131_v11, %v14130_v10  ;;  %v10637_v30 = vpack.c.bf16 %v14133_v40, %v14132_v34  ;;  %v14137_v55 = vand.u32 4294901760, %v10297_v4  ;;  %v14138_v32 = vand.u32 4294901760, %v10307_v36  ;;  %8717 = vmatpush3.bf16.msra.mxu1 %v8716_v23 }
  0x74   :  { %v10643_v26 = vpack.c.bf16 %v14135_v63, %v14134_v43  ;;  %v14139_v58 = vand.u32 4294901760, %v10309_v49  ;;  %v14140_v61 = vand.u32 4294901760, %v10331_v8  ;;  %v14141_v48 = vand.u32 4294901760, %v10333_v0  ;;  %8718 = vmatprep.subr.bf16.mxu1 %v14070_v35  ;;  %9293 = vmatpush3.bf16.msra.mxu0 %v9292_v51 }
  0x75   :  { %v10649_v14 = vpack.c.bf16 %v14137_v55, %v14136_v52  ;;  %v14142_v11 = vand.u32 4294901760, %v10342_v1  ;;  %v14143_v34 = vand.u32 4294901760, %v10351_v28  ;;  %v14145_v59 = vand.u32 4294901760, %v10395_v21  ;;  %9294 = vmatprep.subr.bf16.mxu0 %v14070_v35 }
  0x76   :  { %v10655_v54 = vpack.c.bf16 %v14139_v58, %v14138_v32  ;;  %v10661_v10 = vpack.c.bf16 %v14141_v48, %v14140_v61  ;;  %v14146_v43 = vand.u32 4294901760, %v10397_v50  ;;  %v14148_v52 = vand.u32 4294901760, %v10402_v53 }
  0x77   :  { %v10667_v40 = vpack.c.bf16 %v14143_v34, %v14142_v11  ;;  %v14149_v55 = vand.u32 4294901760, %v10412_v29  ;;  %v14151_v58 = vand.u32 4294901760, %v10414_v37  ;;  %v14152_v61 = vand.u32 4294901760, %v10416_v20 }
  0x78   :  { %v10673_v63 = vpack.c.bf16 %v14146_v43, %v14145_v59  ;;  %v14153_v11 = vand.u32 4294901760, %v10427_v9  ;;  %v14154_v34 = vand.u32 4294901760, %v10435_v12  ;;  %v14155_v43 = vand.u32 4294901760, %v10441_v13 }
  0x79   :  { %14144 = vst [vmem:[#allocation48_spill] sm:$0xff] %v10667_v40  ;;  %v10680_v32 = vpack.c.bf16 %v14149_v55, %v14148_v52  ;;  %v10686_v48 = vpack.c.bf16 %v14152_v61, %v14151_v58  ;;  %v8719_v52 = vpack.c.bf16 %v372_v56, %v365_v60  ;;  %v14157_v55 = vand.u32 4294901760, %v10478_v22 }
  0x7a   :  { %14147 = vst [vmem:[#allocation49_spill] sm:$0xff] %v10673_v63  ;;  %v10692_v59 = vpack.c.bf16 %v14154_v34, %v14153_v11  ;;  %v14156_v63 = vand.u32 4294901760, %v10476_v33  ;;  %v10704_v58 = vpack.c.bf16 %v3104_v18, %v3097_v31  ;;  %v9295_v61 = vpack.c.bf16 %v3106_v19, %v3099_v25  ;;  %v14158_v31 = vld [vmem:[#allocation13_spill] sm:$0xff]  ;;  %v14186_v19 = vld [vmem:[#allocation15_spill] sm:$0xff] }
  0x7b   :  { %14150 = vst [vmem:[#allocation50_spill] sm:$0xff] %v10680_v32  ;;  %v10702_v32 = vpack.c.bf16 %v370_v15, %v14157_v55  ;;  %8720 = vmatpush3.bf16.msra.mxu1 %v8719_v52  ;;  %v8722_v11 = vpack.c.bf16 %v10132_v39, %v10130_v38  ;;  %v9298_v23 = vpack.c.bf16 %v10140_v42, %v10138_v41  ;;  %v14193_v34 = vld [vmem:[#allocation19_spill] sm:$0xff] }
  0x7c   :  { %v10698_v40 = vpack.c.bf16 %v14156_v63, %v14155_v43  ;;  %8721 = vmatprep.subr.bf16.mxu1 %v14070_v35  ;;  %9296 = vmatpush3.bf16.msra.mxu0 %v9295_v61  ;;  %v8725_v15 = vpack.c.bf16 %v10233_v3, %v10226_v62  ;;  %v9301_v38 = vpack.c.bf16 %v10280_v47, %v10239_v5  ;;  %v14162_v3 = vld [vmem:[#allocation16_spill] sm:$0xff]  ;;  %v14198_v61 = vld [vmem:[#allocation21_spill] sm:$0xff]  ;;  %v14209_v5 = vld [vmem:[#allocation23_spill] sm:$0xff] }
  0x7d   :  { %9297 = vmatprep.subr.bf16.mxu0 %v14070_v35  ;;  %v8728_v39 = vpack.c.bf16 %v10290_v6, %v10282_v46  ;;  %v9304_v41 = vpack.c.bf16 %v10297_v4, %v10292_v2  ;;  %v8731_v42 = vpack.c.bf16 %v10309_v49, %v10307_v36  ;;  %v9307_v47 = vpack.c.bf16 %v10333_v0, %v10331_v8  ;;  %v14169_v49 = vld [vmem:[#allocation39_spill] sm:$0xff] }
  0x7e   :  { %7061 = vmatmul.mubr.f32.vlgmr.msra.gmra.mrb[0].mxu1 %v10052_v7  ;;  %v8734_v46 = vpack.c.bf16 %v10351_v28, %v10342_v1  ;;  %v9310_v62 = vpack.c.bf16 %v10397_v50, %v10395_v21  ;;  %v8737_v2 = vpack.c.bf16 %v10412_v29, %v10402_v53  ;;  %v9313_v0 = vpack.c.bf16 %v10416_v20, %v10414_v37  ;;  %v14172_v37 = vld [vmem:[#allocation42_spill] sm:$0xff]  ;;  %v14214_v53 = vld [vmem:[#allocation25_spill] sm:$0xff] }
  0x7f   :  { %8723 = vmatpush3.bf16.msra.mxu1 %v8722_v11  ;;  %7095 = vmatprep.mubr.msk.f32.mxu1 %vm14105_vm0, %v14074_v45  ;;  %v8740_v1 = vpack.c.bf16 %v10435_v12, %v10427_v9  ;;  %v9316_v21 = vpack.c.bf16 %v10476_v33, %v10441_v13  ;;  %v8743_v28 = vpack.c.bf16 %v10491_v57, %v10478_v22  ;;  %v14159_v9 = vld [vmem:[#allocation12_spill] sm:$0xff]  ;;  %v14160_v13 = vmov 1.0|1.0   ;;  %v14174_v12 = vld [vmem:[#allocation43_spill] sm:$0xff] }
  0x80   :  { %7901 = vmatmul.mubr.f32.vlgmr.msra.gmra.mrb[0].mxu0 %v14158_v31  ;;  %8724 = vmatprep.subr.bf16.mxu1 %v14070_v35  ;;  %v9319_v20 = vpack.c.bf16 %v10571_v17, %v10569_v44  ;;  %vm14173_vm6 = vnez %v14172_v37  ;;  %v14180_v18 = vand.u32 4294901760, %v14159_v9  ;;  %v14181_v51 = vand.u32 4294901760, %v14162_v3  ;;  %v14182_v60 = vld [vmem:[#allocation48_spill] sm:$0xff] }
  0x81   :  { %9299 = vmatpush3.bf16.msra.mxu0 %v9298_v23  ;;  %7935 = vmatprep.mubr.msk.f32.mxu0 %vm14105_vm0, %v14074_v45  ;;  %v14183_v56 = vld [vmem:[#allocation49_spill] sm:$0xff]  ;;  %v14199_v11 = vmov 0  ;;  %v14210_v33 = vmov 0  ;;  %v14215_v22 = vmov 0  ;;  %v14218_v17 = vld [vmem:[#allocation28_spill] sm:$0xff] }
  0x82   :  { %9300 = vmatprep.subr.bf16.mxu0 %v14070_v35  ;;  %v14184_v25 = vld [vmem:[#allocation50_spill] sm:$0xff] }
  0x83   :  { %8726 = vmatpush3.bf16.msra.mxu1 %v8725_v15 }
  0x84   :  { %8727 = vmatprep.subr.bf16.mxu1 %v14070_v35 }
  0x85   :  { %9302 = vmatpush3.bf16.msra.mxu0 %v9301_v38 }
  0x86   :  { %9303 = vmatprep.subr.bf16.mxu0 %v14070_v35 }
  0x87   :  { %8729 = vmatpush3.bf16.msra.mxu1 %v8728_v39 }
  0x88   :  { %8730 = vmatprep.subr.bf16.mxu1 %v14070_v35 }
  0x89   :  { %9305 = vmatpush3.bf16.msra.mxu0 %v9304_v41 }
  0x8a   :  { %9306 = vmatprep.subr.bf16.mxu0 %v14070_v35 }
  0x8b   :  { %8732 = vmatpush3.bf16.msra.mxu1 %v8731_v42 }
  0x8c   :  { %8733 = vmatprep.subr.bf16.mxu1 %v14070_v35 }
  0x8d   :  { %9308 = vmatpush3.bf16.msra.mxu0 %v9307_v47 }
  0x8e   :  { %9309 = vmatprep.subr.bf16.mxu0 %v14070_v35 }
  0x8f   :  { %8735 = vmatpush3.bf16.msra.mxu1 %v8734_v46 }
  0x90   :  { %8736 = vmatprep.subr.bf16.mxu1 %v14070_v35 }
  0x91   :  { %9311 = vmatpush3.bf16.msra.mxu0 %v9310_v62 }
  0x92   :  { %9312 = vmatprep.subr.bf16.mxu0 %v14070_v35 }
  0x93   :  { %8738 = vmatpush3.bf16.msra.mxu1 %v8737_v2  ;;  %v14202_v2 = vmov 0 }
  0x94   :  { %8739 = vmatprep.subr.bf16.mxu1 %v14070_v35 }
  0x95   :  { %9314 = vmatpush3.bf16.msra.mxu0 %v9313_v0 }
  0x96   :  { %9315 = vmatprep.subr.bf16.mxu0 %v14070_v35 }
  0x97   :  { %8741 = vmatpush3.bf16.msra.mxu1 %v8740_v1 }
  0x98   :  { %8742 = vmatprep.subr.bf16.mxu1 %v14070_v35 }
  0x99   :  { %9317 = vmatpush3.bf16.msra.mxu0 %v9316_v21 }
  0x9a   :  { %9318 = vmatprep.subr.bf16.mxu0 %v14070_v35 }
  0x9b   :  { %8744 = vmatpush3.bf16.msra.mxu1 %v8743_v28 }
  0x9c   :  { %8745 = vmatprep.subr.bf16.mxu1 %v14070_v35 }
  0x9d   :  { %9320 = vmatpush3.bf16.msra.mxu0 %v9319_v20  ;;  %v14205_v20 = vmov 0 }
  0x9e   :  { %9321 = vmatprep.subr.bf16.mxu0 %v14070_v35  ;;  %7096 = vmatmul.mubr.f32.vlgmr.msra.gmra.mrb[0].mxu1 %v14159_v9 }
  0x9f   :  { %8747 = vmatpush3.bf16.msk.msra.mxu1 %vm10121_vm7, %v14160_v13  ;;  %7130 = vmatprep.mubr.msk.f32.mxu1 %vm14105_vm0, %v14074_v45 }
  0xa0   :  { %7936 = vmatmul.mubr.f32.vlgmr.msra.gmra.mrb[0].mxu0 %v14162_v3  ;;  %8748 = vmatprep.subr.bf16.mxu1 %v14070_v35  ;;  %v14208_v3 = vld [vmem:[#allocation22_spill] sm:$0xff] }
  0xa1   :  { %9323 = vmatpush3.bf16.msk.msra.mxu0 %vm10134_vm8, %v14160_v13  ;;  %7970 = vmatprep.mubr.msk.f32.mxu0 %vm14105_vm0, %v14074_v45 }
  0xa2   :  { %9324 = vmatprep.subr.bf16.mxu0 %v14070_v35 }
  0xa3   :  { %8750 = vmatpush3.bf16.msk.msra.mxu1 %vm10160_vm12, %v14160_v13 }
  0xa4   :  { %8751 = vmatprep.subr.bf16.mxu1 %v14070_v35 }
  0xa5   :  { %9326 = vmatpush3.bf16.msk.msra.mxu0 %vm10189_vm14, %v14160_v13 }
  0xa6   :  { %9327 = vmatprep.subr.bf16.mxu0 %v14070_v35 }
  0xa7   :  { %8753 = vmatpush3.bf16.msk.msra.mxu1 %vm10254_vm4, %v14160_v13 }
  0xa8   :  { %8754 = vmatprep.subr.bf16.mxu1 %v14070_v35 }
  0xa9   :  { %9329 = vmatpush3.bf16.msk.msra.mxu0 %vm10265_vm5, %v14160_v13 }
  0xaa   :  { %9330 = vmatprep.subr.bf16.mxu0 %v14070_v35 }
  0xab   :  { %8756 = vmatpush3.bf16.msk.msra.mxu1 %vm10286_vm10, %v14160_v13 }
  0xac   :  { %8757 = vmatprep.subr.bf16.mxu1 %v14070_v35 }
  0xad   :  { %9332 = vmatpush3.bf16.msk.msra.mxu0 %vm10312_vm1, %v14160_v13  ;;  %vm14175_vm1 = vnez %v14174_v12  ;;  %v60_v12 = vld [vmem:[#allocation5] sm:$0x1] }
  0xae   :  { %9333 = vmatprep.subr.bf16.mxu0 %v14070_v35 }
  0xaf   :  { %8759 = vmatpush3.bf16.msk.msra.mxu1 %vm10326_vm3, %v14160_v13 }
  0xb0   :  { %8760 = vmatprep.subr.bf16.mxu1 %v14070_v35 }
  0xb1   :  { %9335 = vmatpush3.bf16.msk.msra.mxu0 %vm10353_vm13, %v14160_v13 }
  0xb2   :  { %9336 = vmatprep.subr.bf16.mxu0 %v14070_v35 }
  0xb3   :  { %8762 = vmatpush3.bf16.msk.msra.mxu1 %vm14173_vm6, %v14160_v13 }
  0xb4   :  { %8763 = vmatprep.subr.bf16.mxu1 %v14070_v35 }
  0xb5   :  { %9338 = vmatpush3.bf16.msk.msra.mxu0 %vm14175_vm1, %v14160_v13 }
  0xb6   :  { %9339 = vmatprep.subr.bf16.mxu0 %v14070_v35 }
  0xb7   :  { %8765 = vmatpush3.bf16.msk.msra.mxu1 %vm10420_vm9, %v14160_v13 }
  0xb8   :  { %8766 = vmatprep.subr.bf16.mxu1 %v14070_v35 }
  0xb9   :  { %9341 = vmatpush3.bf16.msk.msra.mxu0 %vm10437_vm11, %v14160_v13 }
  0xba   :  { %9342 = vmatprep.subr.bf16.mxu0 %v14070_v35 }
  0xbb   :  { %8768 = vmatpush3.bf16.msk.msra.mxu1 %vm10453_vm2, %v14160_v13 }
  0xbc   :  { %8769 = vmatprep.subr.bf16.mxu1 %v14070_v35 }
  0xbd   :  { %9344 = vmatpush3.bf16.msk.msra.mxu0 %vm10486_vm15, %v14160_v13 }
  0xbe   :  { %9345 = vmatprep.subr.bf16.mxu0 %v14070_v35  ;;  %7131 = vmatmul.mubr.f32.vlgmr.msra.gmra.mrb[0].mxu1 %v14180_v18  ;;  %v14219_v18 = vld [vmem:[#allocation30_spill] sm:$0xff] }
  0xbf   :  { %8771 = vmatpush3.bf16.msra.mxu1 %v10618_v24  ;;  %7165 = vmatprep.mubr.msk.f32.mxu1 %vm14105_vm0, %v14074_v45  ;;  %v5982_v24 = vadd.s32 4294966656, %v14186_v19 }
  0xc0   :  { %7971 = vmatmul.mubr.f32.vlgmr.msra.gmra.mrb[0].mxu0 %v14181_v51  ;;  %8772 = vmatprep.subr.bf16.mxu1 %v14070_v35  ;;  %v3548_v51 = vld [vmem:[#allocation5 + $0x5] sm:$0x1] }
  0xc1   :  { %9347 = vmatpush3.bf16.msra.mxu0 %v10624_v16  ;;  %8005 = vmatprep.mubr.msk.f32.mxu0 %vm14105_vm0, %v14074_v45  ;;  %v14187_v16 = vld [vmem:[#allocation14_spill] sm:$0xff] }
  0xc2   :  { %9348 = vmatprep.subr.bf16.mxu0 %v14070_v35 }
  0xc3   :  { %8774 = vmatpush3.bf16.msra.mxu1 %v10631_v27  ;;  %v10930_v27 = vrot.slane %v14186_v19, %v14187_v16 }
  0xc4   :  { %8775 = vmatprep.subr.bf16.mxu1 %v14070_v35 }
  0xc5   :  { %9350 = vmatpush3.bf16.msra.mxu0 %v10637_v30  ;;  %v10937_v30 = vrot.slane %v5982_v24, %v14187_v16 }
  0xc6   :  { %9351 = vmatprep.subr.bf16.mxu0 %v14070_v35 }
  0xc7   :  { %8777 = vmatpush3.bf16.msra.mxu1 %v10643_v26  ;;  %v14188_v26 = vld [vmem:[#allocation11_spill] sm:$0xff] }
  0xc8   :  { %8778 = vmatprep.subr.bf16.mxu1 %v14070_v35 }
  0xc9   :  { %9353 = vmatpush3.bf16.msra.mxu0 %v10649_v14  ;;  %v14189_v14 = vld [vmem:[#allocation17_spill] sm:$0xff] }
  0xca   :  { %9354 = vmatprep.subr.bf16.mxu0 %v14070_v35 }
  0xcb   :  { %8780 = vmatpush3.bf16.msra.mxu1 %v10655_v54 }
  0xcc   :  { %8781 = vmatprep.subr.bf16.mxu1 %v14070_v35 }
  0xcd   :  { %9356 = vmatpush3.bf16.msra.mxu0 %v10661_v10 }
  0xce   :  { %9357 = vmatprep.subr.bf16.mxu0 %v14070_v35 }
  0xcf   :  { %8783 = vmatpush3.bf16.msra.mxu1 %v14182_v60 }
  0xd0   :  { %8784 = vmatprep.subr.bf16.mxu1 %v14070_v35 }
  0xd1   :  { %9359 = vmatpush3.bf16.msra.mxu0 %v14183_v56 }
  0xd2   :  { %9360 = vmatprep.subr.bf16.mxu0 %v14070_v35 }
  0xd3   :  { %8786 = vmatpush3.bf16.msra.mxu1 %v14184_v25 }
  0xd4   :  { %8787 = vmatprep.subr.bf16.mxu1 %v14070_v35 }
  0xd5   :  { %9362 = vmatpush3.bf16.msra.mxu0 %v10686_v48  ;;  %v14192_v48 = vld [vmem:[#allocation18_spill] sm:$0xff] }
  0xd6   :  { %9363 = vmatprep.subr.bf16.mxu0 %v14070_v35 }
  0xd7   :  { %8789 = vmatpush3.bf16.msra.mxu1 %v10692_v59  ;;  %v14194_v59 = vmov 0 }
  0xd8   :  { %8790 = vmatprep.subr.bf16.mxu1 %v14070_v35 }
  0xd9   :  { %9365 = vmatpush3.bf16.msra.mxu0 %v10698_v40  ;;  %v14340_v40 = vld [vmem:[#allocation15_spill] sm:$0xff] }
  0xda   :  { %9366 = vmatprep.subr.bf16.mxu0 %v14070_v35 }
  0xdb   :  { %8792 = vmatpush3.bf16.msra.mxu1 %v10702_v32 }
  0xdc   :  { %8793 = vmatprep.subr.bf16.mxu1 %v14070_v35 }
  0xdd   :  { %9368 = vmatpush3.bf16.msra.mxu0 %v10704_v58  ;;  %v14197_v58 = vld [vmem:[#allocation20_spill] sm:$0xff] }
  0xde   :  { %9369 = vmatprep.subr.bf16.mxu0 %v14070_v35  ;;  %7166 = vmatmul.mubr.f32.vlgmr.msra.gmra.mrb[0].mxu1 %v10052_v7 }
  0xdf   :  { %8795 = vmatpush3.bf16.msk.msra.mxu1 %vm10121_vm7, %v14160_v13  ;;  %7200 = vmatprep.mubr.msk.f32.mxu1 %vm14105_vm0, %v14074_v45  ;;  %vm14185_vm7 = vnez %v14169_v49  ;;  %v14213_v49 = vld [vmem:[#allocation24_spill] sm:$0xff] }
  0xe0   :  { %8006 = vmatmul.mubr.f32.vlgmr.msra.gmra.mrb[0].mxu0 %v14158_v31  ;;  %8796 = vmatprep.subr.bf16.mxu1 %v14070_v35 }
  0xe1   :  { %9371 = vmatpush3.bf16.msk.msra.mxu0 %vm10134_vm8, %v14160_v13  ;;  %8040 = vmatprep.mubr.msk.f32.mxu0 %vm14105_vm0, %v14074_v45  ;;  %vm67_vm8 = vcmp.eq.s32.totalorder %v14188_v26, %v10930_v27 }
  0xe2   :  { %9372 = vmatprep.subr.bf16.mxu0 %v14070_v35  ;;  %v5658_v54 = vsel %vm67_vm8, 1.0, %v14074_v45 }
  0xe3   :  { %8798 = vmatpush3.bf16.msk.msra.mxu1 %vm10160_vm12, %v14160_v13  ;;  %vm68_vm12 = vcmp.eq.s32.totalorder %v14189_v14, %v10930_v27 }
  0xe4   :  { %8799 = vmatprep.subr.bf16.mxu1 %v14070_v35  ;;  %v5659_v10 = vsel %vm68_vm12, 1.0, %v14074_v45 }
  0xe5   :  { %9374 = vmatpush3.bf16.msk.msra.mxu0 %vm10189_vm14, %v14160_v13  ;;  %vm3555_vm14 = vcmp.eq.s32.totalorder %v14188_v26, %v10937_v30  ;;  %v11032_v38 = vsub.f32 %v5659_v10, %v5659_v10 }
  0xe6   :  { %9375 = vmatprep.subr.bf16.mxu0 %v14070_v35  ;;  %v5983_v63 = vsel %vm3555_vm14, 1.0, %v14074_v45 }
  0xe7   :  { %8801 = vmatpush3.bf16.msk.msra.mxu1 %vm10254_vm4, %v14160_v13  ;;  %vm3556_vm4 = vcmp.eq.s32.totalorder %v14189_v14, %v10937_v30  ;;  %v11047_v42 = vsub.f32 %v5983_v63, %v5983_v63  ;;  %v14252_v14 = vld [vmem:[#allocation35_spill] sm:$0xff] }
  0xe8   :  { %8802 = vmatprep.subr.bf16.mxu1 %v14070_v35  ;;  %v5984_v32 = vsel %vm3556_vm4, 1.0, %v14074_v45 }
  0xe9   :  { %9377 = vmatpush3.bf16.msk.msra.mxu0 %vm10265_vm5, %v14160_v13  ;;  %vm10958_vm5 = vmpackc.low %vm68_vm12, %vm67_vm8  ;;  %v11049_v47 = vsub.f32 %v5984_v32, %v5984_v32 }
  0xea   :  { %9378 = vmatprep.subr.bf16.mxu0 %v14070_v35 }
  0xeb   :  { %8804 = vmatpush3.bf16.msk.msra.mxu1 %vm10286_vm10, %v14160_v13  ;;  %vm69_vm10 = vcmp.eq.s32.totalorder %v14192_v48, %v10930_v27 }
  0xec   :  { %8805 = vmatprep.subr.bf16.mxu1 %v14070_v35  ;;  %v5660_v43 = vsel %vm69_vm10, 1.0, %v14074_v45 }
  0xed   :  { %9380 = vmatpush3.bf16.msk.msra.mxu0 %vm14185_vm7, %v14160_v13  ;;  %vm3560_vm7 = vcmp.eq.s32.totalorder %v14198_v61, %v10937_v30  ;;  %v11052_v46 = vsub.f32 %v5660_v43, %v5660_v43  ;;  %v11204_v43 = vand.u32 4294901760, %v60_v12 }
  0xee   :  { %9381 = vmatprep.subr.bf16.mxu0 %v14070_v35  ;;  %v5988_v41 = vsel %vm3560_vm7, 1.0, %v14074_v45 }
  0xef   :  { %8807 = vmatpush3.bf16.msk.msra.mxu1 %vm10326_vm3, %v14160_v13  ;;  %vm10973_vm3 = vmpackc.low %vm3556_vm4, %vm3555_vm14  ;;  %v11090_v50 = vsub.f32 %v5988_v41, %v5988_v41  ;;  %vm73_vm14 = vcmp.eq.s32.totalorder %v14208_v3, %v10930_v27  ;;  %vm74_vm4 = vcmp.eq.s32.totalorder %v14209_v5, %v10930_v27 }
  0xf0   :  { %8808 = vmatprep.subr.bf16.mxu1 %v14070_v35  ;;  %v14195_v59 = vsel %vm10973_vm3, 4294967295, %v14194_v59  ;;  %v5664_v6 = vsel %vm73_vm14, 1.0, %v14074_v45  ;;  %v5665_v8 = vsel %vm74_vm4, 1.0, %v14074_v45 }
  0xf1   :  { %9383 = vmatpush3.bf16.msk.msra.mxu0 %vm10353_vm13, %v14160_v13  ;;  %14196 = vst [vmem:[#allocation13_spill] sm:$0xff] %v14195_v59  ;;  %vm3557_vm13 = vcmp.eq.s32.totalorder %v14192_v48, %v10937_v30  ;;  %v11175_v60 = vsub.f32 %v5664_v6, %v5664_v6  ;;  %v11177_v56 = vsub.f32 %v5665_v8, %v5665_v8 }
  0xf2   :  { %9384 = vmatprep.subr.bf16.mxu0 %v14070_v35 }
  0xf3   :  { %8810 = vmatpush3.bf16.msk.msra.mxu1 %vm14173_vm6, %v14160_v13  ;;  %vm3559_vm6 = vcmp.eq.s32.totalorder %v14197_v58, %v10937_v30 }
  0xf4   :  { %8811 = vmatprep.subr.bf16.mxu1 %v14070_v35  ;;  %v5987_v39 = vsel %vm3559_vm6, 1.0, %v14074_v45 }
  0xf5   :  { %9386 = vmatpush3.bf16.msk.msra.mxu0 %vm14175_vm1, %v14160_v13  ;;  %vm70_vm1 = vcmp.eq.s32.totalorder %v14193_v34, %v10930_v27  ;;  %v11088_v9 = vsub.f32 %v5987_v39, %v5987_v39 }
  0xf6   :  { %9387 = vmatprep.subr.bf16.mxu0 %v14070_v35  ;;  %v5661_v52 = vsel %vm70_vm1, 1.0, %v14074_v45 }
  0xf7   :  { %8813 = vmatpush3.bf16.msk.msra.mxu1 %vm10420_vm9, %v14160_v13  ;;  %vm3558_vm9 = vcmp.eq.s32.totalorder %v14193_v34, %v10937_v30  ;;  %v11054_v62 = vsub.f32 %v5661_v52, %v5661_v52 }
  0xf8   :  { %8814 = vmatprep.subr.bf16.mxu1 %v14070_v35  ;;  %v5986_v55 = vsel %vm3558_vm9, 1.0, %v14074_v45  ;;  %vm11062_vm8 = vmpackc.low %vm3558_vm9, %vm3557_vm13  ;;  %vm13808_vm9 = vcmp.eq.s32.totalorder %v14213_v49, %v10930_v27 }
  0xf9   :  { %9389 = vmatpush3.bf16.msk.msra.mxu0 %vm10437_vm11, %v14160_v13  ;;  %vm71_vm11 = vcmp.eq.s32.totalorder %v14197_v58, %v10930_v27  ;;  %v14203_v2 = vsel %vm11062_vm8, 4294967295, %v14202_v2  ;;  %v11071_v1 = vsub.f32 %v5986_v55, %v5986_v55  ;;  %v5666_v29 = vsel %vm13808_vm9, 1.0, %v14074_v45 }
  0xfa   :  { %9390 = vmatprep.subr.bf16.mxu0 %v14070_v35  ;;  %v5662_v23 = vsel %vm71_vm11, 1.0, %v14074_v45  ;;  %14204 = vst [vmem:[#allocation26_spill] sm:$0xff] %v14203_v2  ;;  %vm13809_vm9 = vcmp.eq.s32.totalorder %v14219_v18, %v10930_v27  ;;  %v11202_v32 = vsub.f32 %v5666_v29, %v5666_v29  ;;  %v14229_v29 = vmov 0 }
  0xfb   :  { %8816 = vmatpush3.bf16.msk.msra.mxu1 %vm10453_vm2, %v14160_v13  ;;  %vm72_vm2 = vcmp.eq.s32.totalorder %v14198_v61, %v10930_v27  ;;  %v11073_v21 = vsub.f32 %v5662_v23, %v5662_v23  ;;  %v5669_v24 = vsel %vm13809_vm9, 1.0, %v14074_v45  ;;  %v11215_v23 = vand.u32 4294901760, %v3548_v51 }
  0xfc   :  { %8817 = vmatprep.subr.bf16.mxu1 %v14070_v35  ;;  %v5663_v15 = vsel %vm72_vm2, 1.0, %v14074_v45  ;;  %vm11084_vm12 = vmpackc.low %vm72_vm2, %vm71_vm11  ;;  %vm13807_vm11 = vcmp.eq.s32.totalorder %v14214_v53, %v10930_v27  ;;  %vm3563_vm2 = vcmp.eq.s32.totalorder %v14213_v49, %v10937_v30  ;;  %v11230_v41 = vsub.f32 %v5669_v24, %v5669_v24 }
  0xfd   :  { %9392 = vmatpush3.bf16.msk.msra.mxu0 %vm10486_vm15, %v14160_v13  ;;  %vm11014_vm15 = vmpackc.low %vm70_vm1, %vm69_vm10  ;;  %v11075_v28 = vsub.f32 %v5663_v15, %v5663_v15  ;;  %v14206_v20 = vsel %vm11084_vm12, 4294967295, %v14205_v20  ;;  %vm3561_vm10 = vcmp.eq.s32.totalorder %v14208_v3, %v10937_v30  ;;  %vm3562_vm1 = vcmp.eq.s32.totalorder %v14209_v5, %v10937_v30 }
  0xfe   :  { %9393 = vmatprep.subr.bf16.mxu0 %v14070_v35  ;;  %7201 = vmatmul.mubr.f32.vlgmr.msra.gmra.mrb[0].mxu1 %v10052_v7  ;;  %v5985_v7 = vsel %vm3557_vm13, 1.0, %v14074_v45  ;;  %v14200_v11 = vsel %vm11014_vm15, 4294967295, %v14199_v11  ;;  %14207 = vst [vmem:[#allocation16_spill] sm:$0xff] %v14206_v20  ;;  %vm11118_vm13 = vmpackc.low %vm3560_vm7, %vm3559_vm6  ;;  %v5989_v4 = vsel %vm3561_vm10, 1.0, %v14074_v45  ;;  %v5990_v36 = vsel %vm3562_vm1, 1.0, %v14074_v45 }
  0xff   :  { %8819 = vmatpush3.bf16.msk.msra.mxu1 %vm10958_vm5, %v14160_v13  ;;  %7235 = vmatprep.mubr.msk.f32.mxu1 %vm14105_vm0, %v14074_v45  ;;  %14201 = vst [vmem:[#allocation12_spill] sm:$0xff] %v14200_v11  ;;  %v11069_v0 = vsub.f32 %v5985_v7, %v5985_v7  ;;  %v14211_v33 = vsel %vm11118_vm13, 4294967295, %v14210_v33  ;;  %v5667_v37 = vsel %vm13807_vm11, 1.0, %v14074_v45  ;;  %vm3564_vm6 = vcmp.eq.s32.totalorder %v14214_v53, %v10937_v30  ;;  %vm11156_vm7 = vmpackc.low %vm74_vm4, %vm73_vm14 }
 0x100   :  { %8041 = vmatmul.mubr.f32.vlgmr.msra.gmra.mrb[0].mxu0 %v14158_v31  ;;  %8820 = vmatprep.subr.bf16.mxu1 %v14070_v35  ;;  %v11030_v31 = vsub.f32 %v5658_v54, %v5658_v54  ;;  %14212 = vst [vmem:[#allocation27_spill] sm:$0xff] %v14211_v33  ;;  %v14216_v22 = vsel %vm11156_vm7, 4294967295, %v14215_v22  ;;  %v5991_v57 = vsel %vm3563_vm2, 1.0, %v14074_v45  ;;  %v5992_v44 = vsel %vm3564_vm6, 1.0, %v14074_v45  ;;  %vm11194_vm14 = vmpackc.low %vm3562_vm1, %vm3561_vm10 }
 0x101   :  { %9395 = vmatpush3.bf16.msk.msra.mxu0 %vm10973_vm3, %v14160_v13  ;;  %8075 = vmatprep.mubr.msk.f32.mxu0 %vm14105_vm0, %v14074_v45  ;;  %14217 = vst [vmem:[#allocation29_spill] sm:$0xff] %v14216_v22  ;;  %vm13810_vm11 = vcmp.eq.s32.totalorder %v14218_v17, %v10930_v27  ;;  %v14220_v54 = vmov 0  ;;  %v11198_v10 = vsub.f32 %v5989_v4, %v5989_v4  ;;  %v14225_v15 = vmov 0  ;;  %v14228_v4 = vld [vmem:[#allocation32_spill] sm:$0xff] }
 0x102   :  { %9396 = vmatprep.subr.bf16.mxu0 %v14070_v35  ;;  %v5668_v25 = vsel %vm13810_vm11, 1.0, %v14074_v45  ;;  %v14221_v54 = vsel %vm11194_vm14, 4294967295, %v14220_v54  ;;  %v11200_v63 = vsub.f32 %v5990_v36, %v5990_v36  ;;  %v11209_v52 = vsub.f32 %v5667_v37, %v5667_v37  ;;  %v14232_v37 = vld [vmem:[#allocation33_spill] sm:$0xff] }
 0x103   :  { %8822 = vmatpush3.bf16.msk.msra.mxu1 %vm11014_vm15, %v14160_v13  ;;  %14222 = vst [vmem:[#allocation31_spill] sm:$0xff] %v14221_v54  ;;  %v11211_v7 = vsub.f32 %v5991_v57, %v5991_v57  ;;  %v11213_v55 = vsub.f32 %v5992_v44, %v5992_v44  ;;  %vm14223_vm4 = vcmp.eq.s32.totalorder %v14213_v49, %v10930_v27  ;;  %v14238_v58 = vand.u32 4294901760, %v11030_v31 }
 0x104   :  { %8823 = vmatprep.subr.bf16.mxu1 %v14070_v35  ;;  %vm14224_vm10 = vcmp.eq.s32.totalorder %v14214_v53, %v10930_v27  ;;  %v11228_v39 = vsub.f32 %v5668_v25, %v5668_v25  ;;  %vm13813_vm9 = vcmp.eq.s32.totalorder %v14218_v17, %v10937_v30  ;;  %vm13811_vm11 = vcmp.eq.s32.totalorder %v14219_v18, %v10937_v30 }
 0x105   :  { %9398 = vmatpush3.bf16.msk.msra.mxu0 %vm11062_vm8, %v14160_v13  ;;  %vm11224_vm1 = vmpackc.low %vm14224_vm10, %vm14223_vm4  ;;  %v5993_v6 = vsel %vm13813_vm9, 1.0, %v14074_v45  ;;  %v5994_v8 = vsel %vm13811_vm11, 1.0, %v14074_v45  ;;  %vm13812_vm4 = vcmp.eq.s32.totalorder %v14228_v4, %v10930_v27  ;;  %vm80_vm11 = vcmp.eq.s32.totalorder %v14232_v37, %v10930_v27 }
 0x106   :  { %9399 = vmatprep.subr.bf16.mxu0 %v14070_v35  ;;  %v14226_v15 = vsel %vm11224_vm1, 4294967295, %v14225_v15  ;;  %vm11257_vm10 = vmpackc.low %vm3564_vm6, %vm3563_vm2  ;;  %v5670_v57 = vsel %vm13812_vm4, 1.0, %v14074_v45  ;;  %v11268_v44 = vsub.f32 %v60_v12, %v11204_v43  ;;  %v5671_v24 = vsel %vm80_vm11, 1.0, %v14074_v45 }
 0x107   :  { %8825 = vmatpush3.bf16.msk.msra.mxu1 %vm11084_vm12, %v14160_v13  ;;  %14227 = vst [vmem:[#allocation36_spill] sm:$0xff] %v14226_v15  ;;  %v14230_v29 = vsel %vm11257_vm10, 4294967295, %v14229_v29  ;;  %vm13827_vm2 = vcmp.eq.s32.totalorder %v14228_v4, %v10937_v30  ;;  %vm13823_vm6 = vcmp.eq.s32.totalorder %v14232_v37, %v10937_v30  ;;  %v11283_v12 = vsub.f32 %v3548_v51, %v11215_v23 }
 0x108   :  { %8826 = vmatprep.subr.bf16.mxu1 %v14070_v35  ;;  %14231 = vst [vmem:[#allocation37_spill] sm:$0xff] %v14230_v29  ;;  %vm14233_vm4 = vcmp.eq.s32.totalorder %v14218_v17, %v10930_v27  ;;  %vm14234_vm9 = vcmp.eq.s32.totalorder %v14219_v18, %v10930_v27  ;;  %v14235_v25 = vmov 0  ;;  %v5995_v36 = vsel %vm13827_vm2, 1.0, %v14074_v45 }
 0x109   :  { %9401 = vmatpush3.bf16.msk.msra.mxu0 %vm11118_vm13, %v14160_v13  ;;  %v5996_v51 = vsel %vm13823_vm6, 1.0, %v14074_v45  ;;  %v11309_v5 = vsub.f32 %v5993_v6, %v5993_v6  ;;  %v11311_v3 = vsub.f32 %v5994_v8, %v5994_v8  ;;  %v11313_v61 = vsub.f32 %v5670_v57, %v5670_v57 }
 0x10a   :  { %9402 = vmatprep.subr.bf16.mxu0 %v14070_v35  ;;  %v907_v34 = vsub.f32 %v11030_v31, %v14238_v58  ;;  %v14241_v49 = vmov 0  ;;  %v14244_v8 = vand.u32 4294901760, %v11032_v38  ;;  %v11342_v48 = vsub.f32 %v5996_v51, %v5996_v51 }
 0x10b   :  { %8828 = vmatpush3.bf16.msk.msra.mxu1 %vm11156_vm7, %v14160_v13  ;;  %v14251_v6 = vand.u32 4294901760, %v11049_v47  ;;  %vm14253_vm2 = vcmp.eq.s32.totalorder %v14228_v4, %v10937_v30  ;;  %v14275_v33 = vand.u32 4294901760, %v11075_v28  ;;  %v14279_v11 = vand.u32 4294901760, %v11177_v56 }
 0x10c   :  { %8829 = vmatprep.subr.bf16.mxu1 %v14070_v35  ;;  %v914_v57 = vsub.f32 %v11032_v38, %v14244_v8  ;;  %v14246_v8 = vmov 0  ;;  %v908_v26 = vand.u32 4294901760, %v907_v34  ;;  %v14259_v34 = vand.u32 4294901760, %v11052_v46 }
 0x10d   :  { %9404 = vmatpush3.bf16.msk.msra.mxu0 %vm11194_vm14, %v14160_v13  ;;  %v3705_v53 = vsub.f32 %v11049_v47, %v14251_v6  ;;  %v14255_v6 = vmov 0  ;;  %v942_v20 = vsub.f32 %v11075_v28, %v14275_v33  ;;  %v14277_v33 = vand.u32 4294901760, %v11090_v50 }
 0x10e   :  { %9405 = vmatprep.subr.bf16.mxu0 %v14070_v35  ;;  %v915_v19 = vand.u32 4294901760, %v914_v57  ;;  %v921_v16 = vsub.f32 %v11052_v46, %v14259_v34 }
 0x10f   :  { %8831 = vmatpush3.bf16.msk.msra.mxu1 %vm11224_vm1, %v14160_v13  ;;  %vm11292_vm1 = vmpackc.low %vm14234_vm9, %vm14233_vm4  ;;  %vm14239_vm9 = vcmp.eq.s32.totalorder %v14218_v17, %v10937_v30  ;;  %vm14240_vm4 = vcmp.eq.s32.totalorder %v14219_v18, %v10937_v30  ;;  %v11338_v17 = vsub.f32 %v5671_v24, %v5671_v24  ;;  %v11340_v18 = vsub.f32 %v5995_v36, %v5995_v36  ;;  %v14249_v24 = vld [vmem:[#allocation34_spill] sm:$0xff] }
 0x110   :  { %8832 = vmatprep.subr.bf16.mxu1 %v14070_v35  ;;  %v14236_v25 = vsel %vm11292_vm1, 4294967295, %v14235_v25  ;;  %vm11325_vm6 = vmpackc.low %vm14240_vm4, %vm14239_vm9  ;;  %vm14245_vm9 = vcmp.eq.s32.totalorder %v14228_v4, %v10930_v27  ;;  %v14250_v36 = vand.u32 4294901760, %v11047_v42  ;;  %v8842_v15 = vpack.c.bf16 %v915_v19, %v908_v26 }
 0x111   :  { %14237 = vst [vmem:[#allocation38_spill] sm:$0xff] %v14236_v25  ;;  %9407 = vmatpush3.bf16.msk.msra.mxu0 %vm11257_vm10, %v14160_v13  ;;  %v14242_v49 = vsel %vm11325_vm6, 4294967295, %v14241_v49  ;;  %vm11352_vm4 = vmpackc.low %vm80_vm11, %vm14245_vm9  ;;  %vm82_vm11 = vcmp.eq.s32.totalorder %v14252_v14, %v10930_v27  ;;  %v922_v54 = vand.u32 4294901760, %v921_v16  ;;  %v3733_v2 = vsub.f32 %v11090_v50, %v14277_v33 }
 0x112   :  { %9408 = vmatprep.subr.bf16.mxu0 %v14070_v35  ;;  %14243 = vst [vmem:[#allocation39_spill] sm:$0xff] %v14242_v49  ;;  %v14247_v8 = vsel %vm11352_vm4, 4294967295, %v14246_v8  ;;  %v3698_v51 = vsub.f32 %v11047_v42, %v14250_v36  ;;  %v14258_v36 = vand.u32 4294901760, %v11268_v44  ;;  %v14260_v49 = vand.u32 4294901760, %v11054_v62 }
 0x113   :  { %8834 = vmatpush3.bf16.msk.msra.mxu1 %vm11292_vm1, %v14160_v13  ;;  %14248 = vst [vmem:[#allocation40_spill] sm:$0xff] %v14247_v8  ;;  %vm14254_vm1 = vcmp.eq.s32.totalorder %v14232_v37, %v10937_v30  ;;  %v14261_v37 = vand.u32 4294901760, %v11283_v12  ;;  %v3706_v8 = vand.u32 4294901760, %v3705_v53  ;;  %v5673_v53 = vsel %vm82_vm11, 1.0, %v14074_v45 }
 0x114   :  { %8835 = vmatprep.subr.bf16.mxu1 %v14070_v35  ;;  %vm11380_vm10 = vmpackc.low %vm14254_vm1, %vm14253_vm2  ;;  %v896_v58 = vsub.f32 %v11268_v44, %v14258_v36  ;;  %v928_v4 = vsub.f32 %v11054_v62, %v14260_v49  ;;  %vm14262_vm2 = vcmp.eq.s32.totalorder %v14249_v24, %v10930_v27  ;;  %v14263_v49 = vmov 0 }
 0x115   :  { %9410 = vmatpush3.bf16.msk.msra.mxu0 %vm11325_vm6, %v14160_v13  ;;  %v14256_v6 = vsel %vm11380_vm10, 4294967295, %v14255_v6  ;;  %v3687_v36 = vsub.f32 %v11283_v12, %v14261_v37  ;;  %vm11410_vm9 = vmpackc.low %vm82_vm11, %vm14262_vm2  ;;  %v3699_v34 = vand.u32 4294901760, %v3698_v51  ;;  %v14266_v37 = vand.u32 4294901760, %v11069_v0 }
 0x116   :  { %9411 = vmatprep.subr.bf16.mxu0 %v14070_v35  ;;  %14257 = vst [vmem:[#allocation41_spill] sm:$0xff] %v14256_v6  ;;  %v14264_v49 = vsel %vm11410_vm9, 4294967295, %v14263_v49  ;;  %vm14267_vm1 = vmmov %vm14262_vm2  ;;  %v14268_v51 = vand.u32 4294901760, %v11071_v1  ;;  %vm14269_vm2 = vcmp.eq.s32.totalorder %v14249_v24, %v10937_v30  ;;  %v14271_v6 = vmov 0 }
 0x117   :  { %8837 = vmatpush3.bf16.msk.msra.mxu1 %vm11352_vm4, %v14160_v13  ;;  %14265 = vst [vmem:[#allocation42_spill] sm:$0xff] %v14264_v49  ;;  %v3712_v57 = vsub.f32 %v11069_v0, %v14266_v37  ;;  %v5672_v29 = vsel %vm14267_vm1, 1.0, %v14074_v45  ;;  %v897_v27 = vand.u32 4294901760, %v896_v58  ;;  %v929_v22 = vand.u32 4294901760, %v928_v4 }
 0x118   :  { %8838 = vmatprep.subr.bf16.mxu1 %v14070_v35  ;;  %v3719_v37 = vsub.f32 %v11071_v1, %v14268_v51  ;;  %v14274_v51 = vand.u32 4294901760, %v11073_v21  ;;  %v3688_v19 = vand.u32 4294901760, %v3687_v36  ;;  %v9418_v16 = vpack.c.bf16 %v3706_v8, %v3699_v34 }
 0x119   :  { %9413 = vmatpush3.bf16.msk.msra.mxu0 %vm11380_vm10, %v14160_v13  ;;  %vm14270_vm10 = vcmp.eq.s32.totalorder %v14252_v14, %v10937_v30  ;;  %v3713_v26 = vand.u32 4294901760, %v3712_v57  ;;  %v14276_v4 = vand.u32 4294901760, %v11088_v9  ;;  %v13868_v49 = vand.u32 4294901760, %v11200_v63 }
 0x11a   :  { %9414 = vmatprep.subr.bf16.mxu0 %v14070_v35  ;;  %vm11440_vm1 = vmpackc.low %vm14270_vm10, %vm14269_vm2  ;;  %v935_v25 = vsub.f32 %v11073_v21, %v14274_v51  ;;  %v3720_v51 = vand.u32 4294901760, %v3719_v37  ;;  %v11467_v36 = vsub.f32 %v5672_v29, %v5672_v29  ;;  %v8845_v8 = vpack.c.bf16 %v929_v22, %v922_v54 }
 0x11b   :  { %v14272_v6 = vsel %vm11440_vm1, 4294967295, %v14271_v6  ;;  %8840 = vmatpush3.bf16.msk.msra.mxu1 %vm11410_vm9, %v14160_v13  ;;  %v3726_v58 = vsub.f32 %v11088_v9, %v14276_v4  ;;  %v13869_v57 = vand.u32 4294901760, %v11202_v32  ;;  %v13870_v34 = vand.u32 4294901760, %v11209_v52  ;;  %vm14281_vm10 = vmmov %vm14269_vm2 }
 0x11c   :  { %14273 = vst [vmem:[#allocation43_spill] sm:$0xff] %v14272_v6  ;;  %8841 = vmatprep.subr.bf16.mxu1 %v14070_v35  ;;  %v936_v37 = vand.u32 4294901760, %v935_v25  ;;  %v943_v4 = vand.u32 4294901760, %v942_v20  ;;  %v14278_v6 = vand.u32 4294901760, %v11175_v60  ;;  %v956_v29 = vsub.f32 %v11177_v56, %v14279_v11 }
 0x11d   :  { %9416 = vmatpush3.bf16.msk.msra.mxu0 %vm11440_vm1, %v14160_v13  ;;  %v3727_v22 = vand.u32 4294901760, %v3726_v58  ;;  %v13871_v54 = vand.u32 4294901760, %v11211_v7  ;;  %v13873_v20 = vand.u32 4294901760, %v11213_v55  ;;  %v3734_v25 = vand.u32 4294901760, %v3733_v2 }
 0x11e   :  { %9417 = vmatprep.subr.bf16.mxu0 %v14070_v35  ;;  %7236 = vmatmul.mubr.f32.vlgmr.msra.gmra.mrb[0].mxu1 %v897_v27  ;;  %v949_v33 = vsub.f32 %v11175_v60, %v14278_v6  ;;  %v11480_v27 = vsub.f32 %v5673_v53, %v5673_v53  ;;  %v14280_v6 = vand.u32 4294901760, %v11198_v10  ;;  %v3747_v53 = vsub.f32 %v11200_v63, %v13868_v49 }
 0x11f   :  { %8843 = vmatpush3.bf16.msra.mxu1 %v8842_v15  ;;  %7270 = vmatprep.mubr.msk.f32.mxu1 %vm14105_vm0, %v14074_v45  ;;  %v9421_v15 = vpack.c.bf16 %v3720_v51, %v3713_v26  ;;  %v970_v2 = vsub.f32 %v11209_v52, %v13870_v34  ;;  %v5997_v58 = vsel %vm14281_vm10, 1.0, %v14074_v45  ;;  %v8848_v51 = vpack.c.bf16 %v943_v4, %v936_v37 }
 0x120   :  { %8076 = vmatmul.mubr.f32.vlgmr.msra.gmra.mrb[0].mxu0 %v3688_v19  ;;  %8844 = vmatprep.subr.bf16.mxu1 %v14070_v35  ;;  %v3740_v11 = vsub.f32 %v11198_v10, %v14280_v6  ;;  %v963_v19 = vsub.f32 %v11202_v32, %v13869_v57  ;;  %v950_v6 = vand.u32 4294901760, %v949_v33  ;;  %v957_v49 = vand.u32 4294901760, %v956_v29 }
 0x121   :  { %9419 = vmatpush3.bf16.msra.mxu0 %v9418_v16  ;;  %8110 = vmatprep.mubr.msk.f32.mxu0 %vm14105_vm0, %v14074_v45  ;;  %v3754_v57 = vsub.f32 %v11211_v7, %v13871_v54  ;;  %v3761_v34 = vsub.f32 %v11213_v55, %v13873_v20  ;;  %vm14282_vm11 = vcmp.eq.s32.totalorder %v14252_v14, %v10937_v30  ;;  %v3748_v33 = vand.u32 4294901760, %v3747_v53 }
 0x122   :  { %9420 = vmatprep.subr.bf16.mxu0 %v14070_v35  ;;  %v9424_v37 = vpack.c.bf16 %v3734_v25, %v3727_v22  ;;  %v3741_v4 = vand.u32 4294901760, %v3740_v11  ;;  %v964_v29 = vand.u32 4294901760, %v963_v19  ;;  %v971_v54 = vand.u32 4294901760, %v970_v2 }
 0x123   :  { %8846 = vmatpush3.bf16.msra.mxu1 %v8845_v8  ;;  %v5998_v8 = vsel %vm14282_vm11, 1.0, %v14074_v45  ;;  %v14283_v24 = vand.u32 4294901760, %v11228_v39  ;;  %v14284_v26 = vand.u32 4294901760, %v11230_v41  ;;  %v11526_v59 = vsub.f32 %v5997_v58, %v5997_v58 }
 0x124   :  { %8847 = vmatprep.subr.bf16.mxu1 %v14070_v35  ;;  %v8851_v30 = vpack.c.bf16 %v957_v49, %v950_v6  ;;  %v990_v22 = vand.u32 4294901760, %v11313_v61  ;;  %v3755_v25 = vand.u32 4294901760, %v3754_v57  ;;  %v3762_v11 = vand.u32 4294901760, %v3761_v34 }
 0x125   :  { %9422 = vmatpush3.bf16.msra.mxu0 %v9421_v15  ;;  %v977_v20 = vsub.f32 %v11228_v39, %v14283_v24  ;;  %v984_v16 = vsub.f32 %v11230_v41, %v14284_v26  ;;  %v13876_v15 = vand.u32 4294901760, %v11338_v17  ;;  %v14285_v53 = vand.u32 4294901760, %v11309_v5 }
 0x126   :  { %9423 = vmatprep.subr.bf16.mxu0 %v14070_v35  ;;  %v14286_v19 = vand.u32 4294901760, %v11311_v3  ;;  %v11537_v26 = vsub.f32 %v5998_v8, %v5998_v8  ;;  %v9427_v49 = vpack.c.bf16 %v3748_v33, %v3741_v4  ;;  %v13878_v58 = vand.u32 4294901760, %v11340_v18 }
 0x127   :  { %8849 = vmatpush3.bf16.msra.mxu1 %v8848_v51  ;;  %v3768_v24 = vsub.f32 %v11309_v5, %v14285_v53  ;;  %v13877_v51 = vand.u32 4294901760, %v11342_v48  ;;  %v8854_v57 = vpack.c.bf16 %v971_v54, %v964_v29  ;;  %v978_v34 = vand.u32 4294901760, %v977_v20 }
 0x128   :  { %8850 = vmatprep.subr.bf16.mxu1 %v14070_v35  ;;  %v3775_v2 = vsub.f32 %v11311_v3, %v14286_v19  ;;  %v985_v6 = vand.u32 4294901760, %v984_v16  ;;  %v991_v53 = vsub.f32 %v11313_v61, %v990_v22  ;;  %v998_v8 = vsub.f32 %v11338_v17, %v13876_v15 }
 0x129   :  { %9425 = vmatpush3.bf16.msra.mxu0 %v9424_v37  ;;  %v13882_v37 = vand.u32 4294901760, %v11467_v36  ;;  %v13881_v4 = vand.u32 4294901760, %v11480_v27  ;;  %v9430_v33 = vpack.c.bf16 %v3762_v11, %v3755_v25  ;;  %v3769_v19 = vand.u32 4294901760, %v3768_v24 }
 0x12a   :  { %9426 = vmatprep.subr.bf16.mxu0 %v14070_v35  ;;  %v3776_v54 = vand.u32 4294901760, %v3775_v2  ;;  %v3782_v20 = vsub.f32 %v11340_v18, %v13878_v58  ;;  %v3789_v16 = vsub.f32 %v11342_v48, %v13877_v51  ;;  %v13880_v29 = vand.u32 4294901760, %v11526_v59 }
 0x12b   :  { %8852 = vmatpush3.bf16.msra.mxu1 %v8851_v30  ;;  %v13879_v30 = vand.u32 4294901760, %v11537_v26  ;;  %v8857_v15 = vpack.c.bf16 %v985_v6, %v978_v34  ;;  %v992_v25 = vand.u32 4294901760, %v991_v53  ;;  %v999_v11 = vand.u32 4294901760, %v998_v8 }
 0x12c   :  { %8853 = vmatprep.subr.bf16.mxu1 %v14070_v35  ;;  %v1005_v24 = vsub.f32 %v11467_v36, %v13882_v37  ;;  %v1012_v2 = vsub.f32 %v11480_v27, %v13881_v4  ;;  %v3783_v51 = vand.u32 4294901760, %v3782_v20  ;;  %v3790_v58 = vand.u32 4294901760, %v3789_v16 }
 0x12d   :  { %9428 = vmatpush3.bf16.msra.mxu0 %v9427_v49  ;;  %v9433_v49 = vpack.c.bf16 %v3776_v54, %v3769_v19  ;;  %v3803_v34 = vsub.f32 %v11537_v26, %v13879_v30  ;;  %v8860_v6 = vpack.c.bf16 %v999_v11, %v992_v25  ;;  %v9445_v25 = vpack.c.bf16 %v11071_v1, %v11069_v0 }
 0x12e   :  { %9429 = vmatprep.subr.bf16.mxu0 %v14070_v35  ;;  %v1006_v53 = vand.u32 4294901760, %v1005_v24  ;;  %v1013_v8 = vand.u32 4294901760, %v1012_v2  ;;  %v8872_v11 = vpack.c.bf16 %v11075_v28, %v11073_v21  ;;  %v9448_v24 = vpack.c.bf16 %v11090_v50, %v11088_v9 }
 0x12f   :  { %8855 = vmatpush3.bf16.msra.mxu1 %v8854_v57  ;;  %v3796_v57 = vsub.f32 %v11526_v59, %v13880_v29  ;;  %v3804_v54 = vand.u32 4294901760, %v3803_v34  ;;  %v8875_v2 = vpack.c.bf16 %v11177_v56, %v11175_v60  ;;  %v9454_v34 = vpack.c.bf16 %v11213_v55, %v11211_v7 }
 0x130   :  { %8856 = vmatprep.subr.bf16.mxu1 %v14070_v35  ;;  %v8863_v20 = vpack.c.bf16 %v1013_v8, %v1006_v53  ;;  %v9457_v53 = vpack.c.bf16 %v11311_v3, %v11309_v5  ;;  %v8884_v8 = vpack.c.bf16 %v11338_v17, %v11313_v61  ;;  %v14308_v30 = vand.u32 4294901760, %v11047_v42 }
 0x131   :  { %9431 = vmatpush3.bf16.msra.mxu0 %v9430_v33  ;;  %v9436_v33 = vpack.c.bf16 %v3790_v58, %v3783_v51  ;;  %v3797_v19 = vand.u32 4294901760, %v3796_v57  ;;  %v9442_v58 = vpack.c.bf16 %v11049_v47, %v11047_v42  ;;  %v8869_v51 = vpack.c.bf16 %v11054_v62, %v11052_v46 }
 0x132   :  { %9432 = vmatprep.subr.bf16.mxu0 %v14070_v35  ;;  %v8878_v57 = vpack.c.bf16 %v11209_v52, %v11202_v32  ;;  %v14309_v29 = vand.u32 4294901760, %v11049_v47  ;;  %v14310_v37 = vand.u32 4294901760, %v11268_v44  ;;  %v14314_v42 = vand.u32 4294901760, %v11069_v0 }
 0x133   :  { %8858 = vmatpush3.bf16.msra.mxu1 %v8857_v15  ;;  %v9439_v16 = vpack.c.bf16 %v3804_v54, %v3797_v19  ;;  %v8866_v15 = vpack.c.bf16 %v11032_v38, %v11030_v31  ;;  %v8887_v19 = vpack.c.bf16 %v11480_v27, %v11467_v36  ;;  %v9463_v54 = vpack.c.bf16 %v11537_v26, %v11526_v59 }
 0x134   :  { %8859 = vmatprep.subr.bf16.mxu1 %v14070_v35  ;;  %v9490_v4 = vpack.c.bf16 %v14309_v29, %v14308_v30  ;;  %v14315_v47 = vand.u32 4294901760, %v11071_v1  ;;  %v14319_v0 = vand.u32 4294901760, %v11090_v50  ;;  %v14321_v29 = vand.u32 4294901760, %v11177_v56 }
 0x135   :  { %9434 = vmatpush3.bf16.msra.mxu0 %v9433_v49  ;;  %v9451_v49 = vpack.c.bf16 %v11200_v63, %v11198_v10  ;;  %v14325_v50 = vand.u32 4294901760, %v11209_v52  ;;  %v14327_v56 = vand.u32 4294901760, %v11213_v55  ;;  %v14331_v52 = vand.u32 4294901760, %v11311_v3 }
 0x136   :  { %9435 = vmatprep.subr.bf16.mxu0 %v14070_v35  ;;  %v14335_v3 = vand.u32 4294901760, %v11467_v36  ;;  %v14337_v61 = vand.u32 4294901760, %v11526_v59  ;;  %v6047_v59 = vadd.s32 4294966528, %v14340_v40 }
 0x137   :  { %8861 = vmatpush3.bf16.msra.mxu1 %v8860_v6  ;;  %v8881_v6 = vpack.c.bf16 %v11230_v41, %v11228_v39 }
 0x138   :  { %8862 = vmatprep.subr.bf16.mxu1 %v14070_v35 }
 0x139   :  { %9437 = vmatpush3.bf16.msra.mxu0 %v9436_v33  ;;  %v9460_v33 = vpack.c.bf16 %v11342_v48, %v11340_v18 }
 0x13a   :  { %9438 = vmatprep.subr.bf16.mxu0 %v14070_v35 }
 0x13b   :  { %8864 = vmatpush3.bf16.msra.mxu1 %v8863_v20  ;;  %v14343_v20 = vld [vmem:[#allocation17_spill] sm:$0xff] }
 0x13c   :  { %8865 = vmatprep.subr.bf16.mxu1 %v14070_v35 }
 0x13d   :  { %9440 = vmatpush3.bf16.msra.mxu0 %v9439_v16 }
 0x13e   :  { %9441 = vmatprep.subr.bf16.mxu0 %v14070_v35  ;;  %7271 = vmatmul.mubr.f32.vlgmr.msra.gmra.mrb[0].mxu1 %v11204_v43 }
 0x13f   :  { %8867 = vmatpush3.bf16.msra.mxu1 %v8866_v15  ;;  %7305 = vmatprep.mubr.msk.f32.mxu1 %vm14105_vm0, %v14074_v45 }
 0x140   :  { %8111 = vmatmul.mubr.f32.vlgmr.msra.gmra.mrb[0].mxu0 %v11215_v23  ;;  %8868 = vmatprep.subr.bf16.mxu1 %v14070_v35 }
 0x141   :  { %9443 = vmatpush3.bf16.msra.mxu0 %v9442_v58  ;;  %8145 = vmatprep.mubr.msk.f32.mxu0 %vm14105_vm0, %v14074_v45 }
 0x142   :  { %9444 = vmatprep.subr.bf16.mxu0 %v14070_v35 }
 0x143   :  { %8870 = vmatpush3.bf16.msra.mxu1 %v8869_v51 }
 0x144   :  { %8871 = vmatprep.subr.bf16.mxu1 %v14070_v35 }
 0x145   :  { %9446 = vmatpush3.bf16.msra.mxu0 %v9445_v25 }
 0x146   :  { %9447 = vmatprep.subr.bf16.mxu0 %v14070_v35 }
 0x147   :  { %8873 = vmatpush3.bf16.msra.mxu1 %v8872_v11  ;;  %v14346_v11 = vld [vmem:[#allocation18_spill] sm:$0xff] }
 0x148   :  { %8874 = vmatprep.subr.bf16.mxu1 %v14070_v35 }
 0x149   :  { %9449 = vmatpush3.bf16.msra.mxu0 %v9448_v24  ;;  %v14294_v24 = vld [vmem:[#allocation36_spill] sm:$0xff] }
 0x14a   :  { %9450 = vmatprep.subr.bf16.mxu0 %v14070_v35  ;;  %vm14295_vm2 = vnez %v14294_v24  ;;  %v14347_v24 = vld [vmem:[#allocation19_spill] sm:$0xff] }
 0x14b   :  { %8876 = vmatpush3.bf16.msra.mxu1 %v8875_v2  ;;  %v14296_v2 = vld [vmem:[#allocation37_spill] sm:$0xff] }
 0x14c   :  { %8877 = vmatprep.subr.bf16.mxu1 %v14070_v35  ;;  %vm14297_vm10 = vnez %v14296_v2 }
 0x14d   :  { %9452 = vmatpush3.bf16.msra.mxu0 %v9451_v49  ;;  %v14298_v49 = vld [vmem:[#allocation38_spill] sm:$0xff] }
 0x14e   :  { %9453 = vmatprep.subr.bf16.mxu0 %v14070_v35  ;;  %vm14299_vm11 = vnez %v14298_v49 }
 0x14f   :  { %8879 = vmatpush3.bf16.msra.mxu1 %v8878_v57 }
 0x150   :  { %8880 = vmatprep.subr.bf16.mxu1 %v14070_v35 }
 0x151   :  { %9455 = vmatpush3.bf16.msra.mxu0 %v9454_v34 }
 0x152   :  { %9456 = vmatprep.subr.bf16.mxu0 %v14070_v35 }
 0x153   :  { %8882 = vmatpush3.bf16.msra.mxu1 %v8881_v6  ;;  %v14302_v6 = vld [vmem:[#allocation41_spill] sm:$0xff] }
 0x154   :  { %8883 = vmatprep.subr.bf16.mxu1 %v14070_v35 }
 0x155   :  { %9458 = vmatpush3.bf16.msra.mxu0 %v9457_v53  ;;  %v14352_v53 = vld [vmem:[#allocation21_spill] sm:$0xff] }
 0x156   :  { %9459 = vmatprep.subr.bf16.mxu0 %v14070_v35 }
 0x157   :  { %8885 = vmatpush3.bf16.msra.mxu1 %v8884_v8  ;;  %v14305_v8 = vand.u32 4294901760, %v11030_v31  ;;  %v14311_v31 = vand.u32 4294901760, %v11052_v46  ;;  %v14316_v46 = vand.u32 4294901760, %v11073_v21  ;;  %v14322_v21 = vand.u32 4294901760, %v11198_v10 }
 0x158   :  { %8886 = vmatprep.subr.bf16.mxu1 %v14070_v35  ;;  %v14328_v10 = vand.u32 4294901760, %v11228_v39  ;;  %v14333_v39 = vand.u32 4294901760, %v11340_v18  ;;  %v14341_v18 = vld [vmem:[#allocation14_spill] sm:$0xff] }
 0x159   :  { %9461 = vmatpush3.bf16.msra.mxu0 %v9460_v33  ;;  %v14306_v33 = vand.u32 4294901760, %v11032_v38  ;;  %v14312_v38 = vand.u32 4294901760, %v11054_v62  ;;  %v14317_v62 = vand.u32 4294901760, %v11075_v28  ;;  %v14323_v28 = vand.u32 4294901760, %v11200_v63 }
 0x15a   :  { %9462 = vmatprep.subr.bf16.mxu0 %v14070_v35  ;;  %v14329_v63 = vand.u32 4294901760, %v11230_v41  ;;  %v14334_v41 = vand.u32 4294901760, %v11342_v48  ;;  %v5787_v48 = vadd.s32 4294967040, %v14340_v40 }
 0x15b   :  { %8888 = vmatpush3.bf16.msra.mxu1 %v8887_v19  ;;  %v8914_v19 = vpack.c.bf16 %v14306_v33, %v14305_v8  ;;  %v8917_v8 = vpack.c.bf16 %v14312_v38, %v14311_v31  ;;  %v14313_v33 = vand.u32 4294901760, %v11283_v12 }
 0x15c   :  { %8889 = vmatprep.subr.bf16.mxu1 %v14070_v35  ;;  %v11848_v36 = vrot.slane %v5787_v48, %v14341_v18 }
 0x15d   :  { %9464 = vmatpush3.bf16.msra.mxu0 %v9463_v54  ;;  %v14353_v54 = vmov 0 }
 0x15e   :  { %9465 = vmatprep.subr.bf16.mxu0 %v14070_v35  ;;  %7306 = vmatmul.mubr.f32.vlgmr.msra.gmra.mrb[0].mxu1 %v11268_v44  ;;  %v9493_v44 = vpack.c.bf16 %v14315_v47, %v14314_v42  ;;  %v9508_v42 = vpack.c.bf16 %v14334_v41, %v14333_v39  ;;  %v1454_v41 = vld [vmem:[#allocation5 + $0x2] sm:$0x1] }
 0x15f   :  { %8891 = vmatpush3.bf16.msk.msra.mxu1 %vm10958_vm5, %v14160_v13  ;;  %7340 = vmatprep.mubr.msk.f32.mxu1 %vm14105_vm0, %v14074_v45 }
 0x160   :  { %8146 = vmatmul.mubr.f32.vlgmr.msra.gmra.mrb[0].mxu0 %v11283_v12  ;;  %8892 = vmatprep.subr.bf16.mxu1 %v14070_v35  ;;  %v8920_v12 = vpack.c.bf16 %v14317_v62, %v14316_v46 }
 0x161   :  { %9467 = vmatpush3.bf16.msk.msra.mxu0 %vm10973_vm3, %v14160_v13  ;;  %8180 = vmatprep.mubr.msk.f32.mxu0 %vm14105_vm0, %v14074_v45 }
 0x162   :  { %9468 = vmatprep.subr.bf16.mxu0 %v14070_v35 }
 0x163   :  { %8894 = vmatpush3.bf16.msk.msra.mxu1 %vm11014_vm15, %v14160_v13 }
 0x164   :  { %8895 = vmatprep.subr.bf16.mxu1 %v14070_v35 }
 0x165   :  { %9470 = vmatpush3.bf16.msk.msra.mxu0 %vm11062_vm8, %v14160_v13 }
 0x166   :  { %9471 = vmatprep.subr.bf16.mxu0 %v14070_v35 }
 0x167   :  { %8897 = vmatpush3.bf16.msk.msra.mxu1 %vm11084_vm12, %v14160_v13 }
 0x168   :  { %8898 = vmatprep.subr.bf16.mxu1 %v14070_v35 }
 0x169   :  { %9473 = vmatpush3.bf16.msk.msra.mxu0 %vm11118_vm13, %v14160_v13 }
 0x16a   :  { %9474 = vmatprep.subr.bf16.mxu0 %v14070_v35 }
 0x16b   :  { %8900 = vmatpush3.bf16.msk.msra.mxu1 %vm11156_vm7, %v14160_v13 }
 0x16c   :  { %8901 = vmatprep.subr.bf16.mxu1 %v14070_v35 }
 0x16d   :  { %9476 = vmatpush3.bf16.msk.msra.mxu0 %vm11194_vm14, %v14160_v13 }
 0x16e   :  { %9477 = vmatprep.subr.bf16.mxu0 %v14070_v35 }
 0x16f   :  { %8903 = vmatpush3.bf16.msk.msra.mxu1 %vm14295_vm2, %v14160_v13 }
 0x170   :  { %8904 = vmatprep.subr.bf16.mxu1 %v14070_v35 }
 0x171   :  { %9479 = vmatpush3.bf16.msk.msra.mxu0 %vm14297_vm10, %v14160_v13  ;;  %vm14303_vm10 = vnez %v14302_v6  ;;  %v14351_v6 = vld [vmem:[#allocation20_spill] sm:$0xff] }
 0x172   :  { %9480 = vmatprep.subr.bf16.mxu0 %v14070_v35 }
 0x173   :  { %8906 = vmatpush3.bf16.msk.msra.mxu1 %vm14299_vm11, %v14160_v13 }
 0x174   :  { %8907 = vmatprep.subr.bf16.mxu1 %v14070_v35 }
 0x175   :  { %9482 = vmatpush3.bf16.msk.msra.mxu0 %vm11325_vm6, %v14160_v13 }
 0x176   :  { %9483 = vmatprep.subr.bf16.mxu0 %v14070_v35 }
 0x177   :  { %8909 = vmatpush3.bf16.msk.msra.mxu1 %vm11352_vm4, %v14160_v13 }
 0x178   :  { %8910 = vmatprep.subr.bf16.mxu1 %v14070_v35 }
 0x179   :  { %9485 = vmatpush3.bf16.msk.msra.mxu0 %vm14303_vm10, %v14160_v13 }
 0x17a   :  { %9486 = vmatprep.subr.bf16.mxu0 %v14070_v35 }
 0x17b   :  { %8912 = vmatpush3.bf16.msk.msra.mxu1 %vm11410_vm9, %v14160_v13 }
 0x17c   :  { %8913 = vmatprep.subr.bf16.mxu1 %v14070_v35 }
 0x17d   :  { %9488 = vmatpush3.bf16.msk.msra.mxu0 %vm11440_vm1, %v14160_v13 }
 0x17e   :  { %9489 = vmatprep.subr.bf16.mxu0 %v14070_v35  ;;  %7341 = vmatmul.mubr.f32.vlgmr.msra.gmra.mrb[0].mxu1 %v14310_v37  ;;  %v14318_v37 = vand.u32 4294901760, %v11088_v9  ;;  %v14324_v9 = vand.u32 4294901760, %v11202_v32  ;;  %v14330_v32 = vand.u32 4294901760, %v11309_v5  ;;  %v14336_v5 = vand.u32 4294901760, %v11480_v27 }
 0x17f   :  { %8915 = vmatpush3.bf16.msra.mxu1 %v8914_v19  ;;  %7375 = vmatprep.mubr.msk.f32.mxu1 %vm14105_vm0, %v14074_v45  ;;  %v9499_v19 = vpack.c.bf16 %v14323_v28, %v14322_v21  ;;  %v11855_v27 = vrot.slane %v6047_v59, %v14341_v18 }
 0x180   :  { %8181 = vmatmul.mubr.f32.vlgmr.msra.gmra.mrb[0].mxu0 %v14313_v33  ;;  %8916 = vmatprep.subr.bf16.mxu1 %v14070_v35  ;;  %v9496_v1 = vpack.c.bf16 %v14319_v0, %v14318_v37  ;;  %v8926_v31 = vpack.c.bf16 %v14325_v50, %v14324_v9  ;;  %v9505_v33 = vpack.c.bf16 %v14331_v52, %v14330_v32  ;;  %v14359_v50 = vmov 0 }
 0x181   :  { %9491 = vmatpush3.bf16.msra.mxu0 %v9490_v4  ;;  %8215 = vmatprep.mubr.msk.f32.mxu0 %vm14105_vm0, %v14074_v45  ;;  %v14320_v4 = vand.u32 4294901760, %v11175_v60  ;;  %v14326_v60 = vand.u32 4294901760, %v11211_v7  ;;  %v14332_v7 = vand.u32 4294901760, %v11338_v17  ;;  %v8935_v47 = vpack.c.bf16 %v14336_v5, %v14335_v3 }
 0x182   :  { %9492 = vmatprep.subr.bf16.mxu0 %v14070_v35  ;;  %v14338_v17 = vand.u32 4294901760, %v11537_v26  ;;  %v14342_v26 = vld [vmem:[#allocation11_spill] sm:$0xff] }
 0x183   :  { %8918 = vmatpush3.bf16.msra.mxu1 %v8917_v8  ;;  %v8923_v30 = vpack.c.bf16 %v14321_v29, %v14320_v4  ;;  %v9502_v38 = vpack.c.bf16 %v14327_v56, %v14326_v60  ;;  %v8929_v8 = vpack.c.bf16 %v14329_v63, %v14328_v10  ;;  %v8932_v55 = vpack.c.bf16 %v14332_v7, %v990_v22  ;;  %v14362_v56 = vld [vmem:[#allocation22_spill] sm:$0xff]  ;;  %v14368_v7 = vld [vmem:[#allocation25_spill] sm:$0xff] }
 0x184   :  { %8919 = vmatprep.subr.bf16.mxu1 %v14070_v35  ;;  %v9511_v22 = vpack.c.bf16 %v14338_v17, %v14337_v61  ;;  %v14373_v61 = vld [vmem:[#allocation30_spill] sm:$0xff] }
 0x185   :  { %9494 = vmatpush3.bf16.msra.mxu0 %v9493_v44  ;;  %v4246_v17 = vld [vmem:[#allocation5 + $0x6] sm:$0x1] }
 0x186   :  { %9495 = vmatprep.subr.bf16.mxu0 %v14070_v35 }
 0x187   :  { %8921 = vmatpush3.bf16.msra.mxu1 %v8920_v12 }
 0x188   :  { %8922 = vmatprep.subr.bf16.mxu1 %v14070_v35 }
 0x189   :  { %9497 = vmatpush3.bf16.msra.mxu0 %v9496_v1 }
 0x18a   :  { %9498 = vmatprep.subr.bf16.mxu0 %v14070_v35 }
 0x18b   :  { %8924 = vmatpush3.bf16.msra.mxu1 %v8923_v30  ;;  %v14356_v30 = vmov 0 }
 0x18c   :  { %8925 = vmatprep.subr.bf16.mxu1 %v14070_v35 }
 0x18d   :  { %9500 = vmatpush3.bf16.msra.mxu0 %v9499_v19 }
 0x18e   :  { %9501 = vmatprep.subr.bf16.mxu0 %v14070_v35 }
 0x18f   :  { %8927 = vmatpush3.bf16.msra.mxu1 %v8926_v31 }
 0x190   :  { %8928 = vmatprep.subr.bf16.mxu1 %v14070_v35 }
 0x191   :  { %9503 = vmatpush3.bf16.msra.mxu0 %v9502_v38  ;;  %v14363_v38 = vld [vmem:[#allocation23_spill] sm:$0xff] }
 0x192   :  { %9504 = vmatprep.subr.bf16.mxu0 %v14070_v35 }
 0x193   :  { %8930 = vmatpush3.bf16.msra.mxu1 %v8929_v8  ;;  %v14364_v8 = vmov 0 }
 0x194   :  { %8931 = vmatprep.subr.bf16.mxu1 %v14070_v35 }
 0x195   :  { %9506 = vmatpush3.bf16.msra.mxu0 %v9505_v33  ;;  %v14367_v33 = vld [vmem:[#allocation24_spill] sm:$0xff] }
 0x196   :  { %9507 = vmatprep.subr.bf16.mxu0 %v14070_v35 }
 0x197   :  { %8933 = vmatpush3.bf16.msra.mxu1 %v8932_v55 }
 0x198   :  { %8934 = vmatprep.subr.bf16.mxu1 %v14070_v35 }
 0x199   :  { %9509 = vmatpush3.bf16.msra.mxu0 %v9508_v42  ;;  %v14369_v42 = vmov 0 }
 0x19a   :  { %9510 = vmatprep.subr.bf16.mxu0 %v14070_v35 }
 0x19b   :  { %8936 = vmatpush3.bf16.msra.mxu1 %v8935_v47  ;;  %v14372_v47 = vld [vmem:[#allocation28_spill] sm:$0xff] }
 0x19c   :  { %8937 = vmatprep.subr.bf16.mxu1 %v14070_v35 }
 0x19d   :  { %9512 = vmatpush3.bf16.msra.mxu0 %v9511_v22 }
 0x19e   :  { %9513 = vmatprep.subr.bf16.mxu0 %v14070_v35  ;;  %7376 = vmatmul.mubr.f32.vlgmr.msra.gmra.mrb[0].mxu1 %v11204_v43 }
 0x19f   :  { %8939 = vmatpush3.bf16.msk.msra.mxu1 %vm10958_vm5, %v14160_v13  ;;  %7410 = vmatprep.mubr.msk.f32.mxu1 %vm14105_vm0, %v14074_v45  ;;  %vm14339_vm5 = vnez %v14296_v2  ;;  %v14348_v2 = vmov 0 }
 0x1a0   :  { %8216 = vmatmul.mubr.f32.vlgmr.msra.gmra.mrb[0].mxu0 %v11215_v23  ;;  %8940 = vmatprep.subr.bf16.mxu1 %v14070_v35 }
 0x1a1   :  { %9515 = vmatpush3.bf16.msk.msra.mxu0 %vm10973_vm3, %v14160_v13  ;;  %8250 = vmatprep.mubr.msk.f32.mxu0 %vm14105_vm0, %v14074_v45  ;;  %vm1461_vm3 = vcmp.eq.s32.totalorder %v14342_v26, %v11848_v36 }
 0x1a2   :  { %9516 = vmatprep.subr.bf16.mxu0 %v14070_v35  ;;  %v5788_v16 = vsel %vm1461_vm3, 1.0, %v14074_v45 }
 0x1a3   :  { %8942 = vmatpush3.bf16.msk.msra.mxu1 %vm11014_vm15, %v14160_v13  ;;  %vm1462_vm15 = vcmp.eq.s32.totalorder %v14343_v20, %v11848_v36  ;;  %v11948_v46 = vsub.f32 %v5788_v16, %v5788_v16 }
 0x1a4   :  { %8943 = vmatprep.subr.bf16.mxu1 %v14070_v35  ;;  %v5789_v15 = vsel %vm1462_vm15, 1.0, %v14074_v45 }
 0x1a5   :  { %9518 = vmatpush3.bf16.msk.msra.mxu0 %vm11062_vm8, %v14160_v13  ;;  %vm4253_vm8 = vcmp.eq.s32.totalorder %v14342_v26, %v11855_v27  ;;  %v11950_v62 = vsub.f32 %v5789_v15, %v5789_v15  ;;  %v14374_v15 = vmov 0 }
 0x1a6   :  { %9519 = vmatprep.subr.bf16.mxu0 %v14070_v35  ;;  %v6048_v51 = vsel %vm4253_vm8, 1.0, %v14074_v45 }
 0x1a7   :  { %8945 = vmatpush3.bf16.msk.msra.mxu1 %vm11084_vm12, %v14160_v13  ;;  %vm4254_vm12 = vcmp.eq.s32.totalorder %v14343_v20, %v11855_v27  ;;  %v11965_v0 = vsub.f32 %v6048_v51, %v6048_v51 }
 0x1a8   :  { %8946 = vmatprep.subr.bf16.mxu1 %v14070_v35  ;;  %v6049_v25 = vsel %vm4254_vm12, 1.0, %v14074_v45 }
 0x1a9   :  { %9521 = vmatpush3.bf16.msk.msra.mxu0 %vm11118_vm13, %v14160_v13  ;;  %vm11876_vm13 = vmpackc.low %vm1462_vm15, %vm1461_vm3  ;;  %v11967_v1 = vsub.f32 %v6049_v25, %v6049_v25 }
 0x1aa   :  { %9522 = vmatprep.subr.bf16.mxu0 %v14070_v35 }
 0x1ab   :  { %8948 = vmatpush3.bf16.msk.msra.mxu1 %vm11156_vm7, %v14160_v13  ;;  %vm1463_vm7 = vcmp.eq.s32.totalorder %v14346_v11, %v11848_v36 }
 0x1ac   :  { %8949 = vmatprep.subr.bf16.mxu1 %v14070_v35  ;;  %v5790_v49 = vsel %vm1463_vm7, 1.0, %v14074_v45 }
 0x1ad   :  { %9524 = vmatpush3.bf16.msk.msra.mxu0 %vm11194_vm14, %v14160_v13  ;;  %vm1464_vm14 = vcmp.eq.s32.totalorder %v14347_v24, %v11848_v36  ;;  %v11970_v4 = vsub.f32 %v5790_v49, %v5790_v49 }
 0x1ae   :  { %9525 = vmatprep.subr.bf16.mxu0 %v14070_v35  ;;  %v5791_v57 = vsel %vm1464_vm14, 1.0, %v14074_v45 }
 0x1af   :  { %8951 = vmatpush3.bf16.msk.msra.mxu1 %vm14295_vm2, %v14160_v13  ;;  %vm1466_vm2 = vcmp.eq.s32.totalorder %v14352_v53, %v11848_v36  ;;  %v11972_v29 = vsub.f32 %v5791_v57, %v5791_v57  ;;  %v12122_v57 = vand.u32 4294901760, %v1454_v41 }
 0x1b0   :  { %8952 = vmatprep.subr.bf16.mxu1 %v14070_v35 }
 0x1b1   :  { %9527 = vmatpush3.bf16.msk.msra.mxu0 %vm14339_vm5, %v14160_v13  ;;  %vm4258_vm5 = vcmp.eq.s32.totalorder %v14352_v53, %v11855_v27 }
 0x1b2   :  { %9528 = vmatprep.subr.bf16.mxu0 %v14070_v35  ;;  %v6053_v37 = vsel %vm4258_vm5, 1.0, %v14074_v45 }
 0x1b3   :  { %8954 = vmatpush3.bf16.msk.msra.mxu1 %vm14299_vm11, %v14160_v13  ;;  %vm4257_vm11 = vcmp.eq.s32.totalorder %v14351_v6, %v11855_v27  ;;  %v12008_v60 = vsub.f32 %v6053_v37, %v6053_v37 }
 0x1b4   :  { %8955 = vmatprep.subr.bf16.mxu1 %v14070_v35  ;;  %v6052_v12 = vsel %vm4257_vm11, 1.0, %v14074_v45 }
 0x1b5   :  { %9530 = vmatpush3.bf16.msk.msra.mxu0 %vm11325_vm6, %v14160_v13  ;;  %vm11891_vm6 = vmpackc.low %vm4254_vm12, %vm4253_vm8  ;;  %v12006_v31 = vsub.f32 %v6052_v12, %v6052_v12  ;;  %vm1467_vm8 = vcmp.eq.s32.totalorder %v14362_v56, %v11848_v36  ;;  %vm1468_vm12 = vcmp.eq.s32.totalorder %v14363_v38, %v11848_v36  ;;  %v14379_v12 = vmov 0 }
 0x1b6   :  { %9531 = vmatprep.subr.bf16.mxu0 %v14070_v35  ;;  %v14349_v2 = vsel %vm11891_vm6, 4294967295, %v14348_v2  ;;  %v5794_v10 = vsel %vm1467_vm8, 1.0, %v14074_v45  ;;  %v5795_v63 = vsel %vm1468_vm12, 1.0, %v14074_v45 }
 0x1b7   :  { %8957 = vmatpush3.bf16.msk.msra.mxu1 %vm11352_vm4, %v14160_v13  ;;  %14350 = vst [vmem:[#allocation44_spill] sm:$0xff] %v14349_v2  ;;  %vm4255_vm4 = vcmp.eq.s32.totalorder %v14346_v11, %v11855_v27  ;;  %v12093_v22 = vsub.f32 %v5794_v10, %v5794_v10  ;;  %v12095_v48 = vsub.f32 %v5795_v63, %v5795_v63 }
 0x1b8   :  { %8958 = vmatprep.subr.bf16.mxu1 %v14070_v35 }
 0x1b9   :  { %9533 = vmatpush3.bf16.msk.msra.mxu0 %vm14303_vm10, %v14160_v13  ;;  %vm11932_vm10 = vmpackc.low %vm1464_vm14, %vm1463_vm7  ;;  %vm4259_vm7 = vcmp.eq.s32.totalorder %v14362_v56, %v11855_v27  ;;  %vm4260_vm14 = vcmp.eq.s32.totalorder %v14363_v38, %v11855_v27  ;;  %v14395_v38 = vmov 0 }
 0x1ba   :  { %9534 = vmatprep.subr.bf16.mxu0 %v14070_v35  ;;  %v14354_v54 = vsel %vm11932_vm10, 4294967295, %v14353_v54  ;;  %v6054_v32 = vsel %vm4259_vm7, 1.0, %v14074_v45  ;;  %v6055_v52 = vsel %vm4260_vm14, 1.0, %v14074_v45 }
 0x1bb   :  { %8960 = vmatpush3.bf16.msk.msra.mxu1 %vm11410_vm9, %v14160_v13  ;;  %vm4256_vm9 = vcmp.eq.s32.totalorder %v14347_v24, %v11855_v27  ;;  %14355 = vst [vmem:[#allocation45_spill] sm:$0xff] %v14354_v54  ;;  %v12116_v51 = vsub.f32 %v6054_v32, %v6054_v32  ;;  %v12118_v25 = vsub.f32 %v6055_v52, %v6055_v52  ;;  %v14382_v52 = vld [vmem:[#allocation32_spill] sm:$0xff]  ;;  %v14392_v24 = vand.u32 4294901760, %v11948_v46 }
 0x1bc   :  { %8961 = vmatprep.subr.bf16.mxu1 %v14070_v35  ;;  %v6051_v34 = vsel %vm4256_vm9, 1.0, %v14074_v45  ;;  %vm11980_vm3 = vmpackc.low %vm4256_vm9, %vm4255_vm4  ;;  %vm13884_vm9 = vcmp.eq.s32.totalorder %v14367_v33, %v11848_v36  ;;  %v14432_v54 = vand.u32 4294901760, %v12095_v48 }
 0x1bd   :  { %9536 = vmatpush3.bf16.msk.msra.mxu0 %vm11440_vm1, %v14160_v13  ;;  %vm1465_vm1 = vcmp.eq.s32.totalorder %v14351_v6, %v11848_v36  ;;  %v14357_v30 = vsel %vm11980_vm3, 4294967295, %v14356_v30  ;;  %v11989_v28 = vsub.f32 %v6051_v34, %v6051_v34  ;;  %v5796_v55 = vsel %vm13884_vm9, 1.0, %v14074_v45 }
 0x1be   :  { %9537 = vmatprep.subr.bf16.mxu0 %v14070_v35  ;;  %7411 = vmatmul.mubr.f32.vlgmr.msra.gmra.mrb[0].mxu1 %v11204_v43  ;;  %v6050_v43 = vsel %vm4255_vm4, 1.0, %v14074_v45  ;;  %v5792_v44 = vsel %vm1465_vm1, 1.0, %v14074_v45  ;;  %14358 = vst [vmem:[#allocation46_spill] sm:$0xff] %v14357_v30  ;;  %vm12002_vm15 = vmpackc.low %vm1466_vm2, %vm1465_vm1  ;;  %vm13883_vm1 = vcmp.eq.s32.totalorder %v14368_v7, %v11848_v36  ;;  %vm13885_vm9 = vcmp.eq.s32.totalorder %v14373_v61, %v11848_v36 }
 0x1bf   :  { %8963 = vmatpush3.bf16.msk.msra.mxu1 %vm11876_vm13, %v14160_v13  ;;  %7445 = vmatprep.mubr.msk.f32.mxu1 %vm14105_vm0, %v14074_v45  ;;  %v11987_v21 = vsub.f32 %v6050_v43, %v6050_v43  ;;  %v11991_v19 = vsub.f32 %v5792_v44, %v5792_v44  ;;  %v14360_v50 = vsel %vm12002_vm15, 4294967295, %v14359_v50  ;;  %vm12036_vm4 = vmpackc.low %vm4258_vm5, %vm4257_vm11  ;;  %v5797_v39 = vsel %vm13883_vm1, 1.0, %v14074_v45 }
 0x1c0   :  { %8251 = vmatmul.mubr.f32.vlgmr.msra.gmra.mrb[0].mxu0 %v11215_v23  ;;  %8964 = vmatprep.subr.bf16.mxu1 %v14070_v35  ;;  %v5793_v23 = vsel %vm1466_vm2, 1.0, %v14074_v45  ;;  %14361 = vst [vmem:[#allocation47_spill] sm:$0xff] %v14360_v50  ;;  %v14365_v8 = vsel %vm12036_vm4, 4294967295, %v14364_v8  ;;  %vm4261_vm2 = vcmp.eq.s32.totalorder %v14367_v33, %v11855_v27  ;;  %vm4262_vm11 = vcmp.eq.s32.totalorder %v14368_v7, %v11855_v27  ;;  %vm12074_vm5 = vmpackc.low %vm1468_vm12, %vm1467_vm8 }
 0x1c1   :  { %9539 = vmatpush3.bf16.msk.msra.mxu0 %vm11891_vm6, %v14160_v13  ;;  %8285 = vmatprep.mubr.msk.f32.mxu0 %vm14105_vm0, %v14074_v45  ;;  %v11993_v9 = vsub.f32 %v5793_v23, %v5793_v23  ;;  %14366 = vst [vmem:[#allocation48_spill] sm:$0xff] %v14365_v8  ;;  %v14370_v42 = vsel %vm12074_vm5, 4294967295, %v14369_v42  ;;  %v6056_v3 = vsel %vm4261_vm2, 1.0, %v14074_v45  ;;  %v6057_v5 = vsel %vm4262_vm11, 1.0, %v14074_v45  ;;  %vm12112_vm8 = vmpackc.low %vm4260_vm14, %vm4259_vm7 }
 0x1c2   :  { %9540 = vmatprep.subr.bf16.mxu0 %v14070_v35  ;;  %14371 = vst [vmem:[#allocation49_spill] sm:$0xff] %v14370_v42  ;;  %vm13886_vm1 = vcmp.eq.s32.totalorder %v14372_v47, %v11848_v36  ;;  %v5799_v16 = vsel %vm13885_vm9, 1.0, %v14074_v45  ;;  %v14375_v15 = vsel %vm12112_vm8, 4294967295, %v14374_v15  ;;  %v12120_v49 = vsub.f32 %v5796_v55, %v5796_v55 }
 0x1c3   :  { %8966 = vmatpush3.bf16.msk.msra.mxu1 %vm11932_vm10, %v14160_v13  ;;  %v5798_v59 = vsel %vm13886_vm1, 1.0, %v14074_v45  ;;  %14376 = vst [vmem:[#allocation50_spill] sm:$0xff] %v14375_v15  ;;  %v12127_v43 = vsub.f32 %v5797_v39, %v5797_v39  ;;  %v12129_v34 = vsub.f32 %v6056_v3, %v6056_v3  ;;  %v12131_v44 = vsub.f32 %v6057_v5, %v6057_v5  ;;  %v14386_v3 = vld [vmem:[#allocation33_spill] sm:$0xff] }
 0x1c4   :  { %8967 = vmatprep.subr.bf16.mxu1 %v14070_v35  ;;  %v12133_v23 = vand.u32 4294901760, %v4246_v17  ;;  %vm14377_vm12 = vcmp.eq.s32.totalorder %v14367_v33, %v11848_v36  ;;  %vm14378_vm7 = vcmp.eq.s32.totalorder %v14368_v7, %v11848_v36  ;;  %v12146_v37 = vsub.f32 %v5798_v59, %v5798_v59 }
 0x1c5   :  { %9542 = vmatpush3.bf16.msk.msra.mxu0 %vm11980_vm3, %v14160_v13  ;;  %vm12142_vm14 = vmpackc.low %vm14378_vm7, %vm14377_vm12  ;;  %v12148_v10 = vsub.f32 %v5799_v16, %v5799_v16  ;;  %vm13889_vm9 = vcmp.eq.s32.totalorder %v14372_v47, %v11855_v27  ;;  %vm13887_vm1 = vcmp.eq.s32.totalorder %v14373_v61, %v11855_v27  ;;  %vm13888_vm12 = vcmp.eq.s32.totalorder %v14382_v52, %v11848_v36 }
 0x1c6   :  { %9543 = vmatprep.subr.bf16.mxu0 %v14070_v35  ;;  %v14380_v12 = vsel %vm12142_vm14, 4294967295, %v14379_v12  ;;  %v6058_v63 = vsel %vm13889_vm9, 1.0, %v14074_v45  ;;  %v6059_v32 = vsel %vm13887_vm1, 1.0, %v14074_v45  ;;  %vm12175_vm7 = vmpackc.low %vm4262_vm11, %vm4261_vm2  ;;  %v14383_v39 = vmov 0 }
 0x1c7   :  { %8969 = vmatpush3.bf16.msk.msra.mxu1 %vm12002_vm15, %v14160_v13  ;;  %14381 = vst [vmem:[#allocation35_spill] sm:$0xff] %v14380_v12  ;;  %v14384_v39 = vsel %vm12175_vm7, 4294967295, %v14383_v39  ;;  %vm1474_vm1 = vcmp.eq.s32.totalorder %v14386_v3, %v11848_v36  ;;  %v5800_v5 = vsel %vm13888_vm12, 1.0, %v14074_v45  ;;  %v12186_v59 = vsub.f32 %v1454_v41, %v12122_v57 }
 0x1c8   :  { %8970 = vmatprep.subr.bf16.mxu1 %v14070_v35  ;;  %14385 = vst [vmem:[#allocation13_spill] sm:$0xff] %v14384_v39  ;;  %v5801_v55 = vsel %vm1474_vm1, 1.0, %v14074_v45  ;;  %vm13904_vm2 = vcmp.eq.s32.totalorder %v14382_v52, %v11855_v27  ;;  %vm13900_vm11 = vcmp.eq.s32.totalorder %v14386_v3, %v11855_v27  ;;  %v12201_v41 = vsub.f32 %v4246_v17, %v12133_v23 }
 0x1c9   :  { %9545 = vmatpush3.bf16.msk.msra.mxu0 %vm12036_vm4, %v14160_v13  ;;  %vm14387_vm12 = vcmp.eq.s32.totalorder %v14372_v47, %v11848_v36  ;;  %vm14388_vm9 = vcmp.eq.s32.totalorder %v14373_v61, %v11848_v36  ;;  %v14389_v16 = vmov 0  ;;  %v6060_v7 = vsel %vm13904_vm2, 1.0, %v14074_v45 }
 0x1ca   :  { %9546 = vmatprep.subr.bf16.mxu0 %v14070_v35  ;;  %v6061_v17 = vsel %vm13900_vm11, 1.0, %v14074_v45  ;;  %v12227_v56 = vsub.f32 %v6058_v63, %v6058_v63  ;;  %v12229_v53 = vsub.f32 %v6059_v32, %v6059_v32  ;;  %v12231_v6 = vsub.f32 %v5800_v5, %v5800_v5 }
 0x1cb   :  { %8972 = vmatpush3.bf16.msk.msra.mxu1 %vm12074_vm5, %v14160_v13  ;;  %v1604_v11 = vsub.f32 %v11948_v46, %v14392_v24  ;;  %v14398_v32 = vand.u32 4294901760, %v11950_v62  ;;  %v12260_v20 = vsub.f32 %v6061_v17, %v6061_v17  ;;  %v14405_v63 = vand.u32 4294901760, %v11967_v1 }
 0x1cc   :  { %8973 = vmatprep.subr.bf16.mxu1 %v14070_v35  ;;  %vm14406_vm2 = vcmp.eq.s32.totalorder %v14382_v52, %v11855_v27  ;;  %v14428_v8 = vand.u32 4294901760, %v11993_v9 }
 0x1cd   :  { %9548 = vmatpush3.bf16.msk.msra.mxu0 %vm12112_vm8, %v14160_v13  ;;  %v1611_v5 = vsub.f32 %v11950_v62, %v14398_v32  ;;  %v14400_v32 = vmov 0  ;;  %v4403_v33 = vsub.f32 %v11967_v1, %v14405_v63  ;;  %v1605_v26 = vand.u32 4294901760, %v1604_v11 }
 0x1ce   :  { %9549 = vmatprep.subr.bf16.mxu0 %v14070_v35  ;;  %v14408_v63 = vmov 0  ;;  %v14412_v11 = vand.u32 4294901760, %v11970_v4  ;;  %v1639_v50 = vsub.f32 %v11993_v9, %v14428_v8  ;;  %v14430_v8 = vand.u32 4294901760, %v12008_v60 }
 0x1cf   :  { %8975 = vmatpush3.bf16.msk.msra.mxu1 %vm12142_vm14, %v14160_v13  ;;  %vm12210_vm14 = vmpackc.low %vm14388_vm9, %vm14387_vm12  ;;  %vm14393_vm9 = vcmp.eq.s32.totalorder %v14372_v47, %v11855_v27  ;;  %vm14394_vm12 = vcmp.eq.s32.totalorder %v14373_v61, %v11855_v27  ;;  %v12256_v47 = vsub.f32 %v5801_v55, %v5801_v55  ;;  %v12258_v61 = vsub.f32 %v6060_v7, %v6060_v7  ;;  %v14403_v55 = vld [vmem:[#allocation34_spill] sm:$0xff] }
 0x1d0   :  { %8976 = vmatprep.subr.bf16.mxu1 %v14070_v35  ;;  %v14390_v16 = vsel %vm12210_vm14, 4294967295, %v14389_v16  ;;  %vm12243_vm11 = vmpackc.low %vm14394_vm12, %vm14393_vm9  ;;  %vm14399_vm9 = vcmp.eq.s32.totalorder %v14382_v52, %v11848_v36  ;;  %v14404_v7 = vand.u32 4294901760, %v11965_v0  ;;  %v1612_v40 = vand.u32 4294901760, %v1611_v5 }
 0x1d1   :  { %14391 = vst [vmem:[#allocation12_spill] sm:$0xff] %v14390_v16  ;;  %9551 = vmatpush3.bf16.msk.msra.mxu0 %vm12175_vm7, %v14160_v13  ;;  %v14396_v38 = vsel %vm12243_vm11, 4294967295, %v14395_v38  ;;  %vm12270_vm12 = vmpackc.low %vm1474_vm1, %vm14399_vm9  ;;  %vm1476_vm1 = vcmp.eq.s32.totalorder %v14252_v14, %v11848_v36  ;;  %v1618_v18 = vsub.f32 %v11970_v4, %v14412_v11  ;;  %v4431_v30 = vsub.f32 %v12008_v60, %v14430_v8 }
 0x1d2   :  { %9552 = vmatprep.subr.bf16.mxu0 %v14070_v35  ;;  %14397 = vst [vmem:[#allocation26_spill] sm:$0xff] %v14396_v38  ;;  %v14401_v32 = vsel %vm12270_vm12, 4294967295, %v14400_v32  ;;  %v4396_v17 = vsub.f32 %v11965_v0, %v14404_v7  ;;  %v14411_v7 = vand.u32 4294901760, %v12186_v59  ;;  %v14413_v38 = vand.u32 4294901760, %v11972_v29 }
 0x1d3   :  { %8978 = vmatpush3.bf16.msk.msra.mxu1 %vm12210_vm14, %v14160_v13  ;;  %14402 = vst [vmem:[#allocation16_spill] sm:$0xff] %v14401_v32  ;;  %vm14407_vm14 = vcmp.eq.s32.totalorder %v14386_v3, %v11855_v27  ;;  %v14414_v3 = vand.u32 4294901760, %v12201_v41  ;;  %v4404_v32 = vand.u32 4294901760, %v4403_v33  ;;  %v5803_v33 = vsel %vm1476_vm1, 1.0, %v14074_v45 }
 0x1d4   :  { %8979 = vmatprep.subr.bf16.mxu1 %v14070_v35  ;;  %vm12298_vm7 = vmpackc.low %vm14407_vm14, %vm14406_vm2  ;;  %v1593_v24 = vsub.f32 %v12186_v59, %v14411_v7  ;;  %v1625_v52 = vsub.f32 %v11972_v29, %v14413_v38  ;;  %vm14415_vm2 = vcmp.eq.s32.totalorder %v14403_v55, %v11848_v36  ;;  %v14416_v38 = vmov 0 }
 0x1d5   :  { %9554 = vmatpush3.bf16.msk.msra.mxu0 %vm12243_vm11, %v14160_v13  ;;  %v14409_v63 = vsel %vm12298_vm7, 4294967295, %v14408_v63  ;;  %v4385_v7 = vsub.f32 %v12201_v41, %v14414_v3  ;;  %vm12328_vm9 = vmpackc.low %vm1476_vm1, %vm14415_vm2  ;;  %v4397_v11 = vand.u32 4294901760, %v4396_v17  ;;  %v14419_v3 = vand.u32 4294901760, %v11987_v21 }
 0x1d6   :  { %9555 = vmatprep.subr.bf16.mxu0 %v14070_v35  ;;  %14410 = vst [vmem:[#allocation27_spill] sm:$0xff] %v14409_v63  ;;  %v14417_v38 = vsel %vm12328_vm9, 4294967295, %v14416_v38  ;;  %vm14420_vm14 = vmmov %vm14415_vm2  ;;  %v14421_v17 = vand.u32 4294901760, %v11989_v28  ;;  %vm14422_vm2 = vcmp.eq.s32.totalorder %v14403_v55, %v11855_v27  ;;  %v14424_v63 = vmov 0 }
 0x1d7   :  { %8981 = vmatpush3.bf16.msk.msra.mxu1 %vm12270_vm12, %v14160_v13  ;;  %14418 = vst [vmem:[#allocation29_spill] sm:$0xff] %v14417_v38  ;;  %v4410_v5 = vsub.f32 %v11987_v21, %v14419_v3  ;;  %v5802_v39 = vsel %vm14420_vm14, 1.0, %v14074_v45  ;;  %v1594_v36 = vand.u32 4294901760, %v1593_v24  ;;  %v8986_v12 = vpack.c.bf16 %v1612_v40, %v1605_v26 }
 0x1d8   :  { %8982 = vmatprep.subr.bf16.mxu1 %v14070_v35  ;;  %v4417_v3 = vsub.f32 %v11989_v28, %v14421_v17  ;;  %v1619_v15 = vand.u32 4294901760, %v1618_v18  ;;  %v1626_v42 = vand.u32 4294901760, %v1625_v52  ;;  %v14427_v17 = vand.u32 4294901760, %v11991_v19 }
 0x1d9   :  { %9557 = vmatpush3.bf16.msk.msra.mxu0 %vm12298_vm7, %v14160_v13  ;;  %vm14423_vm7 = vcmp.eq.s32.totalorder %v14252_v14, %v11855_v27  ;;  %v4386_v40 = vand.u32 4294901760, %v4385_v7  ;;  %v9562_v18 = vpack.c.bf16 %v4404_v32, %v4397_v11  ;;  %v4411_v26 = vand.u32 4294901760, %v4410_v5 }
 0x1da   :  { %9558 = vmatprep.subr.bf16.mxu0 %v14070_v35  ;;  %vm12358_vm14 = vmpackc.low %vm14423_vm7, %vm14422_vm2  ;;  %v1632_v16 = vsub.f32 %v11991_v19, %v14427_v17  ;;  %v14429_v52 = vand.u32 4294901760, %v12006_v31  ;;  %v4418_v17 = vand.u32 4294901760, %v4417_v3  ;;  %v13944_v38 = vand.u32 4294901760, %v12118_v25 }
 0x1db   :  { %v14425_v63 = vsel %vm12358_vm14, 4294967295, %v14424_v63  ;;  %8984 = vmatpush3.bf16.msk.msra.mxu1 %vm12328_vm9, %v14160_v13  ;;  %v12385_v7 = vsub.f32 %v5802_v39, %v5802_v39  ;;  %v8989_v32 = vpack.c.bf16 %v1626_v42, %v1619_v15  ;;  %v13945_v5 = vand.u32 4294901760, %v12120_v49  ;;  %vm14434_vm7 = vmmov %vm14422_vm2 }
 0x1dc   :  { %14426 = vst [vmem:[#allocation31_spill] sm:$0xff] %v14425_v63  ;;  %8985 = vmatprep.subr.bf16.mxu1 %v14070_v35  ;;  %v4424_v24 = vsub.f32 %v12006_v31, %v14429_v52  ;;  %v13946_v11 = vand.u32 4294901760, %v12127_v43  ;;  %v1633_v3 = vand.u32 4294901760, %v1632_v16  ;;  %v1640_v52 = vand.u32 4294901760, %v1639_v50 }
 0x1dd   :  { %9560 = vmatpush3.bf16.msk.msra.mxu0 %vm12358_vm14, %v14160_v13  ;;  %v14431_v63 = vand.u32 4294901760, %v12093_v22  ;;  %v1653_v39 = vsub.f32 %v12095_v48, %v14432_v54  ;;  %v13947_v15 = vand.u32 4294901760, %v12129_v34  ;;  %v13949_v50 = vand.u32 4294901760, %v12131_v44 }
 0x1de   :  { %9561 = vmatprep.subr.bf16.mxu0 %v14070_v35  ;;  %7446 = vmatmul.mubr.f32.vlgmr.msra.gmra.mrb[0].mxu1 %v1594_v36  ;;  %v12398_v36 = vsub.f32 %v5803_v33, %v5803_v33  ;;  %v4425_v42 = vand.u32 4294901760, %v4424_v24  ;;  %v4432_v16 = vand.u32 4294901760, %v4431_v30  ;;  %v4445_v33 = vsub.f32 %v12118_v25, %v13944_v38 }
 0x1df   :  { %8987 = vmatpush3.bf16.msra.mxu1 %v8986_v12  ;;  %v1646_v8 = vsub.f32 %v12093_v22, %v14431_v63  ;;  %7480 = vmatprep.mubr.msk.f32.mxu1 %vm14105_vm0, %v14074_v45  ;;  %v9565_v12 = vpack.c.bf16 %v4418_v17, %v4411_v26  ;;  %v14433_v63 = vand.u32 4294901760, %v12116_v51  ;;  %v1667_v30 = vsub.f32 %v12127_v43, %v13946_v11 }
 0x1e0   :  { %8286 = vmatmul.mubr.f32.vlgmr.msra.gmra.mrb[0].mxu0 %v4386_v40  ;;  %8988 = vmatprep.subr.bf16.mxu1 %v14070_v35  ;;  %v1660_v40 = vsub.f32 %v12120_v49, %v13945_v5  ;;  %v6062_v24 = vsel %vm14434_vm7, 1.0, %v14074_v45  ;;  %v8992_v17 = vpack.c.bf16 %v1640_v52, %v1633_v3  ;;  %v1654_v38 = vand.u32 4294901760, %v1653_v39 }
 0x1e1   :  { %9563 = vmatpush3.bf16.msra.mxu0 %v9562_v18  ;;  %v4438_v54 = vsub.f32 %v12116_v51, %v14433_v63  ;;  %8320 = vmatprep.mubr.msk.f32.mxu0 %vm14105_vm0, %v14074_v45  ;;  %v1647_v63 = vand.u32 4294901760, %v1646_v8  ;;  %v4452_v5 = vsub.f32 %v12129_v34, %v13947_v15  ;;  %v4459_v11 = vsub.f32 %v12131_v44, %v13949_v50 }
 0x1e2   :  { %9564 = vmatprep.subr.bf16.mxu0 %v14070_v35  ;;  %vm14435_vm1 = vcmp.eq.s32.totalorder %v14252_v14, %v11855_v27  ;;  %v9568_v3 = vpack.c.bf16 %v4432_v16, %v4425_v42  ;;  %v4446_v8 = vand.u32 4294901760, %v4445_v33  ;;  %v1661_v39 = vand.u32 4294901760, %v1660_v40 }
 0x1e3   :  { %8990 = vmatpush3.bf16.msra.mxu1 %v8989_v32  ;;  %v6063_v32 = vsel %vm14435_vm1, 1.0, %v14074_v45  ;;  %v4439_v52 = vand.u32 4294901760, %v4438_v54  ;;  %v1668_v15 = vand.u32 4294901760, %v1667_v30  ;;  %v14436_v55 = vand.u32 4294901760, %v12146_v37 }
 0x1e4   :  { %8991 = vmatprep.subr.bf16.mxu1 %v14070_v35  ;;  %v14437_v26 = vand.u32 4294901760, %v12148_v10  ;;  %v12444_v2 = vsub.f32 %v6062_v24, %v6062_v24  ;;  %v8995_v27 = vpack.c.bf16 %v1654_v38, %v1647_v63  ;;  %v1687_v42 = vand.u32 4294901760, %v12231_v6 }
 0x1e5   :  { %9566 = vmatpush3.bf16.msra.mxu0 %v9565_v12  ;;  %v1674_v50 = vsub.f32 %v12146_v37, %v14436_v55  ;;  %v13952_v12 = vand.u32 4294901760, %v12256_v47  ;;  %v4453_v16 = vand.u32 4294901760, %v4452_v5  ;;  %v4460_v54 = vand.u32 4294901760, %v4459_v11 }
 0x1e6   :  { %9567 = vmatprep.subr.bf16.mxu0 %v14070_v35  ;;  %v1681_v18 = vsub.f32 %v12148_v10, %v14437_v26  ;;  %v14438_v33 = vand.u32 4294901760, %v12227_v56  ;;  %v14439_v40 = vand.u32 4294901760, %v12229_v53  ;;  %v12455_v26 = vsub.f32 %v6063_v32, %v6063_v32 }
 0x1e7   :  { %8993 = vmatpush3.bf16.msra.mxu1 %v8992_v17  ;;  %v9571_v38 = vpack.c.bf16 %v4446_v8, %v4439_v52  ;;  %v13954_v24 = vand.u32 4294901760, %v12258_v61  ;;  %v13953_v17 = vand.u32 4294901760, %v12260_v20  ;;  %v8998_v5 = vpack.c.bf16 %v1668_v15, %v1661_v39 }
 0x1e8   :  { %8994 = vmatprep.subr.bf16.mxu1 %v14070_v35  ;;  %v4466_v55 = vsub.f32 %v12227_v56, %v14438_v33  ;;  %v4473_v30 = vsub.f32 %v12229_v53, %v14439_v40  ;;  %v1675_v11 = vand.u32 4294901760, %v1674_v50  ;;  %v1682_v63 = vand.u32 4294901760, %v1681_v18 }
 0x1e9   :  { %9569 = vmatpush3.bf16.msra.mxu0 %v9568_v3  ;;  %v1688_v33 = vsub.f32 %v12231_v6, %v1687_v42  ;;  %v1695_v32 = vsub.f32 %v12256_v47, %v13952_v12  ;;  %v13958_v3 = vand.u32 4294901760, %v12385_v7  ;;  %v13957_v52 = vand.u32 4294901760, %v12398_v36 }
 0x1ea   :  { %9570 = vmatprep.subr.bf16.mxu0 %v14070_v35  ;;  %v9574_v8 = vpack.c.bf16 %v4460_v54, %v4453_v16  ;;  %v4467_v40 = vand.u32 4294901760, %v4466_v55  ;;  %v4474_v15 = vand.u32 4294901760, %v4473_v30  ;;  %v4480_v50 = vsub.f32 %v12258_v61, %v13954_v24 }
 0x1eb   :  { %8996 = vmatpush3.bf16.msra.mxu1 %v8995_v27  ;;  %v4487_v18 = vsub.f32 %v12260_v20, %v13953_v17  ;;  %v13956_v39 = vand.u32 4294901760, %v12444_v2  ;;  %v13955_v27 = vand.u32 4294901760, %v12455_v26  ;;  %v9001_v12 = vpack.c.bf16 %v1682_v63, %v1675_v11 }
 0x1ec   :  { %8997 = vmatprep.subr.bf16.mxu1 %v14070_v35  ;;  %v1689_v16 = vand.u32 4294901760, %v1688_v33  ;;  %v1696_v54 = vand.u32 4294901760, %v1695_v32  ;;  %v1702_v55 = vsub.f32 %v12385_v7, %v13958_v3  ;;  %v1709_v30 = vsub.f32 %v12398_v36, %v13957_v52 }
 0x1ed   :  { %9572 = vmatpush3.bf16.msra.mxu0 %v9571_v38  ;;  %v9577_v38 = vpack.c.bf16 %v4474_v15, %v4467_v40  ;;  %v4481_v17 = vand.u32 4294901760, %v4480_v50  ;;  %v4488_v24 = vand.u32 4294901760, %v4487_v18  ;;  %v4501_v11 = vsub.f32 %v12455_v26, %v13955_v27 }
 0x1ee   :  { %9573 = vmatprep.subr.bf16.mxu0 %v14070_v35  ;;  %v9004_v63 = vpack.c.bf16 %v1696_v54, %v1689_v16  ;;  %v1703_v33 = vand.u32 4294901760, %v1702_v55  ;;  %v1710_v32 = vand.u32 4294901760, %v1709_v30  ;;  %v9589_v16 = vpack.c.bf16 %v11989_v28, %v11987_v21 }
 0x1ef   :  { %8999 = vmatpush3.bf16.msra.mxu1 %v8998_v5  ;;  %v4494_v5 = vsub.f32 %v12444_v2, %v13956_v39  ;;  %v4502_v15 = vand.u32 4294901760, %v4501_v11  ;;  %v9016_v54 = vpack.c.bf16 %v11993_v9, %v11991_v19  ;;  %v9592_v55 = vpack.c.bf16 %v12008_v60, %v12006_v31 }
 0x1f0   :  { %9000 = vmatprep.subr.bf16.mxu1 %v14070_v35  ;;  %v9007_v50 = vpack.c.bf16 %v1710_v32, %v1703_v33  ;;  %v9019_v30 = vpack.c.bf16 %v12095_v48, %v12093_v22  ;;  %v9598_v11 = vpack.c.bf16 %v12131_v44, %v12129_v34  ;;  %v9601_v33 = vpack.c.bf16 %v12229_v53, %v12227_v56 }
 0x1f1   :  { %9575 = vmatpush3.bf16.msra.mxu0 %v9574_v8  ;;  %v9580_v8 = vpack.c.bf16 %v4488_v24, %v4481_v17  ;;  %v4495_v40 = vand.u32 4294901760, %v4494_v5  ;;  %v9586_v24 = vpack.c.bf16 %v11967_v1, %v11965_v0  ;;  %v9013_v17 = vpack.c.bf16 %v11972_v29, %v11970_v4 }
 0x1f2   :  { %9576 = vmatprep.subr.bf16.mxu0 %v14070_v35  ;;  %v9022_v5 = vpack.c.bf16 %v12127_v43, %v12120_v49  ;;  %v9028_v32 = vpack.c.bf16 %v12256_v47, %v12231_v6  ;;  %v14461_v27 = vand.u32 4294901760, %v11965_v0  ;;  %v14462_v39 = vand.u32 4294901760, %v11967_v1 }
 0x1f3   :  { %9002 = vmatpush3.bf16.msra.mxu1 %v9001_v12  ;;  %v9583_v18 = vpack.c.bf16 %v4502_v15, %v4495_v40  ;;  %v9010_v12 = vpack.c.bf16 %v11950_v62, %v11948_v46  ;;  %v9031_v40 = vpack.c.bf16 %v12398_v36, %v12385_v7  ;;  %v9607_v15 = vpack.c.bf16 %v12455_v26, %v12444_v2 }
 0x1f4   :  { %9003 = vmatprep.subr.bf16.mxu1 %v14070_v35  ;;  %v9634_v52 = vpack.c.bf16 %v14462_v39, %v14461_v27  ;;  %v14463_v3 = vand.u32 4294901760, %v12186_v59  ;;  %v14467_v0 = vand.u32 4294901760, %v11987_v21  ;;  %v14468_v1 = vand.u32 4294901760, %v11989_v28 }
 0x1f5   :  { %9578 = vmatpush3.bf16.msra.mxu0 %v9577_v38  ;;  %v9595_v38 = vpack.c.bf16 %v12118_v25, %v12116_v51  ;;  %v14472_v21 = vand.u32 4294901760, %v12008_v60  ;;  %v14474_v39 = vand.u32 4294901760, %v12095_v48  ;;  %v14478_v60 = vand.u32 4294901760, %v12127_v43 }
 0x1f6   :  { %9579 = vmatprep.subr.bf16.mxu0 %v14070_v35  ;;  %v14480_v48 = vand.u32 4294901760, %v12131_v44  ;;  %v14484_v43 = vand.u32 4294901760, %v12229_v53  ;;  %v14488_v53 = vand.u32 4294901760, %v12385_v7  ;;  %v14490_v6 = vand.u32 4294901760, %v12444_v2 }
 0x1f7   :  { %9005 = vmatpush3.bf16.msra.mxu1 %v9004_v63  ;;  %v9025_v63 = vpack.c.bf16 %v12148_v10, %v12146_v37 }
 0x1f8   :  { %9006 = vmatprep.subr.bf16.mxu1 %v14070_v35 }
 0x1f9   :  { %9581 = vmatpush3.bf16.msra.mxu0 %v9580_v8  ;;  %v9604_v8 = vpack.c.bf16 %v12260_v20, %v12258_v61 }
 0x1fa   :  { %9582 = vmatprep.subr.bf16.mxu0 %v14070_v35 }
 0x1fb   :  { %9008 = vmatpush3.bf16.msra.mxu1 %v9007_v50  ;;  %v14496_v50 = vld [vmem:[#allocation17_spill] sm:$0xff] }
 0x1fc   :  { %9009 = vmatprep.subr.bf16.mxu1 %v14070_v35 }
 0x1fd   :  { %9584 = vmatpush3.bf16.msra.mxu0 %v9583_v18 }
 0x1fe   :  { %9585 = vmatprep.subr.bf16.mxu0 %v14070_v35  ;;  %7481 = vmatmul.mubr.f32.vlgmr.msra.gmra.mrb[0].mxu1 %v12122_v57 }
 0x1ff   :  { %9011 = vmatpush3.bf16.msra.mxu1 %v9010_v12  ;;  %7515 = vmatprep.mubr.msk.f32.mxu1 %vm14105_vm0, %v14074_v45 }
 0x200   :  { %8321 = vmatmul.mubr.f32.vlgmr.msra.gmra.mrb[0].mxu0 %v12133_v23  ;;  %9012 = vmatprep.subr.bf16.mxu1 %v14070_v35 }
 0x201   :  { %9587 = vmatpush3.bf16.msra.mxu0 %v9586_v24  ;;  %8355 = vmatprep.mubr.msk.f32.mxu0 %vm14105_vm0, %v14074_v45 }
 0x202   :  { %9588 = vmatprep.subr.bf16.mxu0 %v14070_v35 }
 0x203   :  { %9014 = vmatpush3.bf16.msra.mxu1 %v9013_v17 }
 0x204   :  { %9015 = vmatprep.subr.bf16.mxu1 %v14070_v35 }
 0x205   :  { %9590 = vmatpush3.bf16.msra.mxu0 %v9589_v16 }
 0x206   :  { %9591 = vmatprep.subr.bf16.mxu0 %v14070_v35 }
 0x207   :  { %9017 = vmatpush3.bf16.msra.mxu1 %v9016_v54  ;;  %v14499_v54 = vld [vmem:[#allocation18_spill] sm:$0xff] }
 0x208   :  { %9018 = vmatprep.subr.bf16.mxu1 %v14070_v35 }
 0x209   :  { %9593 = vmatpush3.bf16.msra.mxu0 %v9592_v55  ;;  %v14447_v55 = vld [vmem:[#allocation35_spill] sm:$0xff] }
 0x20a   :  { %9594 = vmatprep.subr.bf16.mxu0 %v14070_v35  ;;  %vm14448_vm2 = vnez %v14447_v55  ;;  %v14500_v55 = vld [vmem:[#allocation19_spill] sm:$0xff] }
 0x20b   :  { %9020 = vmatpush3.bf16.msra.mxu1 %v9019_v30  ;;  %v14449_v30 = vld [vmem:[#allocation13_spill] sm:$0xff] }
 0x20c   :  { %9021 = vmatprep.subr.bf16.mxu1 %v14070_v35  ;;  %vm14450_vm7 = vnez %v14449_v30 }
 0x20d   :  { %9596 = vmatpush3.bf16.msra.mxu0 %v9595_v38  ;;  %v14451_v38 = vld [vmem:[#allocation12_spill] sm:$0xff] }
 0x20e   :  { %9597 = vmatprep.subr.bf16.mxu0 %v14070_v35  ;;  %vm14452_vm1 = vnez %v14451_v38 }
 0x20f   :  { %9023 = vmatpush3.bf16.msra.mxu1 %v9022_v5 }
 0x210   :  { %9024 = vmatprep.subr.bf16.mxu1 %v14070_v35 }
 0x211   :  { %9599 = vmatpush3.bf16.msra.mxu0 %v9598_v11 }
 0x212   :  { %9600 = vmatprep.subr.bf16.mxu0 %v14070_v35 }
 0x213   :  { %9026 = vmatpush3.bf16.msra.mxu1 %v9025_v63  ;;  %v14455_v63 = vld [vmem:[#allocation27_spill] sm:$0xff] }
 0x214   :  { %9027 = vmatprep.subr.bf16.mxu1 %v14070_v35 }
 0x215   :  { %9602 = vmatpush3.bf16.msra.mxu0 %v9601_v33  ;;  %v14505_v33 = vld [vmem:[#allocation21_spill] sm:$0xff] }
 0x216   :  { %9603 = vmatprep.subr.bf16.mxu0 %v14070_v35 }
 0x217   :  { %9029 = vmatpush3.bf16.msra.mxu1 %v9028_v32  ;;  %v14458_v32 = vand.u32 4294901760, %v11948_v46  ;;  %v14464_v46 = vand.u32 4294901760, %v11970_v4  ;;  %v14469_v4 = vand.u32 4294901760, %v11991_v19  ;;  %v14475_v19 = vand.u32 4294901760, %v12116_v51 }
 0x218   :  { %9030 = vmatprep.subr.bf16.mxu1 %v14070_v35  ;;  %v14481_v51 = vand.u32 4294901760, %v12146_v37  ;;  %v14486_v37 = vand.u32 4294901760, %v12258_v61  ;;  %v14494_v61 = vld [vmem:[#allocation14_spill] sm:$0xff] }
 0x219   :  { %9605 = vmatpush3.bf16.msra.mxu0 %v9604_v8  ;;  %v14459_v8 = vand.u32 4294901760, %v11950_v62  ;;  %v14465_v62 = vand.u32 4294901760, %v11972_v29  ;;  %v14470_v29 = vand.u32 4294901760, %v11993_v9  ;;  %v14476_v9 = vand.u32 4294901760, %v12118_v25 }
 0x21a   :  { %9606 = vmatprep.subr.bf16.mxu0 %v14070_v35  ;;  %v14482_v25 = vand.u32 4294901760, %v12148_v10  ;;  %v14487_v10 = vand.u32 4294901760, %v12260_v20  ;;  %v14493_v20 = vld [vmem:[#allocation15_spill] sm:$0xff] }
 0x21b   :  { %9032 = vmatpush3.bf16.msra.mxu1 %v9031_v40  ;;  %v9058_v40 = vpack.c.bf16 %v14459_v8, %v14458_v32  ;;  %v9061_v32 = vpack.c.bf16 %v14465_v62, %v14464_v46  ;;  %v14466_v8 = vand.u32 4294901760, %v12201_v41  ;;  %v5852_v58 = vadd.s32 4294966912, %v14493_v20 }
 0x21c   :  { %9033 = vmatprep.subr.bf16.mxu1 %v14070_v35  ;;  %v6112_v2 = vadd.s32 4294966400, %v14493_v20 }
 0x21d   :  { %9608 = vmatpush3.bf16.msra.mxu0 %v9607_v15  ;;  %v12766_v7 = vrot.slane %v5852_v58, %v14494_v61  ;;  %v14506_v15 = vmov 0 }
 0x21e   :  { %9609 = vmatprep.subr.bf16.mxu0 %v14070_v35  ;;  %7516 = vmatmul.mubr.f32.vlgmr.msra.gmra.mrb[0].mxu1 %v12186_v59  ;;  %v9637_v59 = vpack.c.bf16 %v14468_v1, %v14467_v0  ;;  %v9652_v0 = vpack.c.bf16 %v14487_v10, %v14486_v37  ;;  %v2152_v10 = vld [vmem:[#allocation5 + $0x3] sm:$0x1] }
 0x21f   :  { %9035 = vmatpush3.bf16.msk.msra.mxu1 %vm11876_vm13, %v14160_v13  ;;  %7550 = vmatprep.mubr.msk.f32.mxu1 %vm14105_vm0, %v14074_v45 }
 0x220   :  { %8356 = vmatmul.mubr.f32.vlgmr.msra.gmra.mrb[0].mxu0 %v12201_v41  ;;  %9036 = vmatprep.subr.bf16.mxu1 %v14070_v35  ;;  %v9064_v41 = vpack.c.bf16 %v14470_v29, %v14469_v4 }
 0x221   :  { %9611 = vmatpush3.bf16.msk.msra.mxu0 %vm11891_vm6, %v14160_v13  ;;  %8390 = vmatprep.mubr.msk.f32.mxu0 %vm14105_vm0, %v14074_v45 }
 0x222   :  { %9612 = vmatprep.subr.bf16.mxu0 %v14070_v35 }
 0x223   :  { %9038 = vmatpush3.bf16.msk.msra.mxu1 %vm11932_vm10, %v14160_v13 }
 0x224   :  { %9039 = vmatprep.subr.bf16.mxu1 %v14070_v35 }
 0x225   :  { %9614 = vmatpush3.bf16.msk.msra.mxu0 %vm11980_vm3, %v14160_v13 }
 0x226   :  { %9615 = vmatprep.subr.bf16.mxu0 %v14070_v35 }
 0x227   :  { %9041 = vmatpush3.bf16.msk.msra.mxu1 %vm12002_vm15, %v14160_v13 }
 0x228   :  { %9042 = vmatprep.subr.bf16.mxu1 %v14070_v35 }
 0x229   :  { %9617 = vmatpush3.bf16.msk.msra.mxu0 %vm12036_vm4, %v14160_v13 }
 0x22a   :  { %9618 = vmatprep.subr.bf16.mxu0 %v14070_v35 }
 0x22b   :  { %9044 = vmatpush3.bf16.msk.msra.mxu1 %vm12074_vm5, %v14160_v13 }
 0x22c   :  { %9045 = vmatprep.subr.bf16.mxu1 %v14070_v35 }
 0x22d   :  { %9620 = vmatpush3.bf16.msk.msra.mxu0 %vm12112_vm8, %v14160_v13 }
 0x22e   :  { %9621 = vmatprep.subr.bf16.mxu0 %v14070_v35 }
 0x22f   :  { %9047 = vmatpush3.bf16.msk.msra.mxu1 %vm14448_vm2, %v14160_v13 }
 0x230   :  { %9048 = vmatprep.subr.bf16.mxu1 %v14070_v35 }
 0x231   :  { %9623 = vmatpush3.bf16.msk.msra.mxu0 %vm14450_vm7, %v14160_v13  ;;  %vm14456_vm7 = vnez %v14455_v63  ;;  %v14504_v63 = vld [vmem:[#allocation20_spill] sm:$0xff] }
 0x232   :  { %9624 = vmatprep.subr.bf16.mxu0 %v14070_v35 }
 0x233   :  { %9050 = vmatpush3.bf16.msk.msra.mxu1 %vm14452_vm1, %v14160_v13 }
 0x234   :  { %9051 = vmatprep.subr.bf16.mxu1 %v14070_v35 }
 0x235   :  { %9626 = vmatpush3.bf16.msk.msra.mxu0 %vm12243_vm11, %v14160_v13 }
 0x236   :  { %9627 = vmatprep.subr.bf16.mxu0 %v14070_v35 }
 0x237   :  { %9053 = vmatpush3.bf16.msk.msra.mxu1 %vm12270_vm12, %v14160_v13 }
 0x238   :  { %9054 = vmatprep.subr.bf16.mxu1 %v14070_v35 }
 0x239   :  { %9629 = vmatpush3.bf16.msk.msra.mxu0 %vm14456_vm7, %v14160_v13 }
 0x23a   :  { %9630 = vmatprep.subr.bf16.mxu0 %v14070_v35 }
 0x23b   :  { %9056 = vmatpush3.bf16.msk.msra.mxu1 %vm12328_vm9, %v14160_v13 }
 0x23c   :  { %9057 = vmatprep.subr.bf16.mxu1 %v14070_v35 }
 0x23d   :  { %9632 = vmatpush3.bf16.msk.msra.mxu0 %vm12358_vm14, %v14160_v13 }
 0x23e   :  { %9633 = vmatprep.subr.bf16.mxu0 %v14070_v35  ;;  %7551 = vmatmul.mubr.f32.vlgmr.msra.gmra.mrb[0].mxu1 %v14463_v3  ;;  %v14471_v3 = vand.u32 4294901760, %v12006_v31  ;;  %v14477_v31 = vand.u32 4294901760, %v12120_v49  ;;  %v14483_v49 = vand.u32 4294901760, %v12227_v56  ;;  %v14489_v56 = vand.u32 4294901760, %v12398_v36 }
 0x23f   :  { %9059 = vmatpush3.bf16.msra.mxu1 %v9058_v40  ;;  %7585 = vmatprep.mubr.msk.f32.mxu1 %vm14105_vm0, %v14074_v45  ;;  %v9643_v40 = vpack.c.bf16 %v14476_v9, %v14475_v19  ;;  %v12773_v36 = vrot.slane %v6112_v2, %v14494_v61  ;;  %v14527_v61 = vmov 0 }
 0x240   :  { %8391 = vmatmul.mubr.f32.vlgmr.msra.gmra.mrb[0].mxu0 %v14466_v8  ;;  %9060 = vmatprep.subr.bf16.mxu1 %v14070_v35  ;;  %v9640_v28 = vpack.c.bf16 %v14472_v21, %v14471_v3  ;;  %v9070_v46 = vpack.c.bf16 %v14478_v60, %v14477_v31  ;;  %v9649_v8 = vpack.c.bf16 %v14484_v43, %v14483_v49  ;;  %v14512_v60 = vmov 0 }
 0x241   :  { %9635 = vmatpush3.bf16.msra.mxu0 %v9634_v52  ;;  %8425 = vmatprep.mubr.msk.f32.mxu0 %vm14105_vm0, %v14074_v45  ;;  %v14473_v52 = vand.u32 4294901760, %v12093_v22  ;;  %v14479_v22 = vand.u32 4294901760, %v12129_v34  ;;  %v14485_v34 = vand.u32 4294901760, %v12256_v47  ;;  %v9079_v1 = vpack.c.bf16 %v14489_v56, %v14488_v53 }
 0x242   :  { %9636 = vmatprep.subr.bf16.mxu0 %v14070_v35  ;;  %v14491_v47 = vand.u32 4294901760, %v12455_v26  ;;  %v14495_v26 = vld [vmem:[#allocation11_spill] sm:$0xff] }
 0x243   :  { %9062 = vmatpush3.bf16.msra.mxu1 %v9061_v32  ;;  %v9067_v27 = vpack.c.bf16 %v14474_v39, %v14473_v52  ;;  %v9646_v62 = vpack.c.bf16 %v14480_v48, %v14479_v22  ;;  %v9073_v32 = vpack.c.bf16 %v14482_v25, %v14481_v51  ;;  %v9076_v44 = vpack.c.bf16 %v14485_v34, %v1687_v42  ;;  %v14515_v48 = vld [vmem:[#allocation22_spill] sm:$0xff]  ;;  %v14521_v34 = vld [vmem:[#allocation25_spill] sm:$0xff] }
 0x244   :  { %9063 = vmatprep.subr.bf16.mxu1 %v14070_v35  ;;  %v9655_v42 = vpack.c.bf16 %v14491_v47, %v14490_v6  ;;  %v14526_v6 = vld [vmem:[#allocation30_spill] sm:$0xff] }
 0x245   :  { %9638 = vmatpush3.bf16.msra.mxu0 %v9637_v59  ;;  %v4944_v47 = vld [vmem:[#allocation5 + $0x7] sm:$0x1] }
 0x246   :  { %9639 = vmatprep.subr.bf16.mxu0 %v14070_v35 }
 0x247   :  { %9065 = vmatpush3.bf16.msra.mxu1 %v9064_v41 }
 0x248   :  { %9066 = vmatprep.subr.bf16.mxu1 %v14070_v35 }
 0x249   :  { %9641 = vmatpush3.bf16.msra.mxu0 %v9640_v28 }
 0x24a   :  { %9642 = vmatprep.subr.bf16.mxu0 %v14070_v35 }
 0x24b   :  { %9068 = vmatpush3.bf16.msra.mxu1 %v9067_v27  ;;  %v14509_v27 = vmov 0 }
 0x24c   :  { %9069 = vmatprep.subr.bf16.mxu1 %v14070_v35 }
 0x24d   :  { %9644 = vmatpush3.bf16.msra.mxu0 %v9643_v40 }
 0x24e   :  { %9645 = vmatprep.subr.bf16.mxu0 %v14070_v35 }
 0x24f   :  { %9071 = vmatpush3.bf16.msra.mxu1 %v9070_v46 }
 0x250   :  { %9072 = vmatprep.subr.bf16.mxu1 %v14070_v35 }
 0x251   :  { %9647 = vmatpush3.bf16.msra.mxu0 %v9646_v62  ;;  %v14516_v62 = vld [vmem:[#allocation23_spill] sm:$0xff] }
 0x252   :  { %9648 = vmatprep.subr.bf16.mxu0 %v14070_v35 }
 0x253   :  { %9074 = vmatpush3.bf16.msra.mxu1 %v9073_v32  ;;  %v14517_v32 = vmov 0 }
 0x254   :  { %9075 = vmatprep.subr.bf16.mxu1 %v14070_v35 }
 0x255   :  { %9650 = vmatpush3.bf16.msra.mxu0 %v9649_v8  ;;  %v14520_v8 = vld [vmem:[#allocation24_spill] sm:$0xff] }
 0x256   :  { %9651 = vmatprep.subr.bf16.mxu0 %v14070_v35 }
 0x257   :  { %9077 = vmatpush3.bf16.msra.mxu1 %v9076_v44 }
 0x258   :  { %9078 = vmatprep.subr.bf16.mxu1 %v14070_v35 }
 0x259   :  { %9653 = vmatpush3.bf16.msra.mxu0 %v9652_v0  ;;  %v14522_v0 = vmov 0 }
 0x25a   :  { %9654 = vmatprep.subr.bf16.mxu0 %v14070_v35 }
 0x25b   :  { %9080 = vmatpush3.bf16.msra.mxu1 %v9079_v1  ;;  %v14525_v1 = vld [vmem:[#allocation28_spill] sm:$0xff] }
 0x25c   :  { %9081 = vmatprep.subr.bf16.mxu1 %v14070_v35 }
 0x25d   :  { %9656 = vmatpush3.bf16.msra.mxu0 %v9655_v42 }
 0x25e   :  { %9657 = vmatprep.subr.bf16.mxu0 %v14070_v35  ;;  %7586 = vmatmul.mubr.f32.vlgmr.msra.gmra.mrb[0].mxu1 %v12122_v57 }
 0x25f   :  { %9083 = vmatpush3.bf16.msk.msra.mxu1 %vm11876_vm13, %v14160_v13  ;;  %7620 = vmatprep.mubr.msk.f32.mxu1 %vm14105_vm0, %v14074_v45  ;;  %vm14492_vm13 = vnez %v14449_v30  ;;  %v14501_v30 = vmov 0 }
 0x260   :  { %8426 = vmatmul.mubr.f32.vlgmr.msra.gmra.mrb[0].mxu0 %v12133_v23  ;;  %9084 = vmatprep.subr.bf16.mxu1 %v14070_v35 }
 0x261   :  { %9659 = vmatpush3.bf16.msk.msra.mxu0 %vm11891_vm6, %v14160_v13  ;;  %8460 = vmatprep.mubr.msk.f32.mxu0 %vm14105_vm0, %v14074_v45  ;;  %vm2159_vm6 = vcmp.eq.s32.totalorder %v14495_v26, %v12766_v7 }
 0x262   :  { %9660 = vmatprep.subr.bf16.mxu0 %v14070_v35  ;;  %v5853_v18 = vsel %vm2159_vm6, 1.0, %v14074_v45 }
 0x263   :  { %9086 = vmatpush3.bf16.msk.msra.mxu1 %vm11932_vm10, %v14160_v13  ;;  %vm2160_vm10 = vcmp.eq.s32.totalorder %v14496_v50, %v12766_v7  ;;  %v12866_v4 = vsub.f32 %v5853_v18, %v5853_v18 }
 0x264   :  { %9087 = vmatprep.subr.bf16.mxu1 %v14070_v35  ;;  %v5854_v12 = vsel %vm2160_vm10, 1.0, %v14074_v45 }
 0x265   :  { %9662 = vmatpush3.bf16.msk.msra.mxu0 %vm11980_vm3, %v14160_v13  ;;  %vm4951_vm3 = vcmp.eq.s32.totalorder %v14495_v26, %v12773_v36  ;;  %v12868_v29 = vsub.f32 %v5854_v12, %v5854_v12  ;;  %v13040_v12 = vand.u32 4294901760, %v2152_v10 }
 0x266   :  { %9663 = vmatprep.subr.bf16.mxu0 %v14070_v35  ;;  %v6113_v17 = vsel %vm4951_vm3, 1.0, %v14074_v45 }
 0x267   :  { %9089 = vmatpush3.bf16.msk.msra.mxu1 %vm12002_vm15, %v14160_v13  ;;  %vm4952_vm15 = vcmp.eq.s32.totalorder %v14496_v50, %v12773_v36  ;;  %v12883_v21 = vsub.f32 %v6113_v17, %v6113_v17 }
 0x268   :  { %9090 = vmatprep.subr.bf16.mxu1 %v14070_v35  ;;  %v6114_v16 = vsel %vm4952_vm15, 1.0, %v14074_v45 }
 0x269   :  { %9665 = vmatpush3.bf16.msk.msra.mxu0 %vm12036_vm4, %v14160_v13  ;;  %vm12794_vm4 = vmpackc.low %vm2160_vm10, %vm2159_vm6  ;;  %v12885_v28 = vsub.f32 %v6114_v16, %v6114_v16 }
 0x26a   :  { %9666 = vmatprep.subr.bf16.mxu0 %v14070_v35 }
 0x26b   :  { %9092 = vmatpush3.bf16.msk.msra.mxu1 %vm12074_vm5, %v14160_v13  ;;  %vm2161_vm5 = vcmp.eq.s32.totalorder %v14499_v54, %v12766_v7 }
 0x26c   :  { %9093 = vmatprep.subr.bf16.mxu1 %v14070_v35  ;;  %v5855_v38 = vsel %vm2161_vm5, 1.0, %v14074_v45 }
 0x26d   :  { %9668 = vmatpush3.bf16.msk.msra.mxu0 %vm12112_vm8, %v14160_v13  ;;  %vm2162_vm8 = vcmp.eq.s32.totalorder %v14500_v55, %v12766_v7  ;;  %v12888_v52 = vsub.f32 %v5855_v38, %v5855_v38  ;;  %v14532_v38 = vmov 0 }
 0x26e   :  { %9669 = vmatprep.subr.bf16.mxu0 %v14070_v35  ;;  %v5856_v5 = vsel %vm2162_vm8, 1.0, %v14074_v45 }
 0x26f   :  { %9095 = vmatpush3.bf16.msk.msra.mxu1 %vm14448_vm2, %v14160_v13  ;;  %vm2164_vm2 = vcmp.eq.s32.totalorder %v14505_v33, %v12766_v7  ;;  %v12890_v39 = vsub.f32 %v5856_v5, %v5856_v5 }
 0x270   :  { %9096 = vmatprep.subr.bf16.mxu1 %v14070_v35 }
 0x271   :  { %9671 = vmatpush3.bf16.msk.msra.mxu0 %vm14492_vm13, %v14160_v13  ;;  %vm4956_vm13 = vcmp.eq.s32.totalorder %v14505_v33, %v12773_v36  ;;  %v14535_v33 = vld [vmem:[#allocation32_spill] sm:$0xff] }
 0x272   :  { %9672 = vmatprep.subr.bf16.mxu0 %v14070_v35  ;;  %v6118_v3 = vsel %vm4956_vm13, 1.0, %v14074_v45 }
 0x273   :  { %9098 = vmatpush3.bf16.msk.msra.mxu1 %vm14452_vm1, %v14160_v13  ;;  %vm4955_vm1 = vcmp.eq.s32.totalorder %v14504_v63, %v12773_v36  ;;  %v12926_v22 = vsub.f32 %v6118_v3, %v6118_v3 }
 0x274   :  { %9099 = vmatprep.subr.bf16.mxu1 %v14070_v35  ;;  %v6117_v41 = vsel %vm4955_vm1, 1.0, %v14074_v45 }
 0x275   :  { %9674 = vmatpush3.bf16.msk.msra.mxu0 %vm12243_vm11, %v14160_v13  ;;  %vm12809_vm11 = vmpackc.low %vm4952_vm15, %vm4951_vm3  ;;  %v12924_v46 = vsub.f32 %v6117_v41, %v6117_v41  ;;  %vm2165_vm3 = vcmp.eq.s32.totalorder %v14515_v48, %v12766_v7  ;;  %vm2166_vm15 = vcmp.eq.s32.totalorder %v14516_v62, %v12766_v7  ;;  %v14539_v41 = vld [vmem:[#allocation33_spill] sm:$0xff] }
 0x276   :  { %9675 = vmatprep.subr.bf16.mxu0 %v14070_v35  ;;  %v14502_v30 = vsel %vm12809_vm11, 4294967295, %v14501_v30  ;;  %v5859_v51 = vsel %vm2165_vm3, 1.0, %v14074_v45  ;;  %v5860_v25 = vsel %vm2166_vm15, 1.0, %v14074_v45 }
 0x277   :  { %9101 = vmatpush3.bf16.msk.msra.mxu1 %vm12270_vm12, %v14160_v13  ;;  %14503 = vst [vmem:[#allocation36_spill] sm:$0xff] %v14502_v30  ;;  %vm4953_vm12 = vcmp.eq.s32.totalorder %v14499_v54, %v12773_v36  ;;  %v13011_v42 = vsub.f32 %v5859_v51, %v5859_v51  ;;  %v13013_v20 = vsub.f32 %v5860_v25, %v5860_v25 }
 0x278   :  { %9102 = vmatprep.subr.bf16.mxu1 %v14070_v35 }
 0x279   :  { %9677 = vmatpush3.bf16.msk.msra.mxu0 %vm14456_vm7, %v14160_v13  ;;  %vm12850_vm7 = vmpackc.low %vm2162_vm8, %vm2161_vm5  ;;  %vm4957_vm5 = vcmp.eq.s32.totalorder %v14515_v48, %v12773_v36  ;;  %vm4958_vm8 = vcmp.eq.s32.totalorder %v14516_v62, %v12773_v36  ;;  %v13104_v48 = vsub.f32 %v2152_v10, %v13040_v12  ;;  %v13970_v62 = vand.u32 4294901760, %v12868_v29 }
 0x27a   :  { %9678 = vmatprep.subr.bf16.mxu0 %v14070_v35  ;;  %v14507_v15 = vsel %vm12850_vm7, 4294967295, %v14506_v15  ;;  %v6119_v49 = vsel %vm4957_vm5, 1.0, %v14074_v45  ;;  %v6120_v43 = vsel %vm4958_vm8, 1.0, %v14074_v45 }
 0x27b   :  { %9104 = vmatpush3.bf16.msk.msra.mxu1 %vm12328_vm9, %v14160_v13  ;;  %vm4954_vm9 = vcmp.eq.s32.totalorder %v14500_v55, %v12773_v36  ;;  %14508 = vst [vmem:[#allocation37_spill] sm:$0xff] %v14507_v15  ;;  %v13034_v26 = vsub.f32 %v6119_v49, %v6119_v49  ;;  %v13036_v50 = vsub.f32 %v6120_v43, %v6120_v43  ;;  %v13051_v55 = vand.u32 4294901760, %v4944_v47 }
 0x27c   :  { %9105 = vmatprep.subr.bf16.mxu1 %v14070_v35  ;;  %v6116_v11 = vsel %vm4954_vm9, 1.0, %v14074_v45  ;;  %vm12898_vm6 = vmpackc.low %vm4954_vm9, %vm4953_vm12  ;;  %vm13960_vm9 = vcmp.eq.s32.totalorder %v14520_v8, %v12766_v7  ;;  %v14542_v49 = vmov 0  ;;  %v14580_v15 = vand.u32 4294901760, %v13013_v20 }
 0x27d   :  { %9680 = vmatpush3.bf16.msk.msra.mxu0 %vm12358_vm14, %v14160_v13  ;;  %vm2163_vm14 = vcmp.eq.s32.totalorder %v14504_v63, %v12766_v7  ;;  %v14510_v27 = vsel %vm12898_vm6, 4294967295, %v14509_v27  ;;  %v12907_v9 = vsub.f32 %v6116_v11, %v6116_v11  ;;  %v5861_v44 = vsel %vm13960_vm9, 1.0, %v14074_v45 }
 0x27e   :  { %9681 = vmatprep.subr.bf16.mxu0 %v14070_v35  ;;  %7621 = vmatmul.mubr.f32.vlgmr.msra.gmra.mrb[0].mxu1 %v12122_v57  ;;  %v6115_v57 = vsel %vm4953_vm12, 1.0, %v14074_v45  ;;  %v5857_v59 = vsel %vm2163_vm14, 1.0, %v14074_v45  ;;  %14511 = vst [vmem:[#allocation38_spill] sm:$0xff] %v14510_v27  ;;  %vm12920_vm10 = vmpackc.low %vm2164_vm2, %vm2163_vm14  ;;  %vm13959_vm14 = vcmp.eq.s32.totalorder %v14521_v34, %v12766_v7  ;;  %vm13961_vm9 = vcmp.eq.s32.totalorder %v14526_v6, %v12766_v7 }
 0x27f   :  { %9107 = vmatpush3.bf16.msk.msra.mxu1 %vm12794_vm4, %v14160_v13  ;;  %7655 = vmatprep.mubr.msk.f32.mxu1 %vm14105_vm0, %v14074_v45  ;;  %v12905_v19 = vsub.f32 %v6115_v57, %v6115_v57  ;;  %v12909_v40 = vsub.f32 %v5857_v59, %v5857_v59  ;;  %v14513_v60 = vsel %vm12920_vm10, 4294967295, %v14512_v60  ;;  %vm12954_vm12 = vmpackc.low %vm4956_vm13, %vm4955_vm1  ;;  %v5862_v37 = vsel %vm13959_vm14, 1.0, %v14074_v45 }
 0x280   :  { %8461 = vmatmul.mubr.f32.vlgmr.msra.gmra.mrb[0].mxu0 %v12133_v23  ;;  %9108 = vmatprep.subr.bf16.mxu1 %v14070_v35  ;;  %v5858_v23 = vsel %vm2164_vm2, 1.0, %v14074_v45  ;;  %14514 = vst [vmem:[#allocation39_spill] sm:$0xff] %v14513_v60  ;;  %v14518_v32 = vsel %vm12954_vm12, 4294967295, %v14517_v32  ;;  %vm4959_vm2 = vcmp.eq.s32.totalorder %v14520_v8, %v12773_v36  ;;  %vm4960_vm1 = vcmp.eq.s32.totalorder %v14521_v34, %v12773_v36  ;;  %vm12992_vm13 = vmpackc.low %vm2166_vm15, %vm2165_vm3 }
 0x281   :  { %9683 = vmatpush3.bf16.msk.msra.mxu0 %vm12809_vm11, %v14160_v13  ;;  %8495 = vmatprep.mubr.msk.f32.mxu0 %vm14105_vm0, %v14074_v45  ;;  %v12911_v31 = vsub.f32 %v5858_v23, %v5858_v23  ;;  %14519 = vst [vmem:[#allocation40_spill] sm:$0xff] %v14518_v32  ;;  %v14523_v0 = vsel %vm12992_vm13, 4294967295, %v14522_v0  ;;  %v6121_v53 = vsel %vm4959_vm2, 1.0, %v14074_v45  ;;  %v6122_v56 = vsel %vm4960_vm1, 1.0, %v14074_v45  ;;  %vm13030_vm3 = vmpackc.low %vm4958_vm8, %vm4957_vm5 }
 0x282   :  { %9684 = vmatprep.subr.bf16.mxu0 %v14070_v35  ;;  %14524 = vst [vmem:[#allocation41_spill] sm:$0xff] %v14523_v0  ;;  %vm13962_vm14 = vcmp.eq.s32.totalorder %v14525_v1, %v12766_v7  ;;  %v5864_v2 = vsel %vm13961_vm9, 1.0, %v14074_v45  ;;  %v14528_v61 = vsel %vm13030_vm3, 4294967295, %v14527_v61  ;;  %v13038_v18 = vsub.f32 %v5861_v44, %v5861_v44 }
 0x283   :  { %9110 = vmatpush3.bf16.msk.msra.mxu1 %vm12850_vm7, %v14160_v13  ;;  %v5863_v58 = vsel %vm13962_vm14, 1.0, %v14074_v45  ;;  %14529 = vst [vmem:[#allocation42_spill] sm:$0xff] %v14528_v61  ;;  %v13045_v17 = vsub.f32 %v5862_v37, %v5862_v37  ;;  %v13047_v16 = vsub.f32 %v6121_v53, %v6121_v53  ;;  %v13049_v54 = vsub.f32 %v6122_v56, %v6122_v56 }
 0x284   :  { %9111 = vmatprep.subr.bf16.mxu1 %v14070_v35  ;;  %vm14530_vm15 = vcmp.eq.s32.totalorder %v14520_v8, %v12766_v7  ;;  %vm14531_vm5 = vcmp.eq.s32.totalorder %v14521_v34, %v12766_v7  ;;  %v13064_v5 = vsub.f32 %v5863_v58, %v5863_v58  ;;  %v13066_v57 = vsub.f32 %v5864_v2, %v5864_v2 }
 0x285   :  { %9686 = vmatpush3.bf16.msk.msra.mxu0 %vm12898_vm6, %v14160_v13  ;;  %vm13060_vm8 = vmpackc.low %vm14531_vm5, %vm14530_vm15  ;;  %vm13965_vm9 = vcmp.eq.s32.totalorder %v14525_v1, %v12773_v36  ;;  %vm13963_vm14 = vcmp.eq.s32.totalorder %v14526_v6, %v12773_v36  ;;  %vm13964_vm15 = vcmp.eq.s32.totalorder %v14535_v33, %v12766_v7  ;;  %v13969_v59 = vand.u32 4294901760, %v12866_v4 }
 0x286   :  { %9687 = vmatprep.subr.bf16.mxu0 %v14070_v35  ;;  %v14533_v38 = vsel %vm13060_vm8, 4294967295, %v14532_v38  ;;  %v6123_v11 = vsel %vm13965_vm9, 1.0, %v14074_v45  ;;  %v6124_v63 = vsel %vm13963_vm14, 1.0, %v14074_v45  ;;  %vm13093_vm5 = vmpackc.low %vm4960_vm1, %vm4959_vm2  ;;  %v14536_v23 = vmov 0 }
 0x287   :  { %9113 = vmatpush3.bf16.msk.msra.mxu1 %vm12920_vm10, %v14160_v13  ;;  %14534 = vst [vmem:[#allocation43_spill] sm:$0xff] %v14533_v38  ;;  %v14537_v23 = vsel %vm13093_vm5, 4294967295, %v14536_v23  ;;  %vm2172_vm14 = vcmp.eq.s32.totalorder %v14539_v41, %v12766_v7  ;;  %v5865_v3 = vsel %vm13964_vm15, 1.0, %v14074_v45  ;;  %vm13971_vm2 = vcmp.eq.s32.totalorder %v14535_v33, %v12773_v36 }
 0x288   :  { %9114 = vmatprep.subr.bf16.mxu1 %v14070_v35  ;;  %14538 = vst [vmem:[#allocation44_spill] sm:$0xff] %v14537_v23  ;;  %v5866_v51 = vsel %vm2172_vm14, 1.0, %v14074_v45  ;;  %vm13968_vm1 = vcmp.eq.s32.totalorder %v14539_v41, %v12773_v36  ;;  %v13119_v25 = vsub.f32 %v4944_v47, %v13051_v55  ;;  %vm14540_vm15 = vcmp.eq.s32.totalorder %v14525_v1, %v12766_v7 }
 0x289   :  { %9689 = vmatpush3.bf16.msk.msra.mxu0 %vm12954_vm12, %v14160_v13  ;;  %vm14541_vm9 = vcmp.eq.s32.totalorder %v14526_v6, %v12766_v7  ;;  %v6125_v43 = vsel %vm13971_vm2, 1.0, %v14074_v45  ;;  %v6126_v8 = vsel %vm13968_vm1, 1.0, %v14074_v45  ;;  %v13977_v34 = vand.u32 4294901760, %v12883_v21 }
 0x28a   :  { %9690 = vmatprep.subr.bf16.mxu0 %v14070_v35  ;;  %v13976_v44 = vand.u32 4294901760, %v12885_v28  ;;  %v13145_v37 = vsub.f32 %v6123_v11, %v6123_v11  ;;  %v13147_v10 = vsub.f32 %v6124_v63, %v6124_v63  ;;  %v13149_v53 = vsub.f32 %v5865_v3, %v5865_v3 }
 0x28b   :  { %9116 = vmatpush3.bf16.msk.msra.mxu1 %vm12992_vm13, %v14160_v13  ;;  %v2302_v56 = vsub.f32 %v12866_v4, %v13969_v59  ;;  %v14547_v47 = vmov 0  ;;  %v13980_v58 = vand.u32 4294901760, %v13104_v48  ;;  %v2309_v2 = vsub.f32 %v12868_v29, %v13970_v62 }
 0x28c   :  { %9117 = vmatprep.subr.bf16.mxu1 %v14070_v35  ;;  %v13178_v3 = vsub.f32 %v6126_v8, %v6126_v8  ;;  %v14551_v62 = vmov 0  ;;  %v5101_v8 = vsub.f32 %v12885_v28, %v13976_v44  ;;  %vm14555_vm2 = vcmp.eq.s32.totalorder %v14535_v33, %v12773_v36 }
 0x28d   :  { %9692 = vmatpush3.bf16.msk.msra.mxu0 %vm13030_vm3, %v14160_v13  ;;  %v2303_v63 = vand.u32 4294901760, %v2302_v56  ;;  %v14557_v44 = vmov 0  ;;  %v2310_v59 = vand.u32 4294901760, %v2309_v2  ;;  %v14560_v56 = vand.u32 4294901760, %v12888_v52 }
 0x28e   :  { %9693 = vmatprep.subr.bf16.mxu0 %v14070_v35  ;;  %v14576_v32 = vand.u32 4294901760, %v12911_v31 }
 0x28f   :  { %9119 = vmatpush3.bf16.msk.msra.mxu1 %vm13060_vm8, %v14160_v13  ;;  %vm13128_vm8 = vmpackc.low %vm14541_vm9, %vm14540_vm15  ;;  %vm14545_vm9 = vcmp.eq.s32.totalorder %v14525_v1, %v12773_v36  ;;  %vm14546_vm15 = vcmp.eq.s32.totalorder %v14526_v6, %v12773_v36  ;;  %v13174_v1 = vsub.f32 %v5866_v51, %v5866_v51  ;;  %v13176_v6 = vsub.f32 %v6125_v43, %v6125_v43  ;;  %v14554_v51 = vld [vmem:[#allocation34_spill] sm:$0xff] }
 0x290   :  { %9120 = vmatprep.subr.bf16.mxu1 %v14070_v35  ;;  %v14543_v49 = vsel %vm13128_vm8, 4294967295, %v14542_v49  ;;  %vm13161_vm1 = vmpackc.low %vm14546_vm15, %vm14545_vm9  ;;  %vm14550_vm9 = vcmp.eq.s32.totalorder %v14535_v33, %v12766_v7  ;;  %v5094_v43 = vsub.f32 %v12883_v21, %v13977_v34  ;;  %v2291_v34 = vsub.f32 %v13104_v48, %v13980_v58 }
 0x291   :  { %14544 = vst [vmem:[#allocation45_spill] sm:$0xff] %v14543_v49  ;;  %9695 = vmatpush3.bf16.msk.msra.mxu0 %vm13093_vm5, %v14160_v13  ;;  %v14548_v47 = vsel %vm13161_vm1, 4294967295, %v14547_v47  ;;  %vm13188_vm15 = vmpackc.low %vm2172_vm14, %vm14550_vm9  ;;  %vm2174_vm14 = vcmp.eq.s32.totalorder %v14252_v14, %v12766_v7  ;;  %v2316_v11 = vsub.f32 %v12888_v52, %v14560_v56  ;;  %v9130_v38 = vpack.c.bf16 %v2310_v59, %v2303_v63 }
 0x292   :  { %9696 = vmatprep.subr.bf16.mxu0 %v14070_v35  ;;  %14549 = vst [vmem:[#allocation46_spill] sm:$0xff] %v14548_v47  ;;  %v14552_v62 = vsel %vm13188_vm15, 4294967295, %v14551_v62  ;;  %v14561_v47 = vand.u32 4294901760, %v12890_v39  ;;  %v5095_v56 = vand.u32 4294901760, %v5094_v43  ;;  %v5868_v43 = vsel %vm2174_vm14, 1.0, %v14074_v45 }
 0x293   :  { %9122 = vmatpush3.bf16.msk.msra.mxu1 %vm13128_vm8, %v14160_v13  ;;  %14553 = vst [vmem:[#allocation47_spill] sm:$0xff] %v14552_v62  ;;  %vm14556_vm8 = vcmp.eq.s32.totalorder %v14539_v41, %v12773_v36  ;;  %v14562_v41 = vand.u32 4294901760, %v13119_v25  ;;  %v5102_v62 = vand.u32 4294901760, %v5101_v8  ;;  %v14569_v8 = vand.u32 4294901760, %v12907_v9 }
 0x294   :  { %9123 = vmatprep.subr.bf16.mxu1 %v14070_v35  ;;  %vm13216_vm5 = vmpackc.low %vm14556_vm8, %vm14555_vm2  ;;  %v2323_v33 = vsub.f32 %v12890_v39, %v14561_v47  ;;  %vm14563_vm2 = vcmp.eq.s32.totalorder %v14554_v51, %v12766_v7  ;;  %v14564_v47 = vmov 0  ;;  %v2292_v7 = vand.u32 4294901760, %v2291_v34 }
 0x295   :  { %9698 = vmatpush3.bf16.msk.msra.mxu0 %vm13161_vm1, %v14160_v13  ;;  %v14558_v44 = vsel %vm13216_vm5, 4294967295, %v14557_v44  ;;  %v5083_v58 = vsub.f32 %v13119_v25, %v14562_v41  ;;  %vm13246_vm9 = vmpackc.low %vm2174_vm14, %vm14563_vm2  ;;  %v14567_v41 = vand.u32 4294901760, %v12905_v19  ;;  %v2317_v61 = vand.u32 4294901760, %v2316_v11 }
 0x296   :  { %9699 = vmatprep.subr.bf16.mxu0 %v14070_v35  ;;  %14559 = vst [vmem:[#allocation48_spill] sm:$0xff] %v14558_v44  ;;  %v14565_v47 = vsel %vm13246_vm9, 4294967295, %v14564_v47  ;;  %vm14568_vm8 = vmmov %vm14563_vm2  ;;  %vm14570_vm2 = vcmp.eq.s32.totalorder %v14554_v51, %v12773_v36  ;;  %v14572_v44 = vmov 0  ;;  %v2324_v0 = vand.u32 4294901760, %v2323_v33 }
 0x297   :  { %9125 = vmatpush3.bf16.msk.msra.mxu1 %vm13188_vm15, %v14160_v13  ;;  %14566 = vst [vmem:[#allocation49_spill] sm:$0xff] %v14565_v47  ;;  %v5108_v2 = vsub.f32 %v12905_v19, %v14567_v41  ;;  %v5867_v23 = vsel %vm14568_vm8, 1.0, %v14074_v45  ;;  %v5115_v41 = vsub.f32 %v12907_v9, %v14569_v8  ;;  %v14575_v8 = vand.u32 4294901760, %v12909_v40 }
 0x298   :  { %9126 = vmatprep.subr.bf16.mxu1 %v14070_v35  ;;  %v2337_v60 = vsub.f32 %v12911_v31, %v14576_v32  ;;  %v5084_v59 = vand.u32 4294901760, %v5083_v58  ;;  %v9706_v34 = vpack.c.bf16 %v5102_v62, %v5095_v56  ;;  %v14577_v63 = vand.u32 4294901760, %v12924_v46 }
 0x299   :  { %9701 = vmatpush3.bf16.msk.msra.mxu0 %vm13216_vm5, %v14160_v13  ;;  %vm14571_vm5 = vcmp.eq.s32.totalorder %v14252_v14, %v12773_v36  ;;  %v2330_v49 = vsub.f32 %v12909_v40, %v14575_v8  ;;  %v5109_v11 = vand.u32 4294901760, %v5108_v2  ;;  %v5116_v8 = vand.u32 4294901760, %v5115_v41 }
 0x29a   :  { %9702 = vmatprep.subr.bf16.mxu0 %v14070_v35  ;;  %vm13276_vm8 = vmpackc.low %vm14571_vm5, %vm14570_vm2  ;;  %v5122_v33 = vsub.f32 %v12924_v46, %v14577_v63  ;;  %v14578_v32 = vand.u32 4294901760, %v12926_v22  ;;  %v14009_v47 = vand.u32 4294901760, %v13036_v50  ;;  %v13303_v58 = vsub.f32 %v5867_v23, %v5867_v23 }
 0x29b   :  { %v14573_v44 = vsel %vm13276_vm8, 4294967295, %v14572_v44  ;;  %9128 = vmatpush3.bf16.msk.msra.mxu1 %vm13246_vm9, %v14160_v13  ;;  %v9133_v62 = vpack.c.bf16 %v2324_v0, %v2317_v61  ;;  %v14010_v2 = vand.u32 4294901760, %v13038_v18  ;;  %v14011_v56 = vand.u32 4294901760, %v13045_v17  ;;  %vm14582_vm5 = vmmov %vm14570_vm2 }
 0x29c   :  { %14574 = vst [vmem:[#allocation50_spill] sm:$0xff] %v14573_v44  ;;  %9129 = vmatprep.subr.bf16.mxu1 %v14070_v35  ;;  %v5129_v27 = vsub.f32 %v12926_v22, %v14578_v32  ;;  %v2331_v41 = vand.u32 4294901760, %v2330_v49  ;;  %v2338_v63 = vand.u32 4294901760, %v2337_v60  ;;  %v14579_v44 = vand.u32 4294901760, %v13011_v42 }
 0x29d   :  { %9704 = vmatpush3.bf16.msk.msra.mxu0 %vm13276_vm8, %v14160_v13  ;;  %v2351_v23 = vsub.f32 %v13013_v20, %v14580_v15  ;;  %v5123_v0 = vand.u32 4294901760, %v5122_v33  ;;  %v14012_v61 = vand.u32 4294901760, %v13047_v16  ;;  %v14013_v60 = vand.u32 4294901760, %v13049_v54 }
 0x29e   :  { %9705 = vmatprep.subr.bf16.mxu0 %v14070_v35  ;;  %7656 = vmatmul.mubr.f32.vlgmr.msra.gmra.mrb[0].mxu1 %v2292_v7  ;;  %v2344_v32 = vsub.f32 %v13011_v42, %v14579_v44  ;;  %v13316_v7 = vsub.f32 %v5868_v43, %v5868_v43  ;;  %v5130_v49 = vand.u32 4294901760, %v5129_v27  ;;  %v14581_v44 = vand.u32 4294901760, %v13034_v26 }
 0x29f   :  { %9131 = vmatpush3.bf16.msra.mxu1 %v9130_v38  ;;  %7690 = vmatprep.mubr.msk.f32.mxu1 %vm14105_vm0, %v14074_v45  ;;  %v9709_v38 = vpack.c.bf16 %v5116_v8, %v5109_v11  ;;  %v5143_v43 = vsub.f32 %v13036_v50, %v14009_v47  ;;  %v2365_v27 = vsub.f32 %v13045_v17, %v14011_v56  ;;  %v6127_v33 = vsel %vm14582_vm5, 1.0, %v14074_v45 }
 0x2a0   :  { %8496 = vmatmul.mubr.f32.vlgmr.msra.gmra.mrb[0].mxu0 %v5084_v59  ;;  %9132 = vmatprep.subr.bf16.mxu1 %v14070_v35  ;;  %v5136_v15 = vsub.f32 %v13034_v26, %v14581_v44  ;;  %v2358_v59 = vsub.f32 %v13038_v18, %v14010_v2  ;;  %v9136_v8 = vpack.c.bf16 %v2338_v63, %v2331_v41  ;;  %v2345_v44 = vand.u32 4294901760, %v2344_v32 }
 0x2a1   :  { %9707 = vmatpush3.bf16.msra.mxu0 %v9706_v34  ;;  %8530 = vmatprep.mubr.msk.f32.mxu0 %vm14105_vm0, %v14074_v45  ;;  %v2352_v47 = vand.u32 4294901760, %v2351_v23  ;;  %v5150_v2 = vsub.f32 %v13047_v16, %v14012_v61  ;;  %v5157_v56 = vsub.f32 %v13049_v54, %v14013_v60  ;;  %vm14583_vm14 = vcmp.eq.s32.totalorder %v14252_v14, %v12773_v36 }
 0x2a2   :  { %9708 = vmatprep.subr.bf16.mxu0 %v14070_v35  ;;  %v6128_v51 = vsel %vm14583_vm14, 1.0, %v14074_v45  ;;  %v5137_v41 = vand.u32 4294901760, %v5136_v15  ;;  %v5144_v63 = vand.u32 4294901760, %v5143_v43  ;;  %v2359_v32 = vand.u32 4294901760, %v2358_v59 }
 0x2a3   :  { %9134 = vmatpush3.bf16.msra.mxu1 %v9133_v62  ;;  %v9712_v62 = vpack.c.bf16 %v5130_v49, %v5123_v0  ;;  %v2366_v23 = vand.u32 4294901760, %v2365_v27  ;;  %v14584_v61 = vand.u32 4294901760, %v13064_v5  ;;  %v14585_v11 = vand.u32 4294901760, %v13066_v57 }
 0x2a4   :  { %9135 = vmatprep.subr.bf16.mxu1 %v14070_v35  ;;  %v13362_v30 = vsub.f32 %v6127_v33, %v6127_v33  ;;  %v9139_v14 = vpack.c.bf16 %v2352_v47, %v2345_v44  ;;  %v2385_v36 = vand.u32 4294901760, %v13149_v53  ;;  %v2392_v0 = vand.u32 4294901760, %v13174_v1 }
 0x2a5   :  { %9710 = vmatpush3.bf16.msra.mxu0 %v9709_v38  ;;  %v2372_v60 = vsub.f32 %v13064_v5, %v14584_v61  ;;  %v2379_v34 = vsub.f32 %v13066_v57, %v14585_v11  ;;  %v5151_v38 = vand.u32 4294901760, %v5150_v2  ;;  %v5158_v49 = vand.u32 4294901760, %v5157_v56 }
 0x2a6   :  { %9711 = vmatprep.subr.bf16.mxu0 %v14070_v35  ;;  %v14586_v15 = vand.u32 4294901760, %v13145_v37  ;;  %v14587_v43 = vand.u32 4294901760, %v13147_v10  ;;  %v13373_v27 = vsub.f32 %v6128_v51, %v6128_v51  ;;  %v9715_v47 = vpack.c.bf16 %v5144_v63, %v5137_v41 }
 0x2a7   :  { %9137 = vmatpush3.bf16.msra.mxu1 %v9136_v8  ;;  %v14017_v11 = vand.u32 4294901760, %v13176_v6  ;;  %v14016_v33 = vand.u32 4294901760, %v13178_v3  ;;  %v9142_v2 = vpack.c.bf16 %v2366_v23, %v2359_v32  ;;  %v2373_v56 = vand.u32 4294901760, %v2372_v60 }
 0x2a8   :  { %9138 = vmatprep.subr.bf16.mxu1 %v14070_v35  ;;  %v5164_v61 = vsub.f32 %v13145_v37, %v14586_v15  ;;  %v5171_v59 = vsub.f32 %v13147_v10, %v14587_v43  ;;  %v2380_v8 = vand.u32 4294901760, %v2379_v34  ;;  %v2386_v44 = vsub.f32 %v13149_v53, %v2385_v36 }
 0x2a9   :  { %9713 = vmatpush3.bf16.msra.mxu0 %v9712_v62  ;;  %v2393_v51 = vsub.f32 %v13174_v1, %v2392_v0  ;;  %v14021_v62 = vand.u32 4294901760, %v13303_v58  ;;  %v14020_v41 = vand.u32 4294901760, %v13316_v7  ;;  %v9718_v63 = vpack.c.bf16 %v5158_v49, %v5151_v38 }
 0x2aa   :  { %9714 = vmatprep.subr.bf16.mxu0 %v14070_v35  ;;  %v5165_v15 = vand.u32 4294901760, %v5164_v61  ;;  %v5172_v32 = vand.u32 4294901760, %v5171_v59  ;;  %v5178_v60 = vsub.f32 %v13176_v6, %v14017_v11  ;;  %v5185_v34 = vsub.f32 %v13178_v3, %v14016_v33 }
 0x2ab   :  { %9140 = vmatpush3.bf16.msra.mxu1 %v9139_v14  ;;  %v14019_v23 = vand.u32 4294901760, %v13362_v30  ;;  %v14018_v14 = vand.u32 4294901760, %v13373_v27  ;;  %v9145_v43 = vpack.c.bf16 %v2380_v8, %v2373_v56  ;;  %v2387_v38 = vand.u32 4294901760, %v2386_v44 }
 0x2ac   :  { %9141 = vmatprep.subr.bf16.mxu1 %v14070_v35  ;;  %v2394_v49 = vand.u32 4294901760, %v2393_v51  ;;  %v2400_v61 = vsub.f32 %v13303_v58, %v14021_v62  ;;  %v2407_v59 = vsub.f32 %v13316_v7, %v14020_v41  ;;  %v5179_v33 = vand.u32 4294901760, %v5178_v60 }
 0x2ad   :  { %9716 = vmatpush3.bf16.msra.mxu0 %v9715_v47  ;;  %v9721_v47 = vpack.c.bf16 %v5172_v32, %v5165_v15  ;;  %v5186_v11 = vand.u32 4294901760, %v5185_v34  ;;  %v5199_v56 = vsub.f32 %v13373_v27, %v14018_v14  ;;  %v14609_v14 = vand.u32 4294901760, %v12883_v21 }
 0x2ae   :  { %9717 = vmatprep.subr.bf16.mxu0 %v14070_v35  ;;  %v9148_v8 = vpack.c.bf16 %v2394_v49, %v2387_v38  ;;  %v2401_v44 = vand.u32 4294901760, %v2400_v61  ;;  %v2408_v51 = vand.u32 4294901760, %v2407_v59  ;;  %v9733_v38 = vpack.c.bf16 %v12907_v9, %v12905_v19 }
 0x2af   :  { %9143 = vmatpush3.bf16.msra.mxu1 %v9142_v2  ;;  %v5192_v2 = vsub.f32 %v13362_v30, %v14019_v23  ;;  %v5200_v32 = vand.u32 4294901760, %v5199_v56  ;;  %v9160_v49 = vpack.c.bf16 %v12911_v31, %v12909_v40  ;;  %v9736_v61 = vpack.c.bf16 %v12926_v22, %v12924_v46 }
 0x2b0   :  { %9144 = vmatprep.subr.bf16.mxu1 %v14070_v35  ;;  %v9151_v60 = vpack.c.bf16 %v2408_v51, %v2401_v44  ;;  %v9163_v59 = vpack.c.bf16 %v13013_v20, %v13011_v42  ;;  %v9742_v56 = vpack.c.bf16 %v13049_v54, %v13047_v16  ;;  %v9745_v44 = vpack.c.bf16 %v13147_v10, %v13145_v37 }
 0x2b1   :  { %9719 = vmatpush3.bf16.msra.mxu0 %v9718_v63  ;;  %v9724_v63 = vpack.c.bf16 %v5186_v11, %v5179_v33  ;;  %v5193_v15 = vand.u32 4294901760, %v5192_v2  ;;  %v9730_v11 = vpack.c.bf16 %v12885_v28, %v12883_v21  ;;  %v9157_v33 = vpack.c.bf16 %v12890_v39, %v12888_v52 }
 0x2b2   :  { %9720 = vmatprep.subr.bf16.mxu0 %v14070_v35  ;;  %v9166_v2 = vpack.c.bf16 %v13045_v17, %v13038_v18  ;;  %v9172_v51 = vpack.c.bf16 %v13174_v1, %v13149_v53  ;;  %v14610_v23 = vand.u32 4294901760, %v12885_v28  ;;  %v14611_v62 = vand.u32 4294901760, %v13104_v48 }
 0x2b3   :  { %9146 = vmatpush3.bf16.msra.mxu1 %v9145_v43  ;;  %v9727_v34 = vpack.c.bf16 %v5200_v32, %v5193_v15  ;;  %v9154_v43 = vpack.c.bf16 %v12868_v29, %v12866_v4  ;;  %v9175_v15 = vpack.c.bf16 %v13316_v7, %v13303_v58  ;;  %v9751_v32 = vpack.c.bf16 %v13373_v27, %v13362_v30 }
 0x2b4   :  { %9147 = vmatprep.subr.bf16.mxu1 %v14070_v35  ;;  %v9778_v41 = vpack.c.bf16 %v14610_v23, %v14609_v14  ;;  %v14615_v21 = vand.u32 4294901760, %v12905_v19  ;;  %v14616_v28 = vand.u32 4294901760, %v12907_v9  ;;  %v14620_v19 = vand.u32 4294901760, %v12926_v22 }
 0x2b5   :  { %9722 = vmatpush3.bf16.msra.mxu0 %v9721_v47  ;;  %v9739_v47 = vpack.c.bf16 %v13036_v50, %v13034_v26  ;;  %v14622_v23 = vand.u32 4294901760, %v13013_v20  ;;  %v14626_v22 = vand.u32 4294901760, %v13045_v17  ;;  %v14628_v20 = vand.u32 4294901760, %v13049_v54 }
 0x2b6   :  { %9723 = vmatprep.subr.bf16.mxu0 %v14070_v35  ;;  %v14632_v17 = vand.u32 4294901760, %v13147_v10  ;;  %v14633_v54 = vand.u32 4294901760, %v13176_v6  ;;  %v14636_v10 = vand.u32 4294901760, %v13316_v7  ;;  %v14637_v53 = vand.u32 4294901760, %v13362_v30 }
 0x2b7   :  { %9149 = vmatpush3.bf16.msra.mxu1 %v9148_v8  ;;  %v9169_v8 = vpack.c.bf16 %v13066_v57, %v13064_v5  ;;  %v14638_v1 = vand.u32 4294901760, %v13373_v27 }
 0x2b8   :  { %9150 = vmatprep.subr.bf16.mxu1 %v14070_v35 }
 0x2b9   :  { %9725 = vmatpush3.bf16.msra.mxu0 %v9724_v63  ;;  %v9748_v63 = vpack.c.bf16 %v13178_v3, %v13176_v6 }
 0x2ba   :  { %9726 = vmatprep.subr.bf16.mxu0 %v14070_v35 }
 0x2bb   :  { %9152 = vmatpush3.bf16.msra.mxu1 %v9151_v60 }
 0x2bc   :  { %9153 = vmatprep.subr.bf16.mxu1 %v14070_v35 }
 0x2bd   :  { %9728 = vmatpush3.bf16.msra.mxu0 %v9727_v34 }
 0x2be   :  { %9729 = vmatprep.subr.bf16.mxu0 %v14070_v35  ;;  %7691 = vmatmul.mubr.f32.vlgmr.msra.gmra.mrb[0].mxu1 %v13040_v12 }
 0x2bf   :  { %9155 = vmatpush3.bf16.msra.mxu1 %v9154_v43  ;;  %7725 = vmatprep.mubr.msk.f32.mxu1 %vm14105_vm0, %v14074_v45 }
 0x2c0   :  { %8531 = vmatmul.mubr.f32.vlgmr.msra.gmra.mrb[0].mxu0 %v13051_v55  ;;  %9156 = vmatprep.subr.bf16.mxu1 %v14070_v35 }
 0x2c1   :  { %9731 = vmatpush3.bf16.msra.mxu0 %v9730_v11  ;;  %8565 = vmatprep.mubr.msk.f32.mxu0 %vm14105_vm0, %v14074_v45 }
 0x2c2   :  { %9732 = vmatprep.subr.bf16.mxu0 %v14070_v35 }
 0x2c3   :  { %9158 = vmatpush3.bf16.msra.mxu1 %v9157_v33 }
 0x2c4   :  { %9159 = vmatprep.subr.bf16.mxu1 %v14070_v35 }
 0x2c5   :  { %9734 = vmatpush3.bf16.msra.mxu0 %v9733_v38 }
 0x2c6   :  { %9735 = vmatprep.subr.bf16.mxu0 %v14070_v35 }
 0x2c7   :  { %9161 = vmatpush3.bf16.msra.mxu1 %v9160_v49 }
 0x2c8   :  { %9162 = vmatprep.subr.bf16.mxu1 %v14070_v35 }
 0x2c9   :  { %9737 = vmatpush3.bf16.msra.mxu0 %v9736_v61  ;;  %v14595_v61 = vld [vmem:[#allocation43_spill] sm:$0xff] }
 0x2ca   :  { %9738 = vmatprep.subr.bf16.mxu0 %v14070_v35  ;;  %vm14596_vm2 = vnez %v14595_v61 }
 0x2cb   :  { %9164 = vmatpush3.bf16.msra.mxu1 %v9163_v59  ;;  %v14597_v59 = vld [vmem:[#allocation44_spill] sm:$0xff] }
 0x2cc   :  { %9165 = vmatprep.subr.bf16.mxu1 %v14070_v35  ;;  %vm14598_vm5 = vnez %v14597_v59 }
 0x2cd   :  { %9740 = vmatpush3.bf16.msra.mxu0 %v9739_v47  ;;  %v14599_v47 = vld [vmem:[#allocation45_spill] sm:$0xff] }
 0x2ce   :  { %9741 = vmatprep.subr.bf16.mxu0 %v14070_v35  ;;  %vm14600_vm14 = vnez %v14599_v47 }
 0x2cf   :  { %9167 = vmatpush3.bf16.msra.mxu1 %v9166_v2 }
 0x2d0   :  { %9168 = vmatprep.subr.bf16.mxu1 %v14070_v35 }
 0x2d1   :  { %9743 = vmatpush3.bf16.msra.mxu0 %v9742_v56 }
 0x2d2   :  { %9744 = vmatprep.subr.bf16.mxu0 %v14070_v35 }
 0x2d3   :  { %9170 = vmatpush3.bf16.msra.mxu1 %v9169_v8  ;;  %v14603_v8 = vld [vmem:[#allocation48_spill] sm:$0xff] }
 0x2d4   :  { %9171 = vmatprep.subr.bf16.mxu1 %v14070_v35 }
 0x2d5   :  { %9746 = vmatpush3.bf16.msra.mxu0 %v9745_v44 }
 0x2d6   :  { %9747 = vmatprep.subr.bf16.mxu0 %v14070_v35 }
 0x2d7   :  { %9173 = vmatpush3.bf16.msra.mxu1 %v9172_v51  ;;  %v14606_v51 = vand.u32 4294901760, %v12866_v4  ;;  %v14612_v4 = vand.u32 4294901760, %v12888_v52  ;;  %v14617_v52 = vand.u32 4294901760, %v12909_v40  ;;  %v14623_v40 = vand.u32 4294901760, %v13034_v26 }
 0x2d8   :  { %9174 = vmatprep.subr.bf16.mxu1 %v14070_v35  ;;  %v14629_v26 = vand.u32 4294901760, %v13064_v5  ;;  %v14634_v5 = vand.u32 4294901760, %v13178_v3 }
 0x2d9   :  { %9749 = vmatpush3.bf16.msra.mxu0 %v9748_v63  ;;  %v14607_v63 = vand.u32 4294901760, %v12868_v29  ;;  %v14613_v29 = vand.u32 4294901760, %v12890_v39  ;;  %v14618_v39 = vand.u32 4294901760, %v12911_v31  ;;  %v14624_v31 = vand.u32 4294901760, %v13036_v50 }
 0x2da   :  { %9750 = vmatprep.subr.bf16.mxu0 %v14070_v35  ;;  %v14630_v50 = vand.u32 4294901760, %v13066_v57  ;;  %v9796_v57 = vpack.c.bf16 %v14634_v5, %v14633_v54 }
 0x2db   :  { %9176 = vmatpush3.bf16.msra.mxu1 %v9175_v15  ;;  %v9202_v15 = vpack.c.bf16 %v14607_v63, %v14606_v51  ;;  %v9205_v51 = vpack.c.bf16 %v14613_v29, %v14612_v4  ;;  %v14614_v63 = vand.u32 4294901760, %v13119_v25 }
 0x2dc   :  { %9177 = vmatprep.subr.bf16.mxu1 %v14070_v35 }
 0x2dd   :  { %9752 = vmatpush3.bf16.msra.mxu0 %v9751_v32 }
 0x2de   :  { %9753 = vmatprep.subr.bf16.mxu0 %v14070_v35  ;;  %7726 = vmatmul.mubr.f32.vlgmr.msra.gmra.mrb[0].mxu1 %v13104_v48  ;;  %v9781_v48 = vpack.c.bf16 %v14616_v28, %v14615_v21 }
 0x2df   :  { %9179 = vmatpush3.bf16.msk.msra.mxu1 %vm12794_vm4, %v14160_v13  ;;  %7760 = vmatprep.mubr.msk.f32.mxu1 %vm14105_vm0, %v14074_v45 }
 0x2e0   :  { %8566 = vmatmul.mubr.f32.vlgmr.msra.gmra.mrb[0].mxu0 %v13119_v25  ;;  %9180 = vmatprep.subr.bf16.mxu1 %v14070_v35  ;;  %v9208_v25 = vpack.c.bf16 %v14618_v39, %v14617_v52 }
 0x2e1   :  { %9755 = vmatpush3.bf16.msk.msra.mxu0 %vm12809_vm11, %v14160_v13  ;;  %8600 = vmatprep.mubr.msk.f32.mxu0 %vm14105_vm0, %v14074_v45 }
 0x2e2   :  { %9756 = vmatprep.subr.bf16.mxu0 %v14070_v35 }
 0x2e3   :  { %9182 = vmatpush3.bf16.msk.msra.mxu1 %vm12850_vm7, %v14160_v13 }
 0x2e4   :  { %9183 = vmatprep.subr.bf16.mxu1 %v14070_v35 }
 0x2e5   :  { %9758 = vmatpush3.bf16.msk.msra.mxu0 %vm12898_vm6, %v14160_v13 }
 0x2e6   :  { %9759 = vmatprep.subr.bf16.mxu0 %v14070_v35 }
 0x2e7   :  { %9185 = vmatpush3.bf16.msk.msra.mxu1 %vm12920_vm10, %v14160_v13 }
 0x2e8   :  { %9186 = vmatprep.subr.bf16.mxu1 %v14070_v35 }
 0x2e9   :  { %9761 = vmatpush3.bf16.msk.msra.mxu0 %vm12954_vm12, %v14160_v13 }
 0x2ea   :  { %9762 = vmatprep.subr.bf16.mxu0 %v14070_v35 }
 0x2eb   :  { %9188 = vmatpush3.bf16.msk.msra.mxu1 %vm12992_vm13, %v14160_v13 }
 0x2ec   :  { %9189 = vmatprep.subr.bf16.mxu1 %v14070_v35 }
 0x2ed   :  { %9764 = vmatpush3.bf16.msk.msra.mxu0 %vm13030_vm3, %v14160_v13 }
 0x2ee   :  { %9765 = vmatprep.subr.bf16.mxu0 %v14070_v35 }
 0x2ef   :  { %9191 = vmatpush3.bf16.msk.msra.mxu1 %vm14596_vm2, %v14160_v13 }
 0x2f0   :  { %9192 = vmatprep.subr.bf16.mxu1 %v14070_v35 }
 0x2f1   :  { %9767 = vmatpush3.bf16.msk.msra.mxu0 %vm14598_vm5, %v14160_v13  ;;  %vm14604_vm5 = vnez %v14603_v8 }
 0x2f2   :  { %9768 = vmatprep.subr.bf16.mxu0 %v14070_v35 }
 0x2f3   :  { %9194 = vmatpush3.bf16.msk.msra.mxu1 %vm14600_vm14, %v14160_v13 }
 0x2f4   :  { %9195 = vmatprep.subr.bf16.mxu1 %v14070_v35 }
 0x2f5   :  { %9770 = vmatpush3.bf16.msk.msra.mxu0 %vm13161_vm1, %v14160_v13 }
 0x2f6   :  { %9771 = vmatprep.subr.bf16.mxu0 %v14070_v35 }
 0x2f7   :  { %9197 = vmatpush3.bf16.msk.msra.mxu1 %vm13188_vm15, %v14160_v13 }
 0x2f8   :  { %9198 = vmatprep.subr.bf16.mxu1 %v14070_v35 }
 0x2f9   :  { %9773 = vmatpush3.bf16.msk.msra.mxu0 %vm14604_vm5, %v14160_v13 }
 0x2fa   :  { %9774 = vmatprep.subr.bf16.mxu0 %v14070_v35 }
 0x2fb   :  { %9200 = vmatpush3.bf16.msk.msra.mxu1 %vm13246_vm9, %v14160_v13 }
 0x2fc   :  { %9201 = vmatprep.subr.bf16.mxu1 %v14070_v35 }
 0x2fd   :  { %9776 = vmatpush3.bf16.msk.msra.mxu0 %vm13276_vm8, %v14160_v13 }
 0x2fe   :  { %9777 = vmatprep.subr.bf16.mxu0 %v14070_v35  ;;  %7761 = vmatmul.mubr.f32.vlgmr.msra.gmra.mrb[0].mxu1 %v14611_v62  ;;  %v14619_v62 = vand.u32 4294901760, %v12924_v46  ;;  %v14625_v46 = vand.u32 4294901760, %v13038_v18  ;;  %v14631_v18 = vand.u32 4294901760, %v13145_v37  ;;  %v14635_v37 = vand.u32 4294901760, %v13303_v58 }
 0x2ff   :  { %9203 = vmatpush3.bf16.msra.mxu1 %v9202_v15  ;;  %7795 = vmatprep.mubr.msk.f32.mxu1 %vm14105_vm0, %v14074_v45  ;;  %v9787_v15 = vpack.c.bf16 %v14624_v31, %v14623_v40 }
 0x300   :  { %8601 = vmatmul.mubr.f32.vlgmr.msra.gmra.mrb[0].mxu0 %v14614_v63  ;;  %9204 = vmatprep.subr.bf16.mxu1 %v14070_v35  ;;  %v9784_v9 = vpack.c.bf16 %v14620_v19, %v14619_v62  ;;  %v9214_v4 = vpack.c.bf16 %v14626_v22, %v14625_v46  ;;  %v9793_v63 = vpack.c.bf16 %v14632_v17, %v14631_v18 }
 0x301   :  { %9779 = vmatpush3.bf16.msra.mxu0 %v9778_v41  ;;  %8635 = vmatprep.mubr.msk.f32.mxu0 %vm14105_vm0, %v14074_v45  ;;  %v14621_v41 = vand.u32 4294901760, %v13011_v42  ;;  %v14627_v42 = vand.u32 4294901760, %v13047_v16  ;;  %v9220_v16 = vpack.c.bf16 %v2392_v0, %v2385_v36  ;;  %v9223_v21 = vpack.c.bf16 %v14636_v10, %v14635_v37 }
 0x302   :  { %9780 = vmatprep.subr.bf16.mxu0 %v14070_v35  ;;  %v9799_v36 = vpack.c.bf16 %v14638_v1, %v14637_v53 }
 0x303   :  { %9206 = vmatpush3.bf16.msra.mxu1 %v9205_v51  ;;  %v9211_v14 = vpack.c.bf16 %v14622_v23, %v14621_v41  ;;  %v9790_v29 = vpack.c.bf16 %v14628_v20, %v14627_v42  ;;  %v9217_v51 = vpack.c.bf16 %v14630_v50, %v14629_v26 }
 0x304   :  { %9207 = vmatprep.subr.bf16.mxu1 %v14070_v35 }
 0x305   :  { %9782 = vmatpush3.bf16.msra.mxu0 %v9781_v48 }
 0x306   :  { %9783 = vmatprep.subr.bf16.mxu0 %v14070_v35 }
 0x307   :  { %9209 = vmatpush3.bf16.msra.mxu1 %v9208_v25 }
 0x308   :  { %9210 = vmatprep.subr.bf16.mxu1 %v14070_v35 }
 0x309   :  { %9785 = vmatpush3.bf16.msra.mxu0 %v9784_v9 }
 0x30a   :  { %9786 = vmatprep.subr.bf16.mxu0 %v14070_v35 }
 0x30b   :  { %9212 = vmatpush3.bf16.msra.mxu1 %v9211_v14 }
 0x30c   :  { %9213 = vmatprep.subr.bf16.mxu1 %v14070_v35 }
 0x30d   :  { %9788 = vmatpush3.bf16.msra.mxu0 %v9787_v15 }
 0x30e   :  { %9789 = vmatprep.subr.bf16.mxu0 %v14070_v35 }
 0x30f   :  { %9215 = vmatpush3.bf16.msra.mxu1 %v9214_v4 }
 0x310   :  { %9216 = vmatprep.subr.bf16.mxu1 %v14070_v35 }
 0x311   :  { %9791 = vmatpush3.bf16.msra.mxu0 %v9790_v29 }
 0x312   :  { %9792 = vmatprep.subr.bf16.mxu0 %v14070_v35 }
 0x313   :  { %9218 = vmatpush3.bf16.msra.mxu1 %v9217_v51 }
 0x314   :  { %9219 = vmatprep.subr.bf16.mxu1 %v14070_v35 }
 0x315   :  { %9794 = vmatpush3.bf16.msra.mxu0 %v9793_v63 }
 0x316   :  { %9795 = vmatprep.subr.bf16.mxu0 %v14070_v35 }
 0x317   :  { %9221 = vmatpush3.bf16.msra.mxu1 %v9220_v16 }
 0x318   :  { %9222 = vmatprep.subr.bf16.mxu1 %v14070_v35 }
 0x319   :  { %9797 = vmatpush3.bf16.msra.mxu0 %v9796_v57 }
 0x31a   :  { %9798 = vmatprep.subr.bf16.mxu0 %v14070_v35 }
 0x31b   :  { %9224 = vmatpush3.bf16.msra.mxu1 %v9223_v21 }
 0x31c   :  { %9225 = vmatprep.subr.bf16.mxu1 %v14070_v35 }
 0x31d   :  { %9800 = vmatpush3.bf16.msra.mxu0 %v9799_v36 }
 0x31e   :  { %9801 = vmatprep.subr.bf16.mxu0 %v14070_v35  ;;  %7796 = vmatmul.mubr.f32.vlgmr.msra.gmra.mrb[0].mxu1 %v13040_v12 }
 0x31f   :  { %9227 = vmatpush3.bf16.msk.msra.mxu1 %vm12794_vm4, %v14160_v13  ;;  %7830 = vmatprep.mubr.msk.f32.mxu1 %vm14105_vm0, %v14074_v45 }
 0x320   :  { %8636 = vmatmul.mubr.f32.vlgmr.msra.gmra.mrb[0].mxu0 %v13051_v55  ;;  %9228 = vmatprep.subr.bf16.mxu1 %v14070_v35 }
 0x321   :  { %9803 = vmatpush3.bf16.msk.msra.mxu0 %vm12809_vm11, %v14160_v13  ;;  %8670 = vmatprep.mubr.msk.f32.mxu0 %vm14105_vm0, %v14074_v45  ;;  %vm14639_vm0 = vnez %v14597_v59 }
 0x322   :  { %9804 = vmatprep.subr.bf16.mxu0 %v14070_v35 }
 0x323   :  { %9230 = vmatpush3.bf16.msk.msra.mxu1 %vm12850_vm7, %v14160_v13 }
 0x324   :  { %9231 = vmatprep.subr.bf16.mxu1 %v14070_v35 }
 0x325   :  { %9806 = vmatpush3.bf16.msk.msra.mxu0 %vm12898_vm6, %v14160_v13 }
 0x326   :  { %9807 = vmatprep.subr.bf16.mxu0 %v14070_v35 }
 0x327   :  { %9233 = vmatpush3.bf16.msk.msra.mxu1 %vm12920_vm10, %v14160_v13 }
 0x328   :  { %9234 = vmatprep.subr.bf16.mxu1 %v14070_v35 }
 0x329   :  { %9809 = vmatpush3.bf16.msk.msra.mxu0 %vm12954_vm12, %v14160_v13 }
 0x32a   :  { %9810 = vmatprep.subr.bf16.mxu0 %v14070_v35 }
 0x32b   :  { %9236 = vmatpush3.bf16.msk.msra.mxu1 %vm12992_vm13, %v14160_v13 }
 0x32c   :  { %9237 = vmatprep.subr.bf16.mxu1 %v14070_v35 }
 0x32d   :  { %9812 = vmatpush3.bf16.msk.msra.mxu0 %vm13030_vm3, %v14160_v13 }
 0x32e   :  { %9813 = vmatprep.subr.bf16.mxu0 %v14070_v35 }
 0x32f   :  { %9239 = vmatpush3.bf16.msk.msra.mxu1 %vm14596_vm2, %v14160_v13 }
 0x330   :  { %9240 = vmatprep.subr.bf16.mxu1 %v14070_v35 }
 0x331   :  { %9815 = vmatpush3.bf16.msk.msra.mxu0 %vm14639_vm0, %v14160_v13 }
 0x332   :  { %9816 = vmatprep.subr.bf16.mxu0 %v14070_v35 }
 0x333   :  { %9242 = vmatpush3.bf16.msk.msra.mxu1 %vm14600_vm14, %v14160_v13 }
 0x334   :  { %9243 = vmatprep.subr.bf16.mxu1 %v14070_v35 }
 0x335   :  { %9818 = vmatpush3.bf16.msk.msra.mxu0 %vm13161_vm1, %v14160_v13 }
 0x336   :  { %9819 = vmatprep.subr.bf16.mxu0 %v14070_v35 }
 0x337   :  { %9245 = vmatpush3.bf16.msk.msra.mxu1 %vm13188_vm15, %v14160_v13 }
 0x338   :  { %9246 = vmatprep.subr.bf16.mxu1 %v14070_v35 }
 0x339   :  { %9821 = vmatpush3.bf16.msk.msra.mxu0 %vm14604_vm5, %v14160_v13 }
 0x33a   :  { %9822 = vmatprep.subr.bf16.mxu0 %v14070_v35 }
 0x33b   :  { %9248 = vmatpush3.bf16.msk.msra.mxu1 %vm13246_vm9, %v14160_v13 }
 0x33d   :  { %9824 = vmatpush3.bf16.msk.msra.mxu0 %vm13276_vm8, %v14160_v13 }
 0x33e   :  { %7831 = vmatmul.mubr.f32.vlgmr.msra.gmra.mrb[0].mxu1 %v13040_v12 }
 0x340   :  { %8671 = vmatmul.mubr.f32.vlgmr.msra.gmra.mrb[0].mxu0 %v13051_v55 }
 0x411   :  { %v2844_v45 = vpop.f32.mrb[0].mxu1 }
 0x412   :  { %v7832_v24 = vpop.f32.mrb[1].mxu1 }
 0x413   :  { %v5636_v30 = vpop.f32.mrb[0].mxu0 }
 0x414   :  { %v9825_v6 = vadd.f32 %v5636_v30, %v2844_v45  ;;  %v8672_v3 = vpop.f32.mrb[1].mxu0 }
 0x416   :  { %5641 = vst [vmem:[#allocation7] sm:$0x1] %v9825_v6 }
 0x417   :  { %9983 = shalt.err (!%p9980_p6)
}
 0x418   :  { %s9984_s10 = scalar_lea.hbm %s13712_s2, 16 }
 0x419   :  { %p9985_p7 = scmp.ne.s32.totalorder %s13712_s2, %s9984_s10  ;;  %p9988_p8 = scmp.lt.u32.totalorder %s9984_s10, %s13712_s2 }
 0x41b   :  { %p9990_p9 = pnand %p9988_p8, %p9985_p7 }
 0x41d   :  { %9993 = shalt.err (!%p9990_p9)
}
 0x41e   :  { %5651 = dma.vmem_to_hbm [thread:$0]  %s5649_s5, 16, %s13712_s2, [#allocation4]  }
 0x41f   :  { %9998 = dma.done.wait [#allocation4], 16  }
 0x420   :  { %9999 = vsyncadd [#allocation4], 4294967280 }
 0x421   :  { %5655 = vsyncpa [#allocation3], 1 }
 0x422   :  { %5656 = vsyncpa [#allocation6], 1 }
 0x423   :  { %5657 = vsyncpa [#allocation4], 1 }

</bundles_post_ra>
